<compile_context>
chip_gen: v7x
topology: tpu7x:2x2x1
jax: 0.10.0
libtpu: 0.0.40
codegen_flags: <defaults>
</compile_context>

<pallas_src>
import functools

import jax
import jax.numpy as jnp
from jax import lax
from jax.experimental import pallas as pl
from jax.experimental.pallas import tpu as pltpu


# Padded (lane-aligned) hidden sizes. Padding is with zero weight columns/rows
# and zero bias, so padded hidden lanes stay exactly 0 through the recurrence.
H1_PAD = 128
H2_PAD = 128
GATE_PERM = (0, 1, 3, 2)  # PyTorch gate order [i, f, g, o] -> kernel [i, f, o, g]


# ----------------------------------------------------------------------------
# Fused kernel: layer-1 projection -> layer-1 recurrence -> layer-2 projection
#               -> layer-2 recurrence -> FC head on the last hidden state.
# ----------------------------------------------------------------------------
def _fused_lstm_kernel(x_ref, wih1_ref, whh1_ref, b1_ref,
                       wih2_ref, whh2_ref, b2_ref,
                       fcw_ref, fcb_ref,
                       o_ref,
                       gx1_scr, out1_scr, gx2_scr,
                       *, t_steps, bp):
    h1p = whh1_ref.shape[0]
    h2p = whh2_ref.shape[0]
    unroll = t_steps <= 32  # small static T: full unroll (max LLO visibility)

    def run_loop(n, body, init):
        if unroll:
            carry = init
            for t in range(n):
                carry = body(t, carry)
            return carry
        return lax.fori_loop(0, n, body, init)

    def row_start(t):
        if isinstance(t, int):
            return t * bp
        return pl.multiple_of(t * bp, bp)

    # ---- Phase 1: layer-1 input projection for the whole sequence (1 matmul).
    gx1_scr[...] = (
        jnp.dot(x_ref[...], wih1_ref[...], preferred_element_type=jnp.float32)
        + b1_ref[...]
    )

    # ---- Phase 2: layer-1 recurrence; only h @ W_hh inside the loop.
    def step1(t, carry):
        h, c = carry
        row = row_start(t)
        gates = gx1_scr[pl.ds(row, bp), :] + jnp.dot(
            h, whh1_ref[...], preferred_element_type=jnp.float32)
        sig = jax.nn.sigmoid(gates[:, :3 * h1p])        # [i | f | o] in one EUP pass
        g = jnp.tanh(gates[:, 3 * h1p:])                # g
        c_new = sig[:, h1p:2 * h1p] * c + sig[:, :h1p] * g
        h_new = sig[:, 2 * h1p:3 * h1p] * jnp.tanh(c_new)
        out1_scr[pl.ds(row, bp), :] = h_new
        return (h_new, c_new)

    z1 = jnp.zeros((bp, h1p), jnp.float32)
    run_loop(t_steps, step1, (z1, z1))

    # dropout(0.2) between layers: identity in eval mode.

    # ---- Phase 3: layer-2 input projection over the VMEM-resident out1.
    gx2_scr[...] = (
        jnp.dot(out1_scr[...], wih2_ref[...], preferred_element_type=jnp.float32)
        + b2_ref[...]
    )

    # ---- Phase 4: layer-2 recurrence (only the final hidden state is needed).
    def step2(t, carry):
        h, c = carry
        row = row_start(t)
        gates = gx2_scr[pl.ds(row, bp), :] + jnp.dot(
            h, whh2_ref[...], preferred_element_type=jnp.float32)
        sig = jax.nn.sigmoid(gates[:, :3 * h2p])
        g = jnp.tanh(gates[:, 3 * h2p:])
        c_new = sig[:, h2p:2 * h2p] * c + sig[:, :h2p] * g
        h_new = sig[:, 2 * h2p:3 * h2p] * jnp.tanh(c_new)
        return (h_new, c_new)

    z2 = jnp.zeros((bp, h2p), jnp.float32)
    h_last, _ = run_loop(t_steps, step2, (z2, z2))

    # ---- Phase 5: FC head as VPU multiply + lane reduction (no N=1 MXU pass).
    o_ref[...] = (
        jnp.sum(h_last * fcw_ref[...], axis=-1, keepdims=True) + fcb_ref[...]
    )


def _fused_forward(x2d, packed, *, t_steps, bp):
    in_dim = x2d.shape[1]
    h1p = packed["whh1"].shape[0]
    h2p = packed["whh2"].shape[0]
    kernel = functools.partial(_fused_lstm_kernel, t_steps=t_steps, bp=bp)
    return pl.pallas_call(
        kernel,
        out_shape=jax.ShapeDtypeStruct((bp, 1), jnp.float32),
        in_specs=[
            pl.BlockSpec((t_steps * bp, in_dim), lambda: (0, 0)),
            pl.BlockSpec((in_dim, 4 * h1p), lambda: (0, 0)),
            pl.BlockSpec((h1p, 4 * h1p), lambda: (0, 0)),
            pl.BlockSpec((1, 4 * h1p), lambda: (0, 0)),
            pl.BlockSpec((h1p, 4 * h2p), lambda: (0, 0)),
            pl.BlockSpec((h2p, 4 * h2p), lambda: (0, 0)),
            pl.BlockSpec((1, 4 * h2p), lambda: (0, 0)),
            pl.BlockSpec((1, h2p), lambda: (0, 0)),
            pl.BlockSpec((1, 1), lambda: (0, 0)),
        ],
        out_specs=pl.BlockSpec((bp, 1), lambda: (0, 0)),
        scratch_shapes=[
            pltpu.VMEM((t_steps * bp, 4 * h1p), jnp.float32),  # layer-1 gate proj
            pltpu.VMEM((t_steps * bp, h1p), jnp.float32),      # layer-1 hidden seq
            pltpu.VMEM((t_steps * bp, 4 * h2p), jnp.float32),  # layer-2 gate proj
        ],
    )(x2d, packed["wih1"], packed["whh1"], packed["b1"],
      packed["wih2"], packed["whh2"], packed["b2"],
      packed["fcw"], packed["fcb"])


# ----------------------------------------------------------------------------
# PyTorch-layout parameters + repacking into the kernel layout.
# ----------------------------------------------------------------------------
def init_torch_params(key, input_size=3, hidden_size1=64, hidden_size2=32):
    """PyTorch nn.LSTM / nn.Linear layout, uniform(-1/sqrt(H), 1/sqrt(H)) init."""
    def uni(k, shape, bound):
        return jax.random.uniform(k, shape, jnp.float32, -bound, bound)

    ks = jax.random.split(key, 10)
    k1 = hidden_size1 ** -0.5
    k2 = hidden_size2 ** -0.5
    return {
        "lstm1": {"w_ih": uni(ks[0], (4 * hidden_size1, input_size), k1),
                  "w_hh": uni(ks[1], (4 * hidden_size1, hidden_size1), k1),
                  "b_ih": uni(ks[2], (4 * hidden_size1,), k1),
                  "b_hh": uni(ks[3], (4 * hidden_size1,), k1)},
        "lstm2": {"w_ih": uni(ks[4], (4 * hidden_size2, hidden_size1), k2),
                  "w_hh": uni(ks[5], (4 * hidden_size2, hidden_size2), k2),
                  "b_ih": uni(ks[6], (4 * hidden_size2,), k2),
                  "b_hh": uni(ks[7], (4 * hidden_size2,), k2)},
        "fc": {"w": uni(ks[8], (1, hidden_size2), k2),
               "b": uni(ks[9], (1,), k2)},
    }


def _pack_lstm(w_ih, w_hh, b_ih, b_hh, h, hp, in_dim, in_pad):
    """PyTorch [i,f,g,o] layout -> transposed, gate-reordered [i,f,o,g], each
    gate zero-padded to `hp` lanes so slices fall on 128-lane boundaries."""
    perm = jnp.array(GATE_PERM)
    wi = w_ih.reshape(4, h, in_dim)[perm]
    wh = w_hh.reshape(4, h, h)[perm]
    bb = (b_ih + b_hh).reshape(4, h)[perm]
    wi_p = jnp.zeros((4, hp, in_pad), jnp.float32).at[:, :h, :in_dim].set(wi)
    wh_p = jnp.zeros((4, hp, hp), jnp.float32).at[:, :h, :h].set(wh)
    b_p = jnp.zeros((4, hp), jnp.float32).at[:, :h].set(bb)
    return (wi_p.transpose(2, 0, 1).reshape(in_pad, 4 * hp),
            wh_p.transpose(2, 0, 1).reshape(hp, 4 * hp),
            b_p.reshape(1, 4 * hp))


def pack_params(p, input_size, h1, h2, h1p=H1_PAD, h2p=H2_PAD):
    wih1, whh1, b1 = _pack_lstm(p["lstm1"]["w_ih"], p["lstm1"]["w_hh"],
                                p["lstm1"]["b_ih"], p["lstm1"]["b_hh"],
                                h1, h1p, input_size, input_size)
    wih2, whh2, b2 = _pack_lstm(p["lstm2"]["w_ih"], p["lstm2"]["w_hh"],
                                p["lstm2"]["b_ih"], p["lstm2"]["b_hh"],
                                h2, h2p, h1, h1p)
    fcw = jnp.zeros((1, h2p), jnp.float32).at[:, :h2].set(p["fc"]["w"])
    fcb = p["fc"]["b"].reshape(1, 1).astype(jnp.float32)
    return {"wih1": wih1, "whh1": whh1, "b1": b1,
            "wih2": wih2, "whh2": whh2, "b2": b2,
            "fcw": fcw, "fcb": fcb}


# ----------------------------------------------------------------------------
# Public forward: batch-first (B, T, F) like the PyTorch module.
# ----------------------------------------------------------------------------
@jax.jit
def modelo_lstm_forward(x_bf, packed):
    B, T, I = x_bf.shape
    BP = max(8, ((B + 7) // 8) * 8)                       # sublane-aligned batch
    x_tm = jnp.transpose(x_bf, (1, 0, 2)).astype(jnp.float32)   # (T, B, I)
    x_tm = jnp.pad(x_tm, ((0, 0), (0, BP - B), (0, 0)))         # (T, BP, I)
    x2d = x_tm.reshape(T * BP, I)                               # (T*BP, I)
    out = _fused_forward(x2d, packed, t_steps=T, bp=BP)         # (BP, 1)
    return out[:B, 0]                                           # (B,) like .squeeze()


# ----------------------------------------------------------------------------
# Pure-JAX reference (PyTorch layout / gate order) for a correctness check.
# ----------------------------------------------------------------------------
def _ref_lstm(x_tm, w_ih, w_hh, b_ih, b_hh):
    H = w_hh.shape[1]
    B = x_tm.shape[1]

    def step(carry, x_t):
        h, c = carry
        gates = x_t @ w_ih.T + h @ w_hh.T + b_ih + b_hh
        i = jax.nn.sigmoid(gates[:, 0 * H:1 * H])
        f = jax.nn.sigmoid(gates[:, 1 * H:2 * H])
        g = jnp.tanh(gates[:, 2 * H:3 * H])
        o = jax.nn.sigmoid(gates[:, 3 * H:4 * H])
        c = f * c + i * g
        h = o * jnp.tanh(c)
        return (h, c), h

    init = (jnp.zeros((B, H), jnp.float32), jnp.zeros((B, H), jnp.float32))
    _, hs = lax.scan(step, init, x_tm)
    return hs


def _ref_forward(x_bf, p):
    x_tm = jnp.transpose(x_bf, (1, 0, 2)).astype(jnp.float32)
    o1 = _ref_lstm(x_tm, p["lstm1"]["w_ih"], p["lstm1"]["w_hh"],
                   p["lstm1"]["b_ih"], p["lstm1"]["b_hh"])
    o2 = _ref_lstm(o1, p["lstm2"]["w_ih"], p["lstm2"]["w_hh"],
                   p["lstm2"]["b_ih"], p["lstm2"]["b_hh"])
    return jnp.squeeze(o2[-1] @ p["fc"]["w"].T + p["fc"]["b"], axis=-1)


if __name__ == "__main__":
    B, T, INPUT_SIZE = 2, 8, 3
    H1, H2 = 64, 32

    root = jax.random.PRNGKey(0)
    kx, kp = jax.random.split(root)
    x = jax.random.normal(kx, (B, T, INPUT_SIZE), jnp.float32)

    tparams = init_torch_params(kp, INPUT_SIZE, H1, H2)
    packed = pack_params(tparams, INPUT_SIZE, H1, H2)

    y = jax.block_until_ready(modelo_lstm_forward(x, packed))
    y_ref = _ref_forward(x, tparams)

    assert y.shape == (B,), y.shape
    assert jnp.allclose(y, y_ref, atol=2e-2, rtol=2e-2), (y, y_ref)

    print("KERNEL_OK")
</pallas_src>

<mosaic_0001>
module attributes {stable_mosaic.version = 11 : i64} {
  func.func @_fused_lstm_kernel(%arg0: memref<64x3xf32, #tpu.memory_space<vmem>>, %arg1: memref<3x512xf32, #tpu.memory_space<vmem>>, %arg2: memref<128x512xf32, #tpu.memory_space<vmem>>, %arg3: memref<1x512xf32, #tpu.memory_space<vmem>>, %arg4: memref<128x512xf32, #tpu.memory_space<vmem>>, %arg5: memref<128x512xf32, #tpu.memory_space<vmem>>, %arg6: memref<1x512xf32, #tpu.memory_space<vmem>>, %arg7: memref<1x128xf32, #tpu.memory_space<vmem>>, %arg8: memref<1x1xf32, #tpu.memory_space<vmem>>, %arg9: memref<8x1xf32, #tpu.memory_space<vmem>>, %arg10: memref<64x512xf32, #tpu.memory_space<vmem>>, %arg11: memref<64x128xf32, #tpu.memory_space<vmem>>, %arg12: memref<64x512xf32, #tpu.memory_space<vmem>>) attributes {dimension_semantics = [], scalar_prefetch = 0 : i64, scratch_operands = 3 : i64, tpu.core_type = #tpu.core_type<tc>} {
    %c0 = arith.constant 0 : index
    %c0_0 = arith.constant 0 : index
    %0 = vector.load %arg0[%c0, %c0_0] : memref<64x3xf32, #tpu.memory_space<vmem>>, vector<64x3xf32>
    %c0_1 = arith.constant 0 : index
    %c0_2 = arith.constant 0 : index
    %1 = vector.load %arg1[%c0_1, %c0_2] : memref<3x512xf32, #tpu.memory_space<vmem>>, vector<3x512xf32>
    %cst = arith.constant dense<0.000000e+00> : vector<64x512xf32>
    %2 = tpu.matmul %0, %1, %cst {dimension_numbers = #tpu.dot_dimension_numbers<[1], [0], [0], [1], [0, 0, 1, 1], [], []>} : vector<64x3xf32>, vector<3x512xf32>, vector<64x512xf32> -> vector<64x512xf32>
    %c0_3 = arith.constant 0 : index
    %c0_4 = arith.constant 0 : index
    %3 = vector.load %arg3[%c0_3, %c0_4] : memref<1x512xf32, #tpu.memory_space<vmem>>, vector<1x512xf32>
    %4 = vector.broadcast %3 : vector<1x512xf32> to vector<64x512xf32>
    %5 = arith.addf %2, %4 : vector<64x512xf32>
    %c0_5 = arith.constant 0 : index
    %c0_6 = arith.constant 0 : index
    %6 = vector.load %arg10[%c0_5, %c0_6] : memref<64x512xf32, #tpu.memory_space<vmem>>, vector<64x512xf32>
    tpu.vector_store %arg10[%c0_5, %c0_6], %5 {strides = array<i32>} : memref<64x512xf32, #tpu.memory_space<vmem>>, vector<64x512xf32>,
    %cst_7 = arith.constant 0.000000e+00 : f32
    %7 = vector.broadcast %cst_7 : f32 to vector<8x128xf32>
    %c0_8 = arith.constant 0 : index
    %c0_9 = arith.constant 0 : index
    %8 = vector.load %arg10[%c0_8, %c0_9] : memref<64x512xf32, #tpu.memory_space<vmem>>, vector<8x512xf32>
    %c0_10 = arith.constant 0 : index
    %c0_11 = arith.constant 0 : index
    %9 = vector.load %arg2[%c0_10, %c0_11] : memref<128x512xf32, #tpu.memory_space<vmem>>, vector<128x512xf32>
    %cst_12 = arith.constant dense<0.000000e+00> : vector<8x512xf32>
    %10 = tpu.matmul %7, %9, %cst_12 {dimension_numbers = #tpu.dot_dimension_numbers<[1], [0], [0], [1], [0, 0, 1, 1], [], []>} : vector<8x128xf32>, vector<128x512xf32>, vector<8x512xf32> -> vector<8x512xf32>
    %11 = arith.addf %8, %10 : vector<8x512xf32>
    %12 = vector.extract_strided_slice %11 {offsets = [0, 0], sizes = [8, 384], strides = [1, 1]} : vector<8x512xf32> to vector<8x384xf32>
    %13 = arith.negf %12 : vector<8x384xf32>
    %14 = math.exp %13 : vector<8x384xf32>
    %cst_13 = arith.constant 1.000000e+00 : f32
    %15 = vector.broadcast %cst_13 : f32 to vector<8x384xf32>
    %16 = arith.addf %15, %14 : vector<8x384xf32>
    %17 = arith.divf %15, %16 : vector<8x384xf32>
    %18 = vector.extract_strided_slice %11 {offsets = [0, 384], sizes = [8, 128], strides = [1, 1]} : vector<8x512xf32> to vector<8x128xf32>
    %19 = math.tanh %18 : vector<8x128xf32>
    %20 = vector.extract_strided_slice %17 {offsets = [0, 128], sizes = [8, 128], strides = [1, 1]} : vector<8x384xf32> to vector<8x128xf32>
    %21 = arith.mulf %20, %7 : vector<8x128xf32>
    %22 = vector.extract_strided_slice %17 {offsets = [0, 0], sizes = [8, 128], strides = [1, 1]} : vector<8x384xf32> to vector<8x128xf32>
    %23 = arith.mulf %22, %19 : vector<8x128xf32>
    %24 = arith.addf %21, %23 : vector<8x128xf32>
    %25 = vector.extract_strided_slice %17 {offsets = [0, 256], sizes = [8, 128], strides = [1, 1]} : vector<8x384xf32> to vector<8x128xf32>
    %26 = math.tanh %24 : vector<8x128xf32>
    %27 = arith.mulf %25, %26 : vector<8x128xf32>
    %c0_14 = arith.constant 0 : index
    %c0_15 = arith.constant 0 : index
    %28 = vector.load %arg11[%c0_14, %c0_15] : memref<64x128xf32, #tpu.memory_space<vmem>>, vector<8x128xf32>
    tpu.vector_store %arg11[%c0_14, %c0_15], %27 {strides = array<i32>} : memref<64x128xf32, #tpu.memory_space<vmem>>, vector<8x128xf32>,
    %c8 = arith.constant 8 : index
    %c0_16 = arith.constant 0 : index
    %29 = vector.load %arg10[%c8, %c0_16] : memref<64x512xf32, #tpu.memory_space<vmem>>, vector<8x512xf32>
    %c0_17 = arith.constant 0 : index
    %c0_18 = arith.constant 0 : index
    %30 = vector.load %arg2[%c0_17, %c0_18] : memref<128x512xf32, #tpu.memory_space<vmem>>, vector<128x512xf32>
    %cst_19 = arith.constant dense<0.000000e+00> : vector<8x512xf32>
    %31 = tpu.matmul %27, %30, %cst_19 {dimension_numbers = #tpu.dot_dimension_numbers<[1], [0], [0], [1], [0, 0, 1, 1], [], []>} : vector<8x128xf32>, vector<128x512xf32>, vector<8x512xf32> -> vector<8x512xf32>
    %32 = arith.addf %29, %31 : vector<8x512xf32>
    %33 = vector.extract_strided_slice %32 {offsets = [0, 0], sizes = [8, 384], strides = [1, 1]} : vector<8x512xf32> to vector<8x384xf32>
    %34 = arith.negf %33 : vector<8x384xf32>
    %35 = math.exp %34 : vector<8x384xf32>
    %cst_20 = arith.constant 1.000000e+00 : f32
    %36 = vector.broadcast %cst_20 : f32 to vector<8x384xf32>
    %37 = arith.addf %36, %35 : vector<8x384xf32>
    %38 = arith.divf %36, %37 : vector<8x384xf32>
    %39 = vector.extract_strided_slice %32 {offsets = [0, 384], sizes = [8, 128], strides = [1, 1]} : vector<8x512xf32> to vector<8x128xf32>
    %40 = math.tanh %39 : vector<8x128xf32>
    %41 = vector.extract_strided_slice %38 {offsets = [0, 128], sizes = [8, 128], strides = [1, 1]} : vector<8x384xf32> to vector<8x128xf32>
    %42 = arith.mulf %41, %24 : vector<8x128xf32>
    %43 = vector.extract_strided_slice %38 {offsets = [0, 0], sizes = [8, 128], strides = [1, 1]} : vector<8x384xf32> to vector<8x128xf32>
    %44 = arith.mulf %43, %40 : vector<8x128xf32>
    %45 = arith.addf %42, %44 : vector<8x128xf32>
    %46 = vector.extract_strided_slice %38 {offsets = [0, 256], sizes = [8, 128], strides = [1, 1]} : vector<8x384xf32> to vector<8x128xf32>
    %47 = math.tanh %45 : vector<8x128xf32>
    %48 = arith.mulf %46, %47 : vector<8x128xf32>
    %c8_21 = arith.constant 8 : index
    %c0_22 = arith.constant 0 : index
    %49 = vector.load %arg11[%c8_21, %c0_22] : memref<64x128xf32, #tpu.memory_space<vmem>>, vector<8x128xf32>
    tpu.vector_store %arg11[%c8_21, %c0_22], %48 {strides = array<i32>} : memref<64x128xf32, #tpu.memory_space<vmem>>, vector<8x128xf32>,
    %c16 = arith.constant 16 : index
    %c0_23 = arith.constant 0 : index
    %50 = vector.load %arg10[%c16, %c0_23] : memref<64x512xf32, #tpu.memory_space<vmem>>, vector<8x512xf32>
    %c0_24 = arith.constant 0 : index
    %c0_25 = arith.constant 0 : index
    %51 = vector.load %arg2[%c0_24, %c0_25] : memref<128x512xf32, #tpu.memory_space<vmem>>, vector<128x512xf32>
    %cst_26 = arith.constant dense<0.000000e+00> : vector<8x512xf32>
    %52 = tpu.matmul %48, %51, %cst_26 {dimension_numbers = #tpu.dot_dimension_numbers<[1], [0], [0], [1], [0, 0, 1, 1], [], []>} : vector<8x128xf32>, vector<128x512xf32>, vector<8x512xf32> -> vector<8x512xf32>
    %53 = arith.addf %50, %52 : vector<8x512xf32>
    %54 = vector.extract_strided_slice %53 {offsets = [0, 0], sizes = [8, 384], strides = [1, 1]} : vector<8x512xf32> to vector<8x384xf32>
    %55 = arith.negf %54 : vector<8x384xf32>
    %56 = math.exp %55 : vector<8x384xf32>
    %cst_27 = arith.constant 1.000000e+00 : f32
    %57 = vector.broadcast %cst_27 : f32 to vector<8x384xf32>
    %58 = arith.addf %57, %56 : vector<8x384xf32>
    %59 = arith.divf %57, %58 : vector<8x384xf32>
    %60 = vector.extract_strided_slice %53 {offsets = [0, 384], sizes = [8, 128], strides = [1, 1]} : vector<8x512xf32> to vector<8x128xf32>
    %61 = math.tanh %60 : vector<8x128xf32>
    %62 = vector.extract_strided_slice %59 {offsets = [0, 128], sizes = [8, 128], strides = [1, 1]} : vector<8x384xf32> to vector<8x128xf32>
    %63 = arith.mulf %62, %45 : vector<8x128xf32>
    %64 = vector.extract_strided_slice %59 {offsets = [0, 0], sizes = [8, 128], strides = [1, 1]} : vector<8x384xf32> to vector<8x128xf32>
    %65 = arith.mulf %64, %61 : vector<8x128xf32>
    %66 = arith.addf %63, %65 : vector<8x128xf32>
    %67 = vector.extract_strided_slice %59 {offsets = [0, 256], sizes = [8, 128], strides = [1, 1]} : vector<8x384xf32> to vector<8x128xf32>
    %68 = math.tanh %66 : vector<8x128xf32>
    %69 = arith.mulf %67, %68 : vector<8x128xf32>
    %c16_28 = arith.constant 16 : index
    %c0_29 = arith.constant 0 : index
    %70 = vector.load %arg11[%c16_28, %c0_29] : memref<64x128xf32, #tpu.memory_space<vmem>>, vector<8x128xf32>
    tpu.vector_store %arg11[%c16_28, %c0_29], %69 {strides = array<i32>} : memref<64x128xf32, #tpu.memory_space<vmem>>, vector<8x128xf32>,
    %c24 = arith.constant 24 : index
    %c0_30 = arith.constant 0 : index
    %71 = vector.load %arg10[%c24, %c0_30] : memref<64x512xf32, #tpu.memory_space<vmem>>, vector<8x512xf32>
    %c0_31 = arith.constant 0 : index
    %c0_32 = arith.constant 0 : index
    %72 = vector.load %arg2[%c0_31, %c0_32] : memref<128x512xf32, #tpu.memory_space<vmem>>, vector<128x512xf32>
    %cst_33 = arith.constant dense<0.000000e+00> : vector<8x512xf32>
    %73 = tpu.matmul %69, %72, %cst_33 {dimension_numbers = #tpu.dot_dimension_numbers<[1], [0], [0], [1], [0, 0, 1, 1], [], []>} : vector<8x128xf32>, vector<128x512xf32>, vector<8x512xf32> -> vector<8x512xf32>
    %74 = arith.addf %71, %73 : vector<8x512xf32>
    %75 = vector.extract_strided_slice %74 {offsets = [0, 0], sizes = [8, 384], strides = [1, 1]} : vector<8x512xf32> to vector<8x384xf32>
    %76 = arith.negf %75 : vector<8x384xf32>
    %77 = math.exp %76 : vector<8x384xf32>
    %cst_34 = arith.constant 1.000000e+00 : f32
    %78 = vector.broadcast %cst_34 : f32 to vector<8x384xf32>
    %79 = arith.addf %78, %77 : vector<8x384xf32>
    %80 = arith.divf %78, %79 : vector<8x384xf32>
    %81 = vector.extract_strided_slice %74 {offsets = [0, 384], sizes = [8, 128], strides = [1, 1]} : vector<8x512xf32> to vector<8x128xf32>
    %82 = math.tanh %81 : vector<8x128xf32>
    %83 = vector.extract_strided_slice %80 {offsets = [0, 128], sizes = [8, 128], strides = [1, 1]} : vector<8x384xf32> to vector<8x128xf32>
    %84 = arith.mulf %83, %66 : vector<8x128xf32>
    %85 = vector.extract_strided_slice %80 {offsets = [0, 0], sizes = [8, 128], strides = [1, 1]} : vector<8x384xf32> to vector<8x128xf32>
    %86 = arith.mulf %85, %82 : vector<8x128xf32>
    %87 = arith.addf %84, %86 : vector<8x128xf32>
    %88 = vector.extract_strided_slice %80 {offsets = [0, 256], sizes = [8, 128], strides = [1, 1]} : vector<8x384xf32> to vector<8x128xf32>
    %89 = math.tanh %87 : vector<8x128xf32>
    %90 = arith.mulf %88, %89 : vector<8x128xf32>
    %c24_35 = arith.constant 24 : index
    %c0_36 = arith.constant 0 : index
    %91 = vector.load %arg11[%c24_35, %c0_36] : memref<64x128xf32, #tpu.memory_space<vmem>>, vector<8x128xf32>
    tpu.vector_store %arg11[%c24_35, %c0_36], %90 {strides = array<i32>} : memref<64x128xf32, #tpu.memory_space<vmem>>, vector<8x128xf32>,
    %c32 = arith.constant 32 : index
    %c0_37 = arith.constant 0 : index
    %92 = vector.load %arg10[%c32, %c0_37] : memref<64x512xf32, #tpu.memory_space<vmem>>, vector<8x512xf32>
    %c0_38 = arith.constant 0 : index
    %c0_39 = arith.constant 0 : index
    %93 = vector.load %arg2[%c0_38, %c0_39] : memref<128x512xf32, #tpu.memory_space<vmem>>, vector<128x512xf32>
    %cst_40 = arith.constant dense<0.000000e+00> : vector<8x512xf32>
    %94 = tpu.matmul %90, %93, %cst_40 {dimension_numbers = #tpu.dot_dimension_numbers<[1], [0], [0], [1], [0, 0, 1, 1], [], []>} : vector<8x128xf32>, vector<128x512xf32>, vector<8x512xf32> -> vector<8x512xf32>
    %95 = arith.addf %92, %94 : vector<8x512xf32>
    %96 = vector.extract_strided_slice %95 {offsets = [0, 0], sizes = [8, 384], strides = [1, 1]} : vector<8x512xf32> to vector<8x384xf32>
    %97 = arith.negf %96 : vector<8x384xf32>
    %98 = math.exp %97 : vector<8x384xf32>
    %cst_41 = arith.constant 1.000000e+00 : f32
    %99 = vector.broadcast %cst_41 : f32 to vector<8x384xf32>
    %100 = arith.addf %99, %98 : vector<8x384xf32>
    %101 = arith.divf %99, %100 : vector<8x384xf32>
    %102 = vector.extract_strided_slice %95 {offsets = [0, 384], sizes = [8, 128], strides = [1, 1]} : vector<8x512xf32> to vector<8x128xf32>
    %103 = math.tanh %102 : vector<8x128xf32>
    %104 = vector.extract_strided_slice %101 {offsets = [0, 128], sizes = [8, 128], strides = [1, 1]} : vector<8x384xf32> to vector<8x128xf32>
    %105 = arith.mulf %104, %87 : vector<8x128xf32>
    %106 = vector.extract_strided_slice %101 {offsets = [0, 0], sizes = [8, 128], strides = [1, 1]} : vector<8x384xf32> to vector<8x128xf32>
    %107 = arith.mulf %106, %103 : vector<8x128xf32>
    %108 = arith.addf %105, %107 : vector<8x128xf32>
    %109 = vector.extract_strided_slice %101 {offsets = [0, 256], sizes = [8, 128], strides = [1, 1]} : vector<8x384xf32> to vector<8x128xf32>
    %110 = math.tanh %108 : vector<8x128xf32>
    %111 = arith.mulf %109, %110 : vector<8x128xf32>
    %c32_42 = arith.constant 32 : index
    %c0_43 = arith.constant 0 : index
    %112 = vector.load %arg11[%c32_42, %c0_43] : memref<64x128xf32, #tpu.memory_space<vmem>>, vector<8x128xf32>
    tpu.vector_store %arg11[%c32_42, %c0_43], %111 {strides = array<i32>} : memref<64x128xf32, #tpu.memory_space<vmem>>, vector<8x128xf32>,
    %c40 = arith.constant 40 : index
    %c0_44 = arith.constant 0 : index
    %113 = vector.load %arg10[%c40, %c0_44] : memref<64x512xf32, #tpu.memory_space<vmem>>, vector<8x512xf32>
    %c0_45 = arith.constant 0 : index
    %c0_46 = arith.constant 0 : index
    %114 = vector.load %arg2[%c0_45, %c0_46] : memref<128x512xf32, #tpu.memory_space<vmem>>, vector<128x512xf32>
    %cst_47 = arith.constant dense<0.000000e+00> : vector<8x512xf32>
    %115 = tpu.matmul %111, %114, %cst_47 {dimension_numbers = #tpu.dot_dimension_numbers<[1], [0], [0], [1], [0, 0, 1, 1], [], []>} : vector<8x128xf32>, vector<128x512xf32>, vector<8x512xf32> -> vector<8x512xf32>
    %116 = arith.addf %113, %115 : vector<8x512xf32>
    %117 = vector.extract_strided_slice %116 {offsets = [0, 0], sizes = [8, 384], strides = [1, 1]} : vector<8x512xf32> to vector<8x384xf32>
    %118 = arith.negf %117 : vector<8x384xf32>
    %119 = math.exp %118 : vector<8x384xf32>
    %cst_48 = arith.constant 1.000000e+00 : f32
    %120 = vector.broadcast %cst_48 : f32 to vector<8x384xf32>
    %121 = arith.addf %120, %119 : vector<8x384xf32>
    %122 = arith.divf %120, %121 : vector<8x384xf32>
    %123 = vector.extract_strided_slice %116 {offsets = [0, 384], sizes = [8, 128], strides = [1, 1]} : vector<8x512xf32> to vector<8x128xf32>
    %124 = math.tanh %123 : vector<8x128xf32>
    %125 = vector.extract_strided_slice %122 {offsets = [0, 128], sizes = [8, 128], strides = [1, 1]} : vector<8x384xf32> to vector<8x128xf32>
    %126 = arith.mulf %125, %108 : vector<8x128xf32>
    %127 = vector.extract_strided_slice %122 {offsets = [0, 0], sizes = [8, 128], strides = [1, 1]} : vector<8x384xf32> to vector<8x128xf32>
    %128 = arith.mulf %127, %124 : vector<8x128xf32>
    %129 = arith.addf %126, %128 : vector<8x128xf32>
    %130 = vector.extract_strided_slice %122 {offsets = [0, 256], sizes = [8, 128], strides = [1, 1]} : vector<8x384xf32> to vector<8x128xf32>
    %131 = math.tanh %129 : vector<8x128xf32>
    %132 = arith.mulf %130, %131 : vector<8x128xf32>
    %c40_49 = arith.constant 40 : index
    %c0_50 = arith.constant 0 : index
    %133 = vector.load %arg11[%c40_49, %c0_50] : memref<64x128xf32, #tpu.memory_space<vmem>>, vector<8x128xf32>
    tpu.vector_store %arg11[%c40_49, %c0_50], %132 {strides = array<i32>} : memref<64x128xf32, #tpu.memory_space<vmem>>, vector<8x128xf32>,
    %c48 = arith.constant 48 : index
    %c0_51 = arith.constant 0 : index
    %134 = vector.load %arg10[%c48, %c0_51] : memref<64x512xf32, #tpu.memory_space<vmem>>, vector<8x512xf32>
    %c0_52 = arith.constant 0 : index
    %c0_53 = arith.constant 0 : index
    %135 = vector.load %arg2[%c0_52, %c0_53] : memref<128x512xf32, #tpu.memory_space<vmem>>, vector<128x512xf32>
    %cst_54 = arith.constant dense<0.000000e+00> : vector<8x512xf32>
    %136 = tpu.matmul %132, %135, %cst_54 {dimension_numbers = #tpu.dot_dimension_numbers<[1], [0], [0], [1], [0, 0, 1, 1], [], []>} : vector<8x128xf32>, vector<128x512xf32>, vector<8x512xf32> -> vector<8x512xf32>
    %137 = arith.addf %134, %136 : vector<8x512xf32>
    %138 = vector.extract_strided_slice %137 {offsets = [0, 0], sizes = [8, 384], strides = [1, 1]} : vector<8x512xf32> to vector<8x384xf32>
    %139 = arith.negf %138 : vector<8x384xf32>
    %140 = math.exp %139 : vector<8x384xf32>
    %cst_55 = arith.constant 1.000000e+00 : f32
    %141 = vector.broadcast %cst_55 : f32 to vector<8x384xf32>
    %142 = arith.addf %141, %140 : vector<8x384xf32>
    %143 = arith.divf %141, %142 : vector<8x384xf32>
    %144 = vector.extract_strided_slice %137 {offsets = [0, 384], sizes = [8, 128], strides = [1, 1]} : vector<8x512xf32> to vector<8x128xf32>
    %145 = math.tanh %144 : vector<8x128xf32>
    %146 = vector.extract_strided_slice %143 {offsets = [0, 128], sizes = [8, 128], strides = [1, 1]} : vector<8x384xf32> to vector<8x128xf32>
    %147 = arith.mulf %146, %129 : vector<8x128xf32>
    %148 = vector.extract_strided_slice %143 {offsets = [0, 0], sizes = [8, 128], strides = [1, 1]} : vector<8x384xf32> to vector<8x128xf32>
    %149 = arith.mulf %148, %145 : vector<8x128xf32>
    %150 = arith.addf %147, %149 : vector<8x128xf32>
    %151 = vector.extract_strided_slice %143 {offsets = [0, 256], sizes = [8, 128], strides = [1, 1]} : vector<8x384xf32> to vector<8x128xf32>
    %152 = math.tanh %150 : vector<8x128xf32>
    %153 = arith.mulf %151, %152 : vector<8x128xf32>
    %c48_56 = arith.constant 48 : index
    %c0_57 = arith.constant 0 : index
    %154 = vector.load %arg11[%c48_56, %c0_57] : memref<64x128xf32, #tpu.memory_space<vmem>>, vector<8x128xf32>
    tpu.vector_store %arg11[%c48_56, %c0_57], %153 {strides = array<i32>} : memref<64x128xf32, #tpu.memory_space<vmem>>, vector<8x128xf32>,
    %c56 = arith.constant 56 : index
    %c0_58 = arith.constant 0 : index
    %155 = vector.load %arg10[%c56, %c0_58] : memref<64x512xf32, #tpu.memory_space<vmem>>, vector<8x512xf32>
    %c0_59 = arith.constant 0 : index
    %c0_60 = arith.constant 0 : index
    %156 = vector.load %arg2[%c0_59, %c0_60] : memref<128x512xf32, #tpu.memory_space<vmem>>, vector<128x512xf32>
    %cst_61 = arith.constant dense<0.000000e+00> : vector<8x512xf32>
    %157 = tpu.matmul %153, %156, %cst_61 {dimension_numbers = #tpu.dot_dimension_numbers<[1], [0], [0], [1], [0, 0, 1, 1], [], []>} : vector<8x128xf32>, vector<128x512xf32>, vector<8x512xf32> -> vector<8x512xf32>
    %158 = arith.addf %155, %157 : vector<8x512xf32>
    %159 = vector.extract_strided_slice %158 {offsets = [0, 0], sizes = [8, 384], strides = [1, 1]} : vector<8x512xf32> to vector<8x384xf32>
    %160 = arith.negf %159 : vector<8x384xf32>
    %161 = math.exp %160 : vector<8x384xf32>
    %cst_62 = arith.constant 1.000000e+00 : f32
    %162 = vector.broadcast %cst_62 : f32 to vector<8x384xf32>
    %163 = arith.addf %162, %161 : vector<8x384xf32>
    %164 = arith.divf %162, %163 : vector<8x384xf32>
    %165 = vector.extract_strided_slice %158 {offsets = [0, 384], sizes = [8, 128], strides = [1, 1]} : vector<8x512xf32> to vector<8x128xf32>
    %166 = math.tanh %165 : vector<8x128xf32>
    %167 = vector.extract_strided_slice %164 {offsets = [0, 128], sizes = [8, 128], strides = [1, 1]} : vector<8x384xf32> to vector<8x128xf32>
    %168 = arith.mulf %167, %150 : vector<8x128xf32>
    %169 = vector.extract_strided_slice %164 {offsets = [0, 0], sizes = [8, 128], strides = [1, 1]} : vector<8x384xf32> to vector<8x128xf32>
    %170 = arith.mulf %169, %166 : vector<8x128xf32>
    %171 = arith.addf %168, %170 : vector<8x128xf32>
    %172 = vector.extract_strided_slice %164 {offsets = [0, 256], sizes = [8, 128], strides = [1, 1]} : vector<8x384xf32> to vector<8x128xf32>
    %173 = math.tanh %171 : vector<8x128xf32>
    %174 = arith.mulf %172, %173 : vector<8x128xf32>
    %c56_63 = arith.constant 56 : index
    %c0_64 = arith.constant 0 : index
    %175 = vector.load %arg11[%c56_63, %c0_64] : memref<64x128xf32, #tpu.memory_space<vmem>>, vector<8x128xf32>
    tpu.vector_store %arg11[%c56_63, %c0_64], %174 {strides = array<i32>} : memref<64x128xf32, #tpu.memory_space<vmem>>, vector<8x128xf32>,
    %c0_65 = arith.constant 0 : index
    %c0_66 = arith.constant 0 : index
    %176 = vector.load %arg11[%c0_65, %c0_66] : memref<64x128xf32, #tpu.memory_space<vmem>>, vector<64x128xf32>
    %c0_67 = arith.constant 0 : index
    %c0_68 = arith.constant 0 : index
    %177 = vector.load %arg4[%c0_67, %c0_68] : memref<128x512xf32, #tpu.memory_space<vmem>>, vector<128x512xf32>
    %cst_69 = arith.constant dense<0.000000e+00> : vector<64x512xf32>
    %178 = tpu.matmul %176, %177, %cst_69 {dimension_numbers = #tpu.dot_dimension_numbers<[1], [0], [0], [1], [0, 0, 1, 1], [], []>} : vector<64x128xf32>, vector<128x512xf32>, vector<64x512xf32> -> vector<64x512xf32>
    %c0_70 = arith.constant 0 : index
    %c0_71 = arith.constant 0 : index
    %179 = vector.load %arg6[%c0_70, %c0_71] : memref<1x512xf32, #tpu.memory_space<vmem>>, vector<1x512xf32>
    %180 = vector.broadcast %179 : vector<1x512xf32> to vector<64x512xf32>
    %181 = arith.addf %178, %180 : vector<64x512xf32>
    %c0_72 = arith.constant 0 : index
    %c0_73 = arith.constant 0 : index
    %182 = vector.load %arg12[%c0_72, %c0_73] : memref<64x512xf32, #tpu.memory_space<vmem>>, vector<64x512xf32>
    tpu.vector_store %arg12[%c0_72, %c0_73], %181 {strides = array<i32>} : memref<64x512xf32, #tpu.memory_space<vmem>>, vector<64x512xf32>,
    %cst_74 = arith.constant 0.000000e+00 : f32
    %183 = vector.broadcast %cst_74 : f32 to vector<8x128xf32>
    %c0_75 = arith.constant 0 : index
    %c0_76 = arith.constant 0 : index
    %184 = vector.load %arg12[%c0_75, %c0_76] : memref<64x512xf32, #tpu.memory_space<vmem>>, vector<8x512xf32>
    %c0_77 = arith.constant 0 : index
    %c0_78 = arith.constant 0 : index
    %185 = vector.load %arg5[%c0_77, %c0_78] : memref<128x512xf32, #tpu.memory_space<vmem>>, vector<128x512xf32>
    %cst_79 = arith.constant dense<0.000000e+00> : vector<8x512xf32>
    %186 = tpu.matmul %183, %185, %cst_79 {dimension_numbers = #tpu.dot_dimension_numbers<[1], [0], [0], [1], [0, 0, 1, 1], [], []>} : vector<8x128xf32>, vector<128x512xf32>, vector<8x512xf32> -> vector<8x512xf32>
    %187 = arith.addf %184, %186 : vector<8x512xf32>
    %188 = vector.extract_strided_slice %187 {offsets = [0, 0], sizes = [8, 384], strides = [1, 1]} : vector<8x512xf32> to vector<8x384xf32>
    %189 = arith.negf %188 : vector<8x384xf32>
    %190 = math.exp %189 : vector<8x384xf32>
    %cst_80 = arith.constant 1.000000e+00 : f32
    %191 = vector.broadcast %cst_80 : f32 to vector<8x384xf32>
    %192 = arith.addf %191, %190 : vector<8x384xf32>
    %193 = arith.divf %191, %192 : vector<8x384xf32>
    %194 = vector.extract_strided_slice %187 {offsets = [0, 384], sizes = [8, 128], strides = [1, 1]} : vector<8x512xf32> to vector<8x128xf32>
    %195 = math.tanh %194 : vector<8x128xf32>
    %196 = vector.extract_strided_slice %193 {offsets = [0, 128], sizes = [8, 128], strides = [1, 1]} : vector<8x384xf32> to vector<8x128xf32>
    %197 = arith.mulf %196, %183 : vector<8x128xf32>
    %198 = vector.extract_strided_slice %193 {offsets = [0, 0], sizes = [8, 128], strides = [1, 1]} : vector<8x384xf32> to vector<8x128xf32>
    %199 = arith.mulf %198, %195 : vector<8x128xf32>
    %200 = arith.addf %197, %199 : vector<8x128xf32>
    %201 = vector.extract_strided_slice %193 {offsets = [0, 256], sizes = [8, 128], strides = [1, 1]} : vector<8x384xf32> to vector<8x128xf32>
    %202 = math.tanh %200 : vector<8x128xf32>
    %203 = arith.mulf %201, %202 : vector<8x128xf32>
    %c8_81 = arith.constant 8 : index
    %c0_82 = arith.constant 0 : index
    %204 = vector.load %arg12[%c8_81, %c0_82] : memref<64x512xf32, #tpu.memory_space<vmem>>, vector<8x512xf32>
    %c0_83 = arith.constant 0 : index
    %c0_84 = arith.constant 0 : index
    %205 = vector.load %arg5[%c0_83, %c0_84] : memref<128x512xf32, #tpu.memory_space<vmem>>, vector<128x512xf32>
    %cst_85 = arith.constant dense<0.000000e+00> : vector<8x512xf32>
    %206 = tpu.matmul %203, %205, %cst_85 {dimension_numbers = #tpu.dot_dimension_numbers<[1], [0], [0], [1], [0, 0, 1, 1], [], []>} : vector<8x128xf32>, vector<128x512xf32>, vector<8x512xf32> -> vector<8x512xf32>
    %207 = arith.addf %204, %206 : vector<8x512xf32>
    %208 = vector.extract_strided_slice %207 {offsets = [0, 0], sizes = [8, 384], strides = [1, 1]} : vector<8x512xf32> to vector<8x384xf32>
    %209 = arith.negf %208 : vector<8x384xf32>
    %210 = math.exp %209 : vector<8x384xf32>
    %cst_86 = arith.constant 1.000000e+00 : f32
    %211 = vector.broadcast %cst_86 : f32 to vector<8x384xf32>
    %212 = arith.addf %211, %210 : vector<8x384xf32>
    %213 = arith.divf %211, %212 : vector<8x384xf32>
    %214 = vector.extract_strided_slice %207 {offsets = [0, 384], sizes = [8, 128], strides = [1, 1]} : vector<8x512xf32> to vector<8x128xf32>
    %215 = math.tanh %214 : vector<8x128xf32>
    %216 = vector.extract_strided_slice %213 {offsets = [0, 128], sizes = [8, 128], strides = [1, 1]} : vector<8x384xf32> to vector<8x128xf32>
    %217 = arith.mulf %216, %200 : vector<8x128xf32>
    %218 = vector.extract_strided_slice %213 {offsets = [0, 0], sizes = [8, 128], strides = [1, 1]} : vector<8x384xf32> to vector<8x128xf32>
    %219 = arith.mulf %218, %215 : vector<8x128xf32>
    %220 = arith.addf %217, %219 : vector<8x128xf32>
    %221 = vector.extract_strided_slice %213 {offsets = [0, 256], sizes = [8, 128], strides = [1, 1]} : vector<8x384xf32> to vector<8x128xf32>
    %222 = math.tanh %220 : vector<8x128xf32>
    %223 = arith.mulf %221, %222 : vector<8x128xf32>
    %c16_87 = arith.constant 16 : index
    %c0_88 = arith.constant 0 : index
    %224 = vector.load %arg12[%c16_87, %c0_88] : memref<64x512xf32, #tpu.memory_space<vmem>>, vector<8x512xf32>
    %c0_89 = arith.constant 0 : index
    %c0_90 = arith.constant 0 : index
    %225 = vector.load %arg5[%c0_89, %c0_90] : memref<128x512xf32, #tpu.memory_space<vmem>>, vector<128x512xf32>
    %cst_91 = arith.constant dense<0.000000e+00> : vector<8x512xf32>
    %226 = tpu.matmul %223, %225, %cst_91 {dimension_numbers = #tpu.dot_dimension_numbers<[1], [0], [0], [1], [0, 0, 1, 1], [], []>} : vector<8x128xf32>, vector<128x512xf32>, vector<8x512xf32> -> vector<8x512xf32>
    %227 = arith.addf %224, %226 : vector<8x512xf32>
    %228 = vector.extract_strided_slice %227 {offsets = [0, 0], sizes = [8, 384], strides = [1, 1]} : vector<8x512xf32> to vector<8x384xf32>
    %229 = arith.negf %228 : vector<8x384xf32>
    %230 = math.exp %229 : vector<8x384xf32>
    %cst_92 = arith.constant 1.000000e+00 : f32
    %231 = vector.broadcast %cst_92 : f32 to vector<8x384xf32>
    %232 = arith.addf %231, %230 : vector<8x384xf32>
    %233 = arith.divf %231, %232 : vector<8x384xf32>
    %234 = vector.extract_strided_slice %227 {offsets = [0, 384], sizes = [8, 128], strides = [1, 1]} : vector<8x512xf32> to vector<8x128xf32>
    %235 = math.tanh %234 : vector<8x128xf32>
    %236 = vector.extract_strided_slice %233 {offsets = [0, 128], sizes = [8, 128], strides = [1, 1]} : vector<8x384xf32> to vector<8x128xf32>
    %237 = arith.mulf %236, %220 : vector<8x128xf32>
    %238 = vector.extract_strided_slice %233 {offsets = [0, 0], sizes = [8, 128], strides = [1, 1]} : vector<8x384xf32> to vector<8x128xf32>
    %239 = arith.mulf %238, %235 : vector<8x128xf32>
    %240 = arith.addf %237, %239 : vector<8x128xf32>
    %241 = vector.extract_strided_slice %233 {offsets = [0, 256], sizes = [8, 128], strides = [1, 1]} : vector<8x384xf32> to vector<8x128xf32>
    %242 = math.tanh %240 : vector<8x128xf32>
    %243 = arith.mulf %241, %242 : vector<8x128xf32>
    %c24_93 = arith.constant 24 : index
    %c0_94 = arith.constant 0 : index
    %244 = vector.load %arg12[%c24_93, %c0_94] : memref<64x512xf32, #tpu.memory_space<vmem>>, vector<8x512xf32>
    %c0_95 = arith.constant 0 : index
    %c0_96 = arith.constant 0 : index
    %245 = vector.load %arg5[%c0_95, %c0_96] : memref<128x512xf32, #tpu.memory_space<vmem>>, vector<128x512xf32>
    %cst_97 = arith.constant dense<0.000000e+00> : vector<8x512xf32>
    %246 = tpu.matmul %243, %245, %cst_97 {dimension_numbers = #tpu.dot_dimension_numbers<[1], [0], [0], [1], [0, 0, 1, 1], [], []>} : vector<8x128xf32>, vector<128x512xf32>, vector<8x512xf32> -> vector<8x512xf32>
    %247 = arith.addf %244, %246 : vector<8x512xf32>
    %248 = vector.extract_strided_slice %247 {offsets = [0, 0], sizes = [8, 384], strides = [1, 1]} : vector<8x512xf32> to vector<8x384xf32>
    %249 = arith.negf %248 : vector<8x384xf32>
    %250 = math.exp %249 : vector<8x384xf32>
    %cst_98 = arith.constant 1.000000e+00 : f32
    %251 = vector.broadcast %cst_98 : f32 to vector<8x384xf32>
    %252 = arith.addf %251, %250 : vector<8x384xf32>
    %253 = arith.divf %251, %252 : vector<8x384xf32>
    %254 = vector.extract_strided_slice %247 {offsets = [0, 384], sizes = [8, 128], strides = [1, 1]} : vector<8x512xf32> to vector<8x128xf32>
    %255 = math.tanh %254 : vector<8x128xf32>
    %256 = vector.extract_strided_slice %253 {offsets = [0, 128], sizes = [8, 128], strides = [1, 1]} : vector<8x384xf32> to vector<8x128xf32>
    %257 = arith.mulf %256, %240 : vector<8x128xf32>
    %258 = vector.extract_strided_slice %253 {offsets = [0, 0], sizes = [8, 128], strides = [1, 1]} : vector<8x384xf32> to vector<8x128xf32>
    %259 = arith.mulf %258, %255 : vector<8x128xf32>
    %260 = arith.addf %257, %259 : vector<8x128xf32>
    %261 = vector.extract_strided_slice %253 {offsets = [0, 256], sizes = [8, 128], strides = [1, 1]} : vector<8x384xf32> to vector<8x128xf32>
    %262 = math.tanh %260 : vector<8x128xf32>
    %263 = arith.mulf %261, %262 : vector<8x128xf32>
    %c32_99 = arith.constant 32 : index
    %c0_100 = arith.constant 0 : index
    %264 = vector.load %arg12[%c32_99, %c0_100] : memref<64x512xf32, #tpu.memory_space<vmem>>, vector<8x512xf32>
    %c0_101 = arith.constant 0 : index
    %c0_102 = arith.constant 0 : index
    %265 = vector.load %arg5[%c0_101, %c0_102] : memref<128x512xf32, #tpu.memory_space<vmem>>, vector<128x512xf32>
    %cst_103 = arith.constant dense<0.000000e+00> : vector<8x512xf32>
    %266 = tpu.matmul %263, %265, %cst_103 {dimension_numbers = #tpu.dot_dimension_numbers<[1], [0], [0], [1], [0, 0, 1, 1], [], []>} : vector<8x128xf32>, vector<128x512xf32>, vector<8x512xf32> -> vector<8x512xf32>
    %267 = arith.addf %264, %266 : vector<8x512xf32>
    %268 = vector.extract_strided_slice %267 {offsets = [0, 0], sizes = [8, 384], strides = [1, 1]} : vector<8x512xf32> to vector<8x384xf32>
    %269 = arith.negf %268 : vector<8x384xf32>
    %270 = math.exp %269 : vector<8x384xf32>
    %cst_104 = arith.constant 1.000000e+00 : f32
    %271 = vector.broadcast %cst_104 : f32 to vector<8x384xf32>
    %272 = arith.addf %271, %270 : vector<8x384xf32>
    %273 = arith.divf %271, %272 : vector<8x384xf32>
    %274 = vector.extract_strided_slice %267 {offsets = [0, 384], sizes = [8, 128], strides = [1, 1]} : vector<8x512xf32> to vector<8x128xf32>
    %275 = math.tanh %274 : vector<8x128xf32>
    %276 = vector.extract_strided_slice %273 {offsets = [0, 128], sizes = [8, 128], strides = [1, 1]} : vector<8x384xf32> to vector<8x128xf32>
    %277 = arith.mulf %276, %260 : vector<8x128xf32>
    %278 = vector.extract_strided_slice %273 {offsets = [0, 0], sizes = [8, 128], strides = [1, 1]} : vector<8x384xf32> to vector<8x128xf32>
    %279 = arith.mulf %278, %275 : vector<8x128xf32>
    %280 = arith.addf %277, %279 : vector<8x128xf32>
    %281 = vector.extract_strided_slice %273 {offsets = [0, 256], sizes = [8, 128], strides = [1, 1]} : vector<8x384xf32> to vector<8x128xf32>
    %282 = math.tanh %280 : vector<8x128xf32>
    %283 = arith.mulf %281, %282 : vector<8x128xf32>
    %c40_105 = arith.constant 40 : index
    %c0_106 = arith.constant 0 : index
    %284 = vector.load %arg12[%c40_105, %c0_106] : memref<64x512xf32, #tpu.memory_space<vmem>>, vector<8x512xf32>
    %c0_107 = arith.constant 0 : index
    %c0_108 = arith.constant 0 : index
    %285 = vector.load %arg5[%c0_107, %c0_108] : memref<128x512xf32, #tpu.memory_space<vmem>>, vector<128x512xf32>
    %cst_109 = arith.constant dense<0.000000e+00> : vector<8x512xf32>
    %286 = tpu.matmul %283, %285, %cst_109 {dimension_numbers = #tpu.dot_dimension_numbers<[1], [0], [0], [1], [0, 0, 1, 1], [], []>} : vector<8x128xf32>, vector<128x512xf32>, vector<8x512xf32> -> vector<8x512xf32>
    %287 = arith.addf %284, %286 : vector<8x512xf32>
    %288 = vector.extract_strided_slice %287 {offsets = [0, 0], sizes = [8, 384], strides = [1, 1]} : vector<8x512xf32> to vector<8x384xf32>
    %289 = arith.negf %288 : vector<8x384xf32>
    %290 = math.exp %289 : vector<8x384xf32>
    %cst_110 = arith.constant 1.000000e+00 : f32
    %291 = vector.broadcast %cst_110 : f32 to vector<8x384xf32>
    %292 = arith.addf %291, %290 : vector<8x384xf32>
    %293 = arith.divf %291, %292 : vector<8x384xf32>
    %294 = vector.extract_strided_slice %287 {offsets = [0, 384], sizes = [8, 128], strides = [1, 1]} : vector<8x512xf32> to vector<8x128xf32>
    %295 = math.tanh %294 : vector<8x128xf32>
    %296 = vector.extract_strided_slice %293 {offsets = [0, 128], sizes = [8, 128], strides = [1, 1]} : vector<8x384xf32> to vector<8x128xf32>
    %297 = arith.mulf %296, %280 : vector<8x128xf32>
    %298 = vector.extract_strided_slice %293 {offsets = [0, 0], sizes = [8, 128], strides = [1, 1]} : vector<8x384xf32> to vector<8x128xf32>
    %299 = arith.mulf %298, %295 : vector<8x128xf32>
    %300 = arith.addf %297, %299 : vector<8x128xf32>
    %301 = vector.extract_strided_slice %293 {offsets = [0, 256], sizes = [8, 128], strides = [1, 1]} : vector<8x384xf32> to vector<8x128xf32>
    %302 = math.tanh %300 : vector<8x128xf32>
    %303 = arith.mulf %301, %302 : vector<8x128xf32>
    %c48_111 = arith.constant 48 : index
    %c0_112 = arith.constant 0 : index
    %304 = vector.load %arg12[%c48_111, %c0_112] : memref<64x512xf32, #tpu.memory_space<vmem>>, vector<8x512xf32>
    %c0_113 = arith.constant 0 : index
    %c0_114 = arith.constant 0 : index
    %305 = vector.load %arg5[%c0_113, %c0_114] : memref<128x512xf32, #tpu.memory_space<vmem>>, vector<128x512xf32>
    %cst_115 = arith.constant dense<0.000000e+00> : vector<8x512xf32>
    %306 = tpu.matmul %303, %305, %cst_115 {dimension_numbers = #tpu.dot_dimension_numbers<[1], [0], [0], [1], [0, 0, 1, 1], [], []>} : vector<8x128xf32>, vector<128x512xf32>, vector<8x512xf32> -> vector<8x512xf32>
    %307 = arith.addf %304, %306 : vector<8x512xf32>
    %308 = vector.extract_strided_slice %307 {offsets = [0, 0], sizes = [8, 384], strides = [1, 1]} : vector<8x512xf32> to vector<8x384xf32>
    %309 = arith.negf %308 : vector<8x384xf32>
    %310 = math.exp %309 : vector<8x384xf32>
    %cst_116 = arith.constant 1.000000e+00 : f32
    %311 = vector.broadcast %cst_116 : f32 to vector<8x384xf32>
    %312 = arith.addf %311, %310 : vector<8x384xf32>
    %313 = arith.divf %311, %312 : vector<8x384xf32>
    %314 = vector.extract_strided_slice %307 {offsets = [0, 384], sizes = [8, 128], strides = [1, 1]} : vector<8x512xf32> to vector<8x128xf32>
    %315 = math.tanh %314 : vector<8x128xf32>
    %316 = vector.extract_strided_slice %313 {offsets = [0, 128], sizes = [8, 128], strides = [1, 1]} : vector<8x384xf32> to vector<8x128xf32>
    %317 = arith.mulf %316, %300 : vector<8x128xf32>
    %318 = vector.extract_strided_slice %313 {offsets = [0, 0], sizes = [8, 128], strides = [1, 1]} : vector<8x384xf32> to vector<8x128xf32>
    %319 = arith.mulf %318, %315 : vector<8x128xf32>
    %320 = arith.addf %317, %319 : vector<8x128xf32>
    %321 = vector.extract_strided_slice %313 {offsets = [0, 256], sizes = [8, 128], strides = [1, 1]} : vector<8x384xf32> to vector<8x128xf32>
    %322 = math.tanh %320 : vector<8x128xf32>
    %323 = arith.mulf %321, %322 : vector<8x128xf32>
    %c56_117 = arith.constant 56 : index
    %c0_118 = arith.constant 0 : index
    %324 = vector.load %arg12[%c56_117, %c0_118] : memref<64x512xf32, #tpu.memory_space<vmem>>, vector<8x512xf32>
    %c0_119 = arith.constant 0 : index
    %c0_120 = arith.constant 0 : index
    %325 = vector.load %arg5[%c0_119, %c0_120] : memref<128x512xf32, #tpu.memory_space<vmem>>, vector<128x512xf32>
    %cst_121 = arith.constant dense<0.000000e+00> : vector<8x512xf32>
    %326 = tpu.matmul %323, %325, %cst_121 {dimension_numbers = #tpu.dot_dimension_numbers<[1], [0], [0], [1], [0, 0, 1, 1], [], []>} : vector<8x128xf32>, vector<128x512xf32>, vector<8x512xf32> -> vector<8x512xf32>
    %327 = arith.addf %324, %326 : vector<8x512xf32>
    %328 = vector.extract_strided_slice %327 {offsets = [0, 0], sizes = [8, 384], strides = [1, 1]} : vector<8x512xf32> to vector<8x384xf32>
    %329 = arith.negf %328 : vector<8x384xf32>
    %330 = math.exp %329 : vector<8x384xf32>
    %cst_122 = arith.constant 1.000000e+00 : f32
    %331 = vector.broadcast %cst_122 : f32 to vector<8x384xf32>
    %332 = arith.addf %331, %330 : vector<8x384xf32>
    %333 = arith.divf %331, %332 : vector<8x384xf32>
    %334 = vector.extract_strided_slice %327 {offsets = [0, 384], sizes = [8, 128], strides = [1, 1]} : vector<8x512xf32> to vector<8x128xf32>
    %335 = math.tanh %334 : vector<8x128xf32>
    %336 = vector.extract_strided_slice %333 {offsets = [0, 128], sizes = [8, 128], strides = [1, 1]} : vector<8x384xf32> to vector<8x128xf32>
    %337 = arith.mulf %336, %320 : vector<8x128xf32>
    %338 = vector.extract_strided_slice %333 {offsets = [0, 0], sizes = [8, 128], strides = [1, 1]} : vector<8x384xf32> to vector<8x128xf32>
    %339 = arith.mulf %338, %335 : vector<8x128xf32>
    %340 = arith.addf %337, %339 : vector<8x128xf32>
    %341 = vector.extract_strided_slice %333 {offsets = [0, 256], sizes = [8, 128], strides = [1, 1]} : vector<8x384xf32> to vector<8x128xf32>
    %342 = math.tanh %340 : vector<8x128xf32>
    %343 = arith.mulf %341, %342 : vector<8x128xf32>
    %c0_123 = arith.constant 0 : index
    %c0_124 = arith.constant 0 : index
    %344 = vector.load %arg7[%c0_123, %c0_124] : memref<1x128xf32, #tpu.memory_space<vmem>>, vector<1x128xf32>
    %345 = vector.broadcast %344 : vector<1x128xf32> to vector<8x128xf32>
    %346 = arith.mulf %343, %345 : vector<8x128xf32>
    %cst_125 = arith.constant dense<0.000000e+00> : vector<8xf32>
    %347 = vector.multi_reduction <add>, %346, %cst_125 [1] : vector<8x128xf32> to vector<8xf32>
    %348 = vector.shape_cast %347 : vector<8xf32> to vector<8x1xf32>
    %c0_126 = arith.constant 0 : index
    %c0_127 = arith.constant 0 : index
    %349 = vector.load %arg8[%c0_126, %c0_127] : memref<1x1xf32, #tpu.memory_space<vmem>>, vector<1x1xf32>
    %350 = vector.broadcast %349 : vector<1x1xf32> to vector<8x1xf32>
    %351 = arith.addf %348, %350 : vector<8x1xf32>
    %c0_128 = arith.constant 0 : index
    %c0_129 = arith.constant 0 : index
    %352 = vector.load %arg9[%c0_128, %c0_129] : memref<8x1xf32, #tpu.memory_space<vmem>>, vector<8x1xf32>
    tpu.vector_store %arg9[%c0_128, %c0_129], %351 {strides = array<i32>} : memref<8x1xf32, #tpu.memory_space<vmem>>, vector<8x1xf32>,
    return
  }
}

</mosaic_0001>

<bundles_post_ra>
// kernel: modelo_lstm_forward.1
= control target key start
LH: loop header
LB: loop body
LE: loop exit
PB: predicated region body
PF: predicated region fallthrough
CT: control target
= control target key end

     0   :  { %s6902_s0 = inlined_call_operand.vmem [shape: f32[64,3], index: 0, kind: input, shape index: {}]   ;;  %s6903_s1 = inlined_call_operand.vmem [shape: f32[3,512], index: 1, kind: input, shape index: {}]   ;;  %s6904_s2 = inlined_call_operand.hbm [shape: f32[128,512], index: 2, kind: input, shape index: {}]   ;;  %s6905_s3 = inlined_call_operand.vmem [shape: f32[1,512], index: 3, kind: input, shape index: {}]   ;;  %s6906_s4 = inlined_call_operand.hbm [shape: f32[128,512], index: 4, kind: input, shape index: {}]   ;;  %s6907_s5 = inlined_call_operand.hbm [shape: f32[128,512], index: 5, kind: input, shape index: {}]   ;;  %s6908_s6 = inlined_call_operand.vmem [shape: f32[1,512], index: 6, kind: input, shape index: {}]   ;;  %s6909_s7 = inlined_call_operand.vmem [shape: f32[1,128], index: 7, kind: input, shape index: {}]   ;;  %s6910_s8 = inlined_call_operand.<no memory space> [shape: f32[1,1], index: 8, kind: input, shape index: {}]   ;;  %s6911_s9 = inlined_call_operand.vmem [shape: f32[8,1], index: 9, kind: output, shape index: {}]  }
   0x1   :  { %v14_v0 = vstv %s6910_s8 }
   0x2   :  { %15 = vst [vmem:[#allocation5] sm:$0x1] %v14_v0 }
   0x3   :  { %16 = vsyncpa [#allocation7], 0 }
   0x4   :  { %17 = vsyncpa [#allocation9], 0  ;;  %s5769_s11 = smov [#allocation8]   ;;  %s5770_s13 = smov [#allocation6]  }
   0x5   :  { %s41_s12 = sshll.u32 %s5769_s11, 4  ;;  %s27_s14 = sshll.u32 %s5770_s13, 4  ;;  %s42_s12 = int_to_ptr.vmem [resolvable:$true] %s41_s12  ;;  %s5828_s14 = int_to_ptr.vmem [resolvable:$true] %s27_s14 }
   0x6   :  { %s5699_s17 = scalar_lea.hbm %s6906_s4, 8192 }
   0x7   :  { %p5700_p0 = scmp.ne.s32.totalorder %s6906_s4, %s5699_s17  ;;  %p5703_p1 = scmp.lt.u32.totalorder %s5699_s17, %s6906_s4 }
   0x9   :  { %p5705_p2 = pnand %p5703_p1, %p5700_p0 }
   0xb   :  { %5708 = shalt.err (!%p5705_p2)
}
   0xc   :  { %s5709_s21 = scalar_lea.vmem %s42_s12, 8192  ;;  %p5714_p4 = scmp.lt.s32.totalorder %s42_s12, %s42_s12 }
   0xd   :  { %p5710_p3 = scmp.ne.s32.totalorder %s42_s12, %s5709_s21  ;;  %p5715_p5 = scmp.lt.s32.totalorder %s5709_s21, %s5709_s21 }
   0xf   :  { %p5716_p6 = por %p5715_p5, %p5714_p4 }
  0x11   :  { %p5717_p7 = pnand %p5716_p6, %p5710_p3 }
  0x13   :  { %5720 = shalt.err (!%p5717_p7)
}
  0x14   :  { %s5771_s22 = smov 512   ;;  %s5772_s23 = smov 32  }
  0x15   :  { %47 = dma.hbm_to_vmem [thread:$0]  %s6906_s4, 8192, %s42_s12, [#allocation9], %s5771_s22, %s5771_s22, %s5772_s23  }
  0x16   :  { %s5721_s28 = scalar_lea.hbm %s6904_s2, 8192 }
  0x17   :  { %p5722_p8 = scmp.ne.s32.totalorder %s6904_s2, %s5721_s28  ;;  %p5725_p9 = scmp.lt.u32.totalorder %s5721_s28, %s6904_s2 }
  0x19   :  { %p5727_p10 = pnand %p5725_p9, %p5722_p8 }
  0x1b   :  { %5730 = shalt.err (!%p5727_p10)
}
  0x1c   :  { %s5731_s13 = scalar_lea.vmem %s5828_s14, 8192  ;;  %p5736_p12 = scmp.lt.s32.totalorder %s5828_s14, %s5828_s14 }
  0x1d   :  { %p5732_p11 = scmp.ne.s32.totalorder %s5828_s14, %s5731_s13  ;;  %p5737_p13 = scmp.lt.s32.totalorder %s5731_s13, %s5731_s13 }
  0x1f   :  { %p5738_p0 = por %p5737_p13, %p5736_p12 }
  0x21   :  { %p5739_p1 = pnand %p5738_p0, %p5732_p11 }
  0x23   :  { %5742 = shalt.err (!%p5739_p1)
}
  0x24   :  { %33 = dma.hbm_to_vmem [thread:$0]  %s6904_s2, 8192, %s5828_s14, [#allocation7], %s5771_s22, %s5771_s22, %s5772_s23  }
  0x25   :  { %s5773_s15 = smov [#allocation10]   ;;  %s5743_s19 = scalar_lea.hbm %s6907_s5, 8192 }
  0x26   :  { %s53_s16 = sshll.u32 %s5773_s15, 4  ;;  %p5744_p2 = scmp.ne.s32.totalorder %s6907_s5, %s5743_s19  ;;  %s54_s16 = int_to_ptr.vmem [resolvable:$true] %s53_s16 }
  0x27   :  { %p5747_p3 = scmp.lt.u32.totalorder %s5743_s19, %s6907_s5 }
  0x29   :  { %p5749_p4 = pnand %p5747_p3, %p5744_p2 }
  0x2b   :  { %5752 = shalt.err (!%p5749_p4)
}
  0x2c   :  { %s5753_s25 = scalar_lea.vmem %s54_s16, 8192  ;;  %p5758_p6 = scmp.lt.s32.totalorder %s54_s16, %s54_s16 }
  0x2d   :  { %p5754_p5 = scmp.ne.s32.totalorder %s54_s16, %s5753_s25  ;;  %p5759_p7 = scmp.lt.s32.totalorder %s5753_s25, %s5753_s25 }
  0x2f   :  { %p5760_p8 = por %p5759_p7, %p5758_p6 }
  0x31   :  { %p5761_p9 = pnand %p5760_p8, %p5754_p5 }
  0x33   :  { %5764 = shalt.err (!%p5761_p9)
}
  0x34   :  { %59 = dma.hbm_to_vmem [thread:$0]  %s6907_s5, 8192, %s54_s16, [#allocation9], %s5771_s22, %s5771_s22, %s5772_s23  }
  0x35   :  { %5765 = dma.done.wait [#allocation7], 8192  }
  0x36   :  { %5766 = vsyncadd [#allocation7], 4294959104 }
  0x37   :  { %5767 = dma.done.wait [#allocation9], 16384  }
  0x38   :  { %5768 = vsyncadd [#allocation9], 4294950912  ;;  %v5774_v1 = vmov 0.0   ;;  %v83_v2 = vld [vmem:[%s6903_s1] sm:$0x77]  ;;  %vm136_vm0 = vcmask 1042432  }
  0x39   :  { %209 = vmatprep.mubr.f32.mxu0 %v5774_v1  ;;  %322 = vmatprep.mubr.f32.mxu1 %v5774_v1  ;;  %v84_v3 = vld [vmem:[%s6903_s1 + $0x8] sm:$0x77]  ;;  %v75_v4 = vld [vmem:[%s6902_s0] sm:$0xff]  ;;  %v109_v5 = vcombine.high %v83_v2, %v83_v2  ;;  %vm111_vm1 = vcmask 23552   ;;  %v409_v16 = vld [vmem:[#allocation6 + $0x10] sm:$0xff]  ;;  %vm4141_vm2 = vcmask 7168  }
  0x3a   :  { %v110_v6 = vcombine.high %v84_v3, %v84_v3  ;;  %v408_v7 = vld [vmem:[#allocation6 + $0x8] sm:$0xff]  ;;  %v410_v9 = vld [vmem:[#allocation6 + $0x18] sm:$0xff]  ;;  %v407_v12 = vld [vmem:[#allocation6] sm:$0xff] }
  0x3b   :  { %v412_v8 = vld [vmem:[#allocation6 + $0x28] sm:$0xff]  ;;  %v414_v11 = vld [vmem:[#allocation6 + $0x38] sm:$0xff]  ;;  %v411_v13 = vld [vmem:[#allocation6 + $0x20] sm:$0xff]  ;;  %4149 = vmatprep.subr.msk.mxu0 %vm136_vm0, %v109_v5 }
  0x3c   :  { %v5891_v10 = vpack.c.bf16 %v412_v8, %v408_v7  ;;  %4159 = vmatprep.subr.msk.mxu1 %vm136_vm0, %v110_v6  ;;  %v5895_v14 = vpack.c.bf16 %v414_v11, %v410_v9  ;;  %v5897_v15 = vpack.c.bf16 %v411_v13, %v407_v12  ;;  %v413_v17 = vld [vmem:[#allocation6 + $0x30] sm:$0xff]  ;;  %4150 = vmatpush1.msk.msra.mxu0 %vm136_vm0, %v83_v2  ;;  %v416_v19 = vld [vmem:[#allocation6 + $0x48] sm:$0xff]  ;;  %v418_v21 = vld [vmem:[#allocation6 + $0x58] sm:$0xff] }
  0x3d   :  { %4160 = vmatpush1.msk.msra.mxu1 %vm136_vm0, %v84_v3  ;;  %v5901_v18 = vpack.c.bf16 %v413_v17, %v409_v16  ;;  %v420_v20 = vld [vmem:[#allocation6 + $0x68] sm:$0xff]  ;;  %4151 = vmatmul.mubr.msk.f32.vlgmr.msra.gmra.mrb[0].mxu0 %vm111_vm1, %v75_v4  ;;  %v422_v22 = vld [vmem:[#allocation6 + $0x78] sm:$0xff]  ;;  %v415_v23 = vld [vmem:[#allocation6 + $0x40] sm:$0xff] }
  0x3e   :  { %4161 = vmatmul.mubr.msk.f32.vlgmr.msra.gmra.mrb[0].mxu1 %vm111_vm1, %v75_v4  ;;  %v419_v24 = vld [vmem:[#allocation6 + $0x60] sm:$0xff]  ;;  %4220 = vmatprep.subr.bf16.mxu0 %v5891_v10  ;;  %v5910_v26 = vpack.c.bf16 %v420_v20, %v416_v19  ;;  %v5912_v27 = vpack.c.bf16 %v422_v22, %v418_v21  ;;  %v417_v28 = vld [vmem:[#allocation6 + $0x50] sm:$0xff]  ;;  %v424_v32 = vld [vmem:[#allocation6 + $0x88] sm:$0xff] }
  0x3f   :  { %4252 = vmatprep.subr.bf16.mxu1 %v5895_v14  ;;  %v76_v25 = vld [vmem:[%s6902_s0 + $0x8] sm:$0xff]  ;;  %v421_v29 = vld [vmem:[#allocation6 + $0x70] sm:$0xff]  ;;  %4222 = vmatpush1.bf16.msra.mxu0 %v5897_v15  ;;  %v5916_v30 = vpack.c.bf16 %v419_v24, %v415_v23  ;;  %v426_v34 = vld [vmem:[#allocation6 + $0x98] sm:$0xff] }
  0x40   :  { %4254 = vmatpush1.bf16.msra.mxu1 %v5901_v18  ;;  %v5918_v31 = vpack.c.bf16 %v421_v29, %v417_v28  ;;  %v428_v33 = vld [vmem:[#allocation6 + $0xa8] sm:$0xff]  ;;  %215 = vmatprep.mubr.f32.mxu0 %v5774_v1  ;;  %v430_v35 = vld [vmem:[#allocation6 + $0xb8] sm:$0xff]  ;;  %v423_v36 = vld [vmem:[#allocation6 + $0x80] sm:$0xff] }
  0x41   :  { %328 = vmatprep.mubr.f32.mxu1 %v5774_v1  ;;  %v427_v37 = vld [vmem:[#allocation6 + $0xa0] sm:$0xff]  ;;  %4152 = vmatmul.mubr.msk.f32.gmra.mrb[2].mxu0 %vm111_vm1, %v76_v25  ;;  %v425_v38 = vld [vmem:[#allocation6 + $0x90] sm:$0xff]  ;;  %v5929_v41 = vpack.c.bf16 %v428_v33, %v424_v32  ;;  %v5931_v42 = vpack.c.bf16 %v430_v35, %v426_v34  ;;  %v432_v43 = vld [vmem:[#allocation6 + $0xc8] sm:$0xff] }
  0x42   :  { %4162 = vmatmul.mubr.msk.f32.gmra.mrb[2].mxu1 %vm111_vm1, %v76_v25  ;;  %v429_v39 = vld [vmem:[#allocation6 + $0xb0] sm:$0xff]  ;;  %4224 = vmatprep.subr.bf16.mxu0 %v5910_v26  ;;  %v436_v44 = vld [vmem:[#allocation6 + $0xe8] sm:$0xff]  ;;  %v5935_v45 = vpack.c.bf16 %v427_v37, %v423_v36  ;;  %v434_v47 = vld [vmem:[#allocation6 + $0xd8] sm:$0xff] }
  0x43   :  { %4256 = vmatprep.subr.bf16.mxu1 %v5912_v27  ;;  %v77_v40 = vld [vmem:[%s6902_s0 + $0x10] sm:$0xff]  ;;  %4226 = vmatpush1.bf16.msra.mxu0 %v5916_v30  ;;  %v5937_v46 = vpack.c.bf16 %v429_v39, %v425_v38  ;;  %v438_v48 = vld [vmem:[#allocation6 + $0xf8] sm:$0xff]  ;;  %v431_v49 = vld [vmem:[#allocation6 + $0xc0] sm:$0xff]  ;;  %v5948_v54 = vpack.c.bf16 %v436_v44, %v432_v43 }
  0x44   :  { %4258 = vmatpush1.bf16.msra.mxu1 %v5918_v31  ;;  %221 = vmatprep.mubr.f32.mxu0 %v5774_v1  ;;  %v435_v50 = vld [vmem:[#allocation6 + $0xe0] sm:$0xff]  ;;  %v433_v51 = vld [vmem:[#allocation6 + $0xd0] sm:$0xff]  ;;  %v5950_v55 = vpack.c.bf16 %v438_v48, %v434_v47  ;;  %v440_v56 = vld [vmem:[#allocation6 + $0x108] sm:$0xff] }
  0x45   :  { %334 = vmatprep.mubr.f32.mxu1 %v5774_v1  ;;  %v437_v52 = vld [vmem:[#allocation6 + $0xf0] sm:$0xff]  ;;  %4153 = vmatmul.mubr.msk.f32.gmra.mrb[4].mxu0 %vm111_vm1, %v77_v40  ;;  %v444_v57 = vld [vmem:[#allocation6 + $0x128] sm:$0xff]  ;;  %v5954_v58 = vpack.c.bf16 %v435_v50, %v431_v49  ;;  %v442_v60 = vld [vmem:[#allocation6 + $0x118] sm:$0xff] }
  0x46   :  { %4163 = vmatmul.mubr.msk.f32.gmra.mrb[4].mxu1 %vm111_vm1, %v77_v40  ;;  %4228 = vmatprep.subr.bf16.mxu0 %v5929_v41  ;;  %v78_v53 = vld [vmem:[%s6902_s0 + $0x18] sm:$0xff]  ;;  %v5956_v59 = vpack.c.bf16 %v437_v52, %v433_v51  ;;  %v439_v62 = vld [vmem:[#allocation6 + $0x100] sm:$0xff]  ;;  %v5967_v4 = vpack.c.bf16 %v444_v57, %v440_v56  ;;  %v448_v6 = vld [vmem:[#allocation6 + $0x148] sm:$0xff] }
  0x47   :  { %4260 = vmatprep.subr.bf16.mxu1 %v5931_v42  ;;  %4230 = vmatpush1.bf16.msra.mxu0 %v5935_v45  ;;  %v446_v61 = vld [vmem:[#allocation6 + $0x138] sm:$0xff]  ;;  %v443_v63 = vld [vmem:[#allocation6 + $0x120] sm:$0xff]  ;;  %v441_v0 = vld [vmem:[#allocation6 + $0x110] sm:$0xff] }
  0x48   :  { %4262 = vmatpush1.bf16.msra.mxu1 %v5937_v46  ;;  %227 = vmatprep.mubr.f32.mxu0 %v5774_v1  ;;  %v445_v2 = vld [vmem:[#allocation6 + $0x130] sm:$0xff]  ;;  %v79_v3 = vld [vmem:[%s6902_s0 + $0x20] sm:$0xff]  ;;  %v5969_v5 = vpack.c.bf16 %v446_v61, %v442_v60  ;;  %v452_v7 = vld [vmem:[#allocation6 + $0x168] sm:$0xff]  ;;  %v5973_v8 = vpack.c.bf16 %v443_v63, %v439_v62  ;;  %v87_v63 = vlaneseq }
  0x49   :  { %340 = vmatprep.mubr.f32.mxu1 %v5774_v1  ;;  %4154 = vmatmul.mubr.msk.f32.gmra.mrb[6].mxu0 %vm111_vm1, %v78_v53  ;;  %v5975_v9 = vpack.c.bf16 %v445_v2, %v441_v0  ;;  %v450_v11 = vld [vmem:[#allocation6 + $0x158] sm:$0xff]  ;;  %v447_v13 = vld [vmem:[#allocation6 + $0x140] sm:$0xff]  ;;  %v449_v17 = vld [vmem:[#allocation6 + $0x150] sm:$0xff]  ;;  %v5986_v21 = vpack.c.bf16 %v452_v7, %v448_v6 }
  0x4a   :  { %4164 = vmatmul.mubr.msk.f32.gmra.mrb[6].mxu1 %vm111_vm1, %v78_v53  ;;  %4232 = vmatprep.subr.bf16.mxu0 %v5948_v54  ;;  %v454_v12 = vld [vmem:[#allocation6 + $0x178] sm:$0xff]  ;;  %v451_v16 = vld [vmem:[#allocation6 + $0x160] sm:$0xff]  ;;  %v453_v19 = vld [vmem:[#allocation6 + $0x170] sm:$0xff]  ;;  %v6082_v0 = vshrl.u32 %v87_v63, 7 }
  0x4b   :  { %4264 = vmatprep.subr.bf16.mxu1 %v5950_v55  ;;  %4234 = vmatpush1.bf16.msra.mxu0 %v5954_v58  ;;  %v80_v20 = vld [vmem:[%s6902_s0 + $0x28] sm:$0xff]  ;;  %v5988_v22 = vpack.c.bf16 %v454_v12, %v450_v11  ;;  %v5992_v25 = vpack.c.bf16 %v451_v16, %v447_v13  ;;  %v5994_v28 = vpack.c.bf16 %v453_v19, %v449_v17  ;;  %v458_v29 = vld [vmem:[#allocation6 + $0x198] sm:$0xff]  ;;  %v457_v35 = vld [vmem:[#allocation6 + $0x190] sm:$0xff] }
  0x4c   :  { %4266 = vmatpush1.bf16.msra.mxu1 %v5956_v59  ;;  %233 = vmatprep.mubr.f32.mxu0 %v5774_v1  ;;  %v456_v23 = vld [vmem:[#allocation6 + $0x188] sm:$0xff]  ;;  %v462_v32 = vld [vmem:[#allocation6 + $0x1b8] sm:$0xff]  ;;  %v455_v33 = vld [vmem:[#allocation6 + $0x180] sm:$0xff]  ;;  %v89_v2 = vsub.s32 0, %v6082_v0  ;;  %v93_v6 = vsub.s32 1, %v6082_v0  ;;  %v97_v13 = vsub.s32 2, %v6082_v0 }
  0x4d   :  { %346 = vmatprep.mubr.f32.mxu1 %v5774_v1  ;;  %4155 = vmatmul.mubr.msk.f32.gmra.mrb[8].mxu0 %vm111_vm1, %v79_v3  ;;  %v460_v24 = vld [vmem:[#allocation6 + $0x1a8] sm:$0xff]  ;;  %v459_v34 = vld [vmem:[#allocation6 + $0x1a0] sm:$0xff]  ;;  %v461_v36 = vld [vmem:[#allocation6 + $0x1b0] sm:$0xff]  ;;  %v6007_v39 = vpack.c.bf16 %v462_v32, %v458_v29 }
  0x4e   :  { %4165 = vmatmul.mubr.msk.f32.gmra.mrb[8].mxu1 %vm111_vm1, %v79_v3  ;;  %4236 = vmatprep.subr.bf16.mxu0 %v5967_v4  ;;  %v81_v37 = vld [vmem:[%s6902_s0 + $0x30] sm:$0xff]  ;;  %v6005_v38 = vpack.c.bf16 %v460_v24, %v456_v23  ;;  %v6011_v44 = vpack.c.bf16 %v459_v34, %v455_v33  ;;  %v6013_v47 = vpack.c.bf16 %v461_v36, %v457_v35  ;;  %v466_v48 = vld [vmem:[#allocation6 + $0x1d8] sm:$0xff]  ;;  %v463_v50 = vld [vmem:[#allocation6 + $0x1c0] sm:$0xff]  ;;  %v101_v24 = vsub.s32 3, %v6082_v0 }
  0x4f   :  { %4268 = vmatprep.subr.bf16.mxu1 %v5969_v5  ;;  %4238 = vmatpush1.bf16.msra.mxu0 %v5973_v8  ;;  %v464_v40 = vld [vmem:[#allocation6 + $0x1c8] sm:$0xff]  ;;  %v470_v49 = vld [vmem:[#allocation6 + $0x1f8] sm:$0xff]  ;;  %v467_v51 = vld [vmem:[#allocation6 + $0x1e0] sm:$0xff] }
  0x50   :  { %4270 = vmatpush1.bf16.msra.mxu1 %v5975_v9  ;;  %239 = vmatprep.mubr.f32.mxu0 %v5774_v1  ;;  %v468_v43 = vld [vmem:[#allocation6 + $0x1e8] sm:$0xff]  ;;  %v465_v52 = vld [vmem:[#allocation6 + $0x1d0] sm:$0xff]  ;;  %v6026_v60 = vpack.c.bf16 %v470_v49, %v466_v48  ;;  %v6030_v61 = vpack.c.bf16 %v467_v51, %v463_v50  ;;  %v85_v3 = vld [vmem:[%s6905_s3] sm:$0xf] }
  0x51   :  { %352 = vmatprep.mubr.f32.mxu1 %v5774_v1  ;;  %4156 = vmatmul.mubr.msk.f32.gmra.mrb[10].mxu0 %vm111_vm1, %v80_v20  ;;  %v469_v53 = vld [vmem:[#allocation6 + $0x1f0] sm:$0xff]  ;;  %v6024_v57 = vpack.c.bf16 %v468_v43, %v464_v40  ;;  %v6091_v7 = vrot.slane %v85_v3, %v89_v2  ;;  %v6103_v29 = vrot.slane %v85_v3, %v97_v13 }
  0x52   :  { %4166 = vmatmul.mubr.msk.f32.gmra.mrb[10].mxu1 %vm111_vm1, %v80_v20  ;;  %4240 = vmatprep.subr.bf16.mxu0 %v5986_v21  ;;  %v82_v56 = vld [vmem:[%s6902_s0 + $0x38] sm:$0xff]  ;;  %v6032_v62 = vpack.c.bf16 %v469_v53, %v465_v52  ;;  %v6107_v32 = vrot.slane %v85_v3, %v101_v24 }
  0x53   :  { %4272 = vmatprep.subr.bf16.mxu1 %v5988_v22  ;;  %4242 = vmatpush1.bf16.msra.mxu0 %v5992_v25 }
  0x54   :  { %4274 = vmatpush1.bf16.msra.mxu1 %v5994_v28  ;;  %245 = vmatprep.mubr.f32.mxu0 %v5774_v1 }
  0x55   :  { %358 = vmatprep.mubr.f32.mxu1 %v5774_v1  ;;  %4157 = vmatmul.mubr.msk.f32.gmra.mrb[12].mxu0 %vm111_vm1, %v81_v37 }
  0x56   :  { %4167 = vmatmul.mubr.msk.f32.gmra.mrb[12].mxu1 %vm111_vm1, %v81_v37  ;;  %4244 = vmatprep.subr.bf16.mxu0 %v6005_v38 }
  0x57   :  { %4276 = vmatprep.subr.bf16.mxu1 %v6007_v39  ;;  %4246 = vmatpush1.bf16.msra.mxu0 %v6011_v44 }
  0x58   :  { %4278 = vmatpush1.bf16.msra.mxu1 %v6013_v47  ;;  %251 = vmatprep.mubr.f32.mxu0 %v5774_v1 }
  0x59   :  { %364 = vmatprep.mubr.f32.mxu1 %v5774_v1  ;;  %4158 = vmatmul.mubr.msk.f32.gmra.mrb[14].mxu0 %vm111_vm1, %v82_v56 }
  0x5a   :  { %4168 = vmatmul.mubr.msk.f32.gmra.mrb[14].mxu1 %vm111_vm1, %v82_v56  ;;  %4248 = vmatprep.subr.bf16.mxu0 %v6024_v57 }
  0x5b   :  { %4280 = vmatprep.subr.bf16.mxu1 %v6026_v60  ;;  %4250 = vmatpush1.bf16.msra.mxu0 %v6030_v61 }
  0x5c   :  { %4282 = vmatpush1.bf16.msra.mxu1 %v6032_v62  ;;  %535 = vmatprep.mubr.f32.mxu0 %v5774_v1 }
  0x5d   :  { %606 = vmatprep.mubr.f32.mxu1 %v5774_v1  ;;  %4284 = vmatprep.subr.bf16.mxu0 %v5891_v10 }
  0x5e   :  { %4316 = vmatprep.subr.bf16.mxu1 %v5895_v14  ;;  %536 = vmatmul.mubr.f32.vlgmr.msra.gmra.mrb[0].mxu0 %v5774_v1 }
  0x5f   :  { %607 = vmatmul.mubr.f32.vlgmr.msra.gmra.mrb[0].mxu1 %v5774_v1  ;;  %4286 = vmatpush1.bf16.msra.mxu0 %v5897_v15 }
  0x60   :  { %4318 = vmatpush1.bf16.msra.mxu1 %v5901_v18  ;;  %4288 = vmatprep.subr.bf16.mxu0 %v5910_v26 }
  0x61   :  { %4320 = vmatprep.subr.bf16.mxu1 %v5912_v27  ;;  %774 = vmatprep.mubr.f32.mxu0 %v5774_v1 }
  0x62   :  { %845 = vmatprep.mubr.f32.mxu1 %v5774_v1 }
  0x63   :  { %4290 = vmatpush1.bf16.msra.mxu0 %v5916_v30 }
  0x64   :  { %4322 = vmatpush1.bf16.msra.mxu1 %v5918_v31  ;;  %4292 = vmatprep.subr.bf16.mxu0 %v5929_v41 }
  0x65   :  { %4324 = vmatprep.subr.bf16.mxu1 %v5931_v42 }
  0x67   :  { %4294 = vmatpush1.bf16.msra.mxu0 %v5935_v45 }
  0x68   :  { %4326 = vmatpush1.bf16.msra.mxu1 %v5937_v46  ;;  %4296 = vmatprep.subr.bf16.mxu0 %v5948_v54 }
  0x69   :  { %4328 = vmatprep.subr.bf16.mxu1 %v5950_v55 }
  0x6b   :  { %4298 = vmatpush1.bf16.msra.mxu0 %v5954_v58 }
  0x6c   :  { %4330 = vmatpush1.bf16.msra.mxu1 %v5956_v59  ;;  %4300 = vmatprep.subr.bf16.mxu0 %v5967_v4 }
  0x6d   :  { %4332 = vmatprep.subr.bf16.mxu1 %v5969_v5 }
  0x6f   :  { %4302 = vmatpush1.bf16.msra.mxu0 %v5973_v8 }
  0x70   :  { %4334 = vmatpush1.bf16.msra.mxu1 %v5975_v9  ;;  %4304 = vmatprep.subr.bf16.mxu0 %v5986_v21 }
  0x71   :  { %4336 = vmatprep.subr.bf16.mxu1 %v5988_v22 }
  0x73   :  { %4306 = vmatpush1.bf16.msra.mxu0 %v5992_v25 }
  0x74   :  { %4338 = vmatpush1.bf16.msra.mxu1 %v5994_v28  ;;  %4308 = vmatprep.subr.bf16.mxu0 %v6005_v38 }
  0x75   :  { %4340 = vmatprep.subr.bf16.mxu1 %v6007_v39 }
  0x77   :  { %4310 = vmatpush1.bf16.msra.mxu0 %v6011_v44 }
  0x78   :  { %4342 = vmatpush1.bf16.msra.mxu1 %v6013_v47  ;;  %4312 = vmatprep.subr.bf16.mxu0 %v6024_v57 }
  0x79   :  { %4344 = vmatprep.subr.bf16.mxu1 %v6026_v60 }
  0x7b   :  { %4314 = vmatpush1.bf16.msra.mxu0 %v6030_v61 }
  0x7c   :  { %4346 = vmatpush1.bf16.msra.mxu1 %v6032_v62  ;;  %4348 = vmatprep.subr.bf16.mxu0 %v5891_v10  ;;  %v6095_v10 = vrot.slane %v85_v3, %v93_v6 }
  0x7d   :  { %4380 = vmatprep.subr.bf16.mxu1 %v5895_v14 }
 0x131   :  { %v537_v14 = vpop.f32.mrb[0].mxu0 }
 0x132   :  { %v608_v11 = vpop.f32.mrb[0].mxu1  ;;  %v5307_v12 = vadd.f32 %v537_v14, %v6091_v7  ;;  %v539_v16 = vpop.f32.mrb[1].mxu0 }
 0x133   :  { %v610_v17 = vpop.f32.mrb[1].mxu1  ;;  %v5308_v19 = vadd.f32 %v539_v16, %v6095_v10  ;;  %v5323_v33 = vadd.f32 %v608_v11, %v6103_v29 }
 0x134   :  { %v4169_v20 = vmul.f32 -1.442695, %v5307_v12  ;;  %v5324_v34 = vadd.f32 %v610_v17, %v6107_v32 }
 0x135   :  { %v4170_v23 = vmul.f32 -1.442695, %v5308_v19  ;;  %v4171_v35 = vmul.f32 -1.442695, %v5323_v33 }
 0x136   :  { %5443 = vpow2.f32 %v4169_v20 }
 0x137   :  { %5445 = vpow2.f32 %v4170_v23 }
 0x138   :  { %5447 = vtanh.f32 %v5324_v34 }
 0x139   :  { %5449 = vpow2.f32 %v4171_v35 }
 0x140   :  { %v5444_v36 = vpop.eup %5443 }
 0x141   :  { %v626_v37 = vadd.f32 1.0, %v5444_v36  ;;  %v5446_v40 = vpop.eup %5445 }
 0x142   :  { %v627_v43 = vadd.f32 1.0, %v5446_v40  ;;  %v5448_v48 = vpop.eup %5447 }
 0x143   :  { %5451 = vrcp.f32 %v626_v37  ;;  %v5450_v49 = vpop.eup %5449 }
 0x144   :  { %5453 = vrcp.f32 %v627_v43  ;;  %v628_v53 = vadd.f32 1.0, %v5450_v49 }
 0x146   :  { %5455 = vrcp.f32 %v628_v53 }
 0x14d   :  { %v5452_v50 = vpop.eup %5451 }
 0x14e   :  { %v637_v51 = vmul.f32 %v5452_v50, %v5448_v48  ;;  %v5454_v52 = vpop.eup %5453 }
 0x14f   :  { %v636_v56 = vmul.f32 0.0, %v5454_v52 }
 0x150   :  { %v5456_v3 = vpop.eup %5455 }
 0x151   :  { %v6111_v63 = vadd.f32 %v637_v51, %v636_v56 }
 0x153   :  { %5457 = vtanh.f32 %v6111_v63 }
 0x15d   :  { %v5458_v14 = vpop.eup %5457 }
 0x15e   :  { %v6114_v11 = vmul.f32 %v5458_v14, %v5456_v3  ;;  %v1125_v3 = vld [vmem:[#allocation6 + $0x8] sm:$0xff] }
 0x15f   :  { %v1129_v14 = vld [vmem:[#allocation6 + $0x28] sm:$0xff] }
 0x160   :  { %775 = vmatmul.mubr.f32.vlgmr.msra.gmra.mrb[2].mxu0 %v6114_v11  ;;  %846 = vmatmul.mubr.f32.vlgmr.msra.gmra.mrb[2].mxu1 %v6114_v11 }
 0x161   :  { %4350 = vmatpush1.bf16.msra.mxu0 %v5897_v15  ;;  %4382 = vmatpush1.bf16.msra.mxu1 %v5901_v18 }
 0x162   :  { %4352 = vmatprep.subr.bf16.mxu0 %v5910_v26  ;;  %4384 = vmatprep.subr.bf16.mxu1 %v5912_v27 }
 0x163   :  { %1013 = vmatprep.mubr.f32.mxu0 %v5774_v1  ;;  %1084 = vmatprep.mubr.f32.mxu1 %v5774_v1 }
 0x165   :  { %4354 = vmatpush1.bf16.msra.mxu0 %v5916_v30  ;;  %4386 = vmatpush1.bf16.msra.mxu1 %v5918_v31 }
 0x166   :  { %4356 = vmatprep.subr.bf16.mxu0 %v5929_v41  ;;  %4388 = vmatprep.subr.bf16.mxu1 %v5931_v42 }
 0x169   :  { %4358 = vmatpush1.bf16.msra.mxu0 %v5935_v45  ;;  %4390 = vmatpush1.bf16.msra.mxu1 %v5937_v46 }
 0x16a   :  { %4360 = vmatprep.subr.bf16.mxu0 %v5948_v54  ;;  %4392 = vmatprep.subr.bf16.mxu1 %v5950_v55 }
 0x16d   :  { %4362 = vmatpush1.bf16.msra.mxu0 %v5954_v58  ;;  %4394 = vmatpush1.bf16.msra.mxu1 %v5956_v59 }
 0x16e   :  { %4364 = vmatprep.subr.bf16.mxu0 %v5967_v4  ;;  %4396 = vmatprep.subr.bf16.mxu1 %v5969_v5 }
 0x171   :  { %4366 = vmatpush1.bf16.msra.mxu0 %v5973_v8  ;;  %4398 = vmatpush1.bf16.msra.mxu1 %v5975_v9 }
 0x172   :  { %4368 = vmatprep.subr.bf16.mxu0 %v5986_v21  ;;  %4400 = vmatprep.subr.bf16.mxu1 %v5988_v22 }
 0x175   :  { %4370 = vmatpush1.bf16.msra.mxu0 %v5992_v25  ;;  %4402 = vmatpush1.bf16.msra.mxu1 %v5994_v28 }
 0x176   :  { %4372 = vmatprep.subr.bf16.mxu0 %v6005_v38  ;;  %4404 = vmatprep.subr.bf16.mxu1 %v6007_v39 }
 0x179   :  { %4374 = vmatpush1.bf16.msra.mxu0 %v6011_v44  ;;  %4406 = vmatpush1.bf16.msra.mxu1 %v6013_v47 }
 0x17a   :  { %4376 = vmatprep.subr.bf16.mxu0 %v6024_v57  ;;  %4408 = vmatprep.subr.bf16.mxu1 %v6026_v60 }
 0x17d   :  { %4378 = vmatpush1.bf16.msra.mxu0 %v6030_v61  ;;  %4410 = vmatpush1.bf16.msra.mxu1 %v6032_v62 }
 0x233   :  { %v776_v15 = vpop.f32.mrb[2].mxu0  ;;  %v847_v18 = vpop.f32.mrb[2].mxu1 }
 0x234   :  { %v5309_v26 = vadd.f32 %v776_v15, %v6091_v7  ;;  %v778_v27 = vpop.f32.mrb[3].mxu0  ;;  %v849_v30 = vpop.f32.mrb[3].mxu1  ;;  %v5325_v17 = vadd.f32 %v847_v18, %v6103_v29  ;;  %v6164_v15 = vpack.c.bf16 %v1129_v14, %v1125_v3  ;;  %v1131_v18 = vld [vmem:[#allocation6 + $0x38] sm:$0xff] }
 0x235   :  { %v5310_v31 = vadd.f32 %v778_v27, %v6095_v10  ;;  %v5326_v19 = vadd.f32 %v849_v30, %v6107_v32  ;;  %v1128_v27 = vld [vmem:[#allocation6 + $0x20] sm:$0xff]  ;;  %v1382_v3 = vld [vmem:[#allocation6 + $0x98] sm:$0xff] }
 0x236   :  { %v4172_v12 = vmul.f32 -1.442695, %v5309_v26  ;;  %v4174_v20 = vmul.f32 -1.442695, %v5325_v17  ;;  %v1124_v26 = vld [vmem:[#allocation6] sm:$0xff]  ;;  %4412 = vmatprep.subr.bf16.mxu0 %v6164_v15 }
 0x237   :  { %v4173_v16 = vmul.f32 -1.442695, %v5310_v31  ;;  %v6168_v31 = vpack.c.bf16 %v1128_v27, %v1124_v26  ;;  %v1383_v26 = vld [vmem:[#allocation6 + $0xa0] sm:$0xff] }
 0x238   :  { %5459 = vpow2.f32 %v4172_v12  ;;  %v1126_v12 = vld [vmem:[#allocation6 + $0x10] sm:$0xff] }
 0x239   :  { %5461 = vpow2.f32 %v4173_v16  ;;  %v1130_v16 = vld [vmem:[#allocation6 + $0x30] sm:$0xff] }
 0x23a   :  { %5463 = vtanh.f32 %v5326_v19  ;;  %v6171_v17 = vpack.c.bf16 %v1130_v16, %v1126_v12  ;;  %v1133_v19 = vld [vmem:[#allocation6 + $0x48] sm:$0xff]  ;;  %v1381_v16 = vld [vmem:[#allocation6 + $0x90] sm:$0xff] }
 0x23b   :  { %5465 = vpow2.f32 %v4174_v20  ;;  %v1137_v20 = vld [vmem:[#allocation6 + $0x68] sm:$0xff] }
 0x242   :  { %v5460_v23 = vpop.eup %5459 }
 0x243   :  { %v865_v33 = vadd.f32 1.0, %v5460_v23  ;;  %v5462_v34 = vpop.eup %5461  ;;  %v1135_v23 = vld [vmem:[#allocation6 + $0x58] sm:$0xff] }
 0x244   :  { %v866_v35 = vadd.f32 1.0, %v5462_v34  ;;  %v5464_v36 = vpop.eup %5463  ;;  %v1139_v34 = vld [vmem:[#allocation6 + $0x78] sm:$0xff] }
 0x245   :  { %5467 = vrcp.f32 %v865_v33  ;;  %v5466_v37 = vpop.eup %5465  ;;  %v6176_v33 = vpack.c.bf16 %v1137_v20, %v1133_v19  ;;  %v1385_v19 = vld [vmem:[#allocation6 + $0xb0] sm:$0xff] }
 0x246   :  { %5469 = vrcp.f32 %v866_v35  ;;  %v867_v49 = vadd.f32 1.0, %v5466_v37  ;;  %v1132_v35 = vld [vmem:[#allocation6 + $0x40] sm:$0xff]  ;;  %v6178_v37 = vpack.c.bf16 %v1139_v34, %v1135_v23  ;;  %v6241_v20 = vpack.c.bf16 %v1385_v19, %v1381_v16  ;;  %v1388_v23 = vld [vmem:[#allocation6 + $0xc8] sm:$0xff] }
 0x247   :  { %v1392_v34 = vld [vmem:[#allocation6 + $0xe8] sm:$0xff] }
 0x248   :  { %5471 = vrcp.f32 %v867_v49  ;;  %v1416_v19 = vld [vmem:[#allocation6 + $0x1a8] sm:$0xff] }
 0x24f   :  { %v5468_v40 = vpop.eup %5467 }
 0x250   :  { %v876_v43 = vmul.f32 %v5468_v40, %v5464_v36  ;;  %v5470_v48 = vpop.eup %5469  ;;  %v1136_v36 = vld [vmem:[#allocation6 + $0x60] sm:$0xff] }
 0x251   :  { %v875_v50 = vmul.f32 %v5470_v48, %v6111_v63  ;;  %v1127_v63 = vld [vmem:[#allocation6 + $0x18] sm:$0xff]  ;;  %v6180_v40 = vpack.c.bf16 %v1136_v36, %v1132_v35  ;;  %v1138_v48 = vld [vmem:[#allocation6 + $0x70] sm:$0xff]  ;;  %v6246_v36 = vpack.c.bf16 %v1392_v34, %v1388_v23 }
 0x252   :  { %v5472_v52 = vpop.eup %5471  ;;  %v6166_v30 = vpack.c.bf16 %v1131_v18, %v1127_v63  ;;  %v1386_v63 = vld [vmem:[#allocation6 + $0xb8] sm:$0xff]  ;;  %v1379_v18 = vld [vmem:[#allocation6 + $0x80] sm:$0xff] }
 0x253   :  { %v6155_v51 = vadd.f32 %v876_v43, %v875_v50  ;;  %v1134_v43 = vld [vmem:[#allocation6 + $0x50] sm:$0xff]  ;;  %v6236_v27 = vpack.c.bf16 %v1386_v63, %v1382_v3  ;;  %v6238_v12 = vpack.c.bf16 %v1383_v26, %v1379_v18  ;;  %v1390_v35 = vld [vmem:[#allocation6 + $0xd8] sm:$0xff]  ;;  %v1412_v26 = vld [vmem:[#allocation6 + $0x188] sm:$0xff] }
 0x254   :  { %4444 = vmatprep.subr.bf16.mxu1 %v6166_v30  ;;  %v6183_v49 = vpack.c.bf16 %v1138_v48, %v1134_v43  ;;  %v1394_v43 = vld [vmem:[#allocation6 + $0xf8] sm:$0xff]  ;;  %v1387_v48 = vld [vmem:[#allocation6 + $0xc0] sm:$0xff]  ;;  %v1405_v63 = vld [vmem:[#allocation6 + $0x150] sm:$0xff] }
 0x255   :  { %5473 = vtanh.f32 %v6155_v51  ;;  %v1409_v18 = vld [vmem:[#allocation6 + $0x170] sm:$0xff]  ;;  %v1414_v23 = vld [vmem:[#allocation6 + $0x198] sm:$0xff] }
 0x256   :  { %v6277_v16 = vpack.c.bf16 %v1409_v18, %v1405_v63  ;;  %v1418_v34 = vld [vmem:[#allocation6 + $0x1b8] sm:$0xff] }
 0x25f   :  { %v5474_v53 = vpop.eup %5473 }
 0x260   :  { %v6158_v56 = vmul.f32 %v5474_v53, %v5472_v52  ;;  %v1384_v53 = vld [vmem:[#allocation6 + $0xa8] sm:$0xff] }
 0x262   :  { %1014 = vmatmul.mubr.f32.vlgmr.msra.gmra.mrb[4].mxu0 %v6158_v56  ;;  %1085 = vmatmul.mubr.f32.vlgmr.msra.gmra.mrb[4].mxu1 %v6158_v56 }
 0x263   :  { %1252 = vmatprep.mubr.f32.mxu0 %v5774_v1  ;;  %1323 = vmatprep.mubr.f32.mxu1 %v5774_v1 }
 0x264   :  { %4414 = vmatpush1.bf16.msra.mxu0 %v6168_v31  ;;  %4446 = vmatpush1.bf16.msra.mxu1 %v6171_v17 }
 0x265   :  { %4416 = vmatprep.subr.bf16.mxu0 %v6176_v33  ;;  %4448 = vmatprep.subr.bf16.mxu1 %v6178_v37 }
 0x268   :  { %4418 = vmatpush1.bf16.msra.mxu0 %v6180_v40  ;;  %4450 = vmatpush1.bf16.msra.mxu1 %v6183_v49 }
 0x269   :  { %4420 = vmatprep.subr.bf16.mxu0 %v5929_v41  ;;  %4452 = vmatprep.subr.bf16.mxu1 %v5931_v42 }
 0x26c   :  { %4422 = vmatpush1.bf16.msra.mxu0 %v5935_v45  ;;  %4454 = vmatpush1.bf16.msra.mxu1 %v5937_v46 }
 0x26d   :  { %4424 = vmatprep.subr.bf16.mxu0 %v5948_v54  ;;  %4456 = vmatprep.subr.bf16.mxu1 %v5950_v55 }
 0x270   :  { %4426 = vmatpush1.bf16.msra.mxu0 %v5954_v58  ;;  %4458 = vmatpush1.bf16.msra.mxu1 %v5956_v59 }
 0x271   :  { %4428 = vmatprep.subr.bf16.mxu0 %v5967_v4  ;;  %4460 = vmatprep.subr.bf16.mxu1 %v5969_v5 }
 0x274   :  { %4430 = vmatpush1.bf16.msra.mxu0 %v5973_v8  ;;  %4462 = vmatpush1.bf16.msra.mxu1 %v5975_v9 }
 0x275   :  { %4432 = vmatprep.subr.bf16.mxu0 %v5986_v21  ;;  %4464 = vmatprep.subr.bf16.mxu1 %v5988_v22 }
 0x278   :  { %4434 = vmatpush1.bf16.msra.mxu0 %v5992_v25  ;;  %4466 = vmatpush1.bf16.msra.mxu1 %v5994_v28 }
 0x279   :  { %4436 = vmatprep.subr.bf16.mxu0 %v6005_v38  ;;  %4468 = vmatprep.subr.bf16.mxu1 %v6007_v39 }
 0x27c   :  { %4438 = vmatpush1.bf16.msra.mxu0 %v6011_v44  ;;  %4470 = vmatpush1.bf16.msra.mxu1 %v6013_v47 }
 0x27d   :  { %4440 = vmatprep.subr.bf16.mxu0 %v6024_v57  ;;  %4472 = vmatprep.subr.bf16.mxu1 %v6026_v60 }
 0x280   :  { %4442 = vmatpush1.bf16.msra.mxu0 %v6030_v61  ;;  %4474 = vmatpush1.bf16.msra.mxu1 %v6032_v62 }
 0x281   :  { %4476 = vmatprep.subr.bf16.mxu0 %v6164_v15  ;;  %4508 = vmatprep.subr.bf16.mxu1 %v6166_v30 }
 0x335   :  { %v1015_v41 = vpop.f32.mrb[4].mxu0  ;;  %v1086_v42 = vpop.f32.mrb[4].mxu1 }
 0x336   :  { %v5311_v45 = vadd.f32 %v1015_v41, %v6091_v7  ;;  %v1017_v46 = vpop.f32.mrb[5].mxu0  ;;  %v1088_v54 = vpop.f32.mrb[5].mxu1  ;;  %v5327_v4 = vadd.f32 %v1086_v42, %v6103_v29  ;;  %v1391_v41 = vld [vmem:[#allocation6 + $0xe0] sm:$0xff]  ;;  %v6248_v42 = vpack.c.bf16 %v1394_v43, %v1390_v35  ;;  %v6281_v35 = vpack.c.bf16 %v1416_v19, %v1412_v26 }
 0x337   :  { %v5312_v55 = vadd.f32 %v1017_v46, %v6095_v10  ;;  %v5328_v5 = vadd.f32 %v1088_v54, %v6107_v32  ;;  %v1389_v46 = vld [vmem:[#allocation6 + $0xd0] sm:$0xff]  ;;  %v6283_v43 = vpack.c.bf16 %v1418_v34, %v1414_v23 }
 0x338   :  { %v4175_v58 = vmul.f32 -1.442695, %v5311_v45  ;;  %v4177_v8 = vmul.f32 -1.442695, %v5327_v4  ;;  %v6250_v45 = vpack.c.bf16 %v1391_v41, %v1387_v48  ;;  %v1393_v54 = vld [vmem:[#allocation6 + $0xf0] sm:$0xff]  ;;  %v1398_v4 = vld [vmem:[#allocation6 + $0x118] sm:$0xff] }
 0x339   :  { %v4176_v59 = vmul.f32 -1.442695, %v5312_v55  ;;  %v6253_v55 = vpack.c.bf16 %v1393_v54, %v1389_v46  ;;  %v1411_v48 = vld [vmem:[#allocation6 + $0x180] sm:$0xff]  ;;  %v1413_v46 = vld [vmem:[#allocation6 + $0x190] sm:$0xff] }
 0x33a   :  { %5475 = vpow2.f32 %v4175_v58  ;;  %v1396_v58 = vld [vmem:[#allocation6 + $0x108] sm:$0xff]  ;;  %v1415_v41 = vld [vmem:[#allocation6 + $0x1a0] sm:$0xff] }
 0x33b   :  { %5477 = vpow2.f32 %v4176_v59  ;;  %v1400_v59 = vld [vmem:[#allocation6 + $0x128] sm:$0xff]  ;;  %v6286_v54 = vpack.c.bf16 %v1415_v41, %v1411_v48 }
 0x33c   :  { %5479 = vtanh.f32 %v5328_v5  ;;  %v6258_v5 = vpack.c.bf16 %v1400_v59, %v1396_v58  ;;  %v1417_v58 = vld [vmem:[#allocation6 + $0x1b0] sm:$0xff]  ;;  %v1420_v59 = vld [vmem:[#allocation6 + $0x1c8] sm:$0xff] }
 0x33d   :  { %5481 = vpow2.f32 %v4177_v8  ;;  %v1402_v8 = vld [vmem:[#allocation6 + $0x138] sm:$0xff] }
 0x344   :  { %v5476_v9 = vpop.eup %5475 }
 0x345   :  { %v1104_v21 = vadd.f32 1.0, %v5476_v9  ;;  %v5478_v22 = vpop.eup %5477  ;;  %v1395_v9 = vld [vmem:[#allocation6 + $0x100] sm:$0xff] }
 0x346   :  { %v1105_v25 = vadd.f32 1.0, %v5478_v22  ;;  %v5480_v28 = vpop.eup %5479  ;;  %v6260_v22 = vpack.c.bf16 %v1402_v8, %v1398_v4  ;;  %v1424_v4 = vld [vmem:[#allocation6 + $0x1e8] sm:$0xff]  ;;  %v6290_v8 = vpack.c.bf16 %v1417_v58, %v1413_v46 }
 0x347   :  { %5483 = vrcp.f32 %v1104_v21  ;;  %v5482_v38 = vpop.eup %5481  ;;  %v1399_v21 = vld [vmem:[#allocation6 + $0x120] sm:$0xff] }
 0x348   :  { %5485 = vrcp.f32 %v1105_v25  ;;  %v1106_v57 = vadd.f32 1.0, %v5482_v38  ;;  %v6262_v25 = vpack.c.bf16 %v1399_v21, %v1395_v9  ;;  %v1401_v38 = vld [vmem:[#allocation6 + $0x130] sm:$0xff]  ;;  %v6292_v9 = vpack.c.bf16 %v1424_v4, %v1420_v59  ;;  %v1422_v21 = vld [vmem:[#allocation6 + $0x1d8] sm:$0xff] }
 0x34a   :  { %5487 = vrcp.f32 %v1106_v57  ;;  %v1406_v57 = vld [vmem:[#allocation6 + $0x158] sm:$0xff] }
 0x351   :  { %v5484_v39 = vpop.eup %5483 }
 0x352   :  { %v1115_v44 = vmul.f32 %v5484_v39, %v5480_v28  ;;  %v5486_v47 = vpop.eup %5485  ;;  %v1397_v28 = vld [vmem:[#allocation6 + $0x110] sm:$0xff] }
 0x353   :  { %v1114_v60 = vmul.f32 %v5486_v47, %v6155_v51  ;;  %v1380_v51 = vld [vmem:[#allocation6 + $0x88] sm:$0xff]  ;;  %v6265_v39 = vpack.c.bf16 %v1401_v38, %v1397_v28  ;;  %v1426_v28 = vld [vmem:[#allocation6 + $0x1f8] sm:$0xff]  ;;  %v1419_v38 = vld [vmem:[#allocation6 + $0x1c0] sm:$0xff] }
 0x354   :  { %v5488_v62 = vpop.eup %5487  ;;  %v6234_v14 = vpack.c.bf16 %v1384_v53, %v1380_v51  ;;  %v1408_v47 = vld [vmem:[#allocation6 + $0x168] sm:$0xff]  ;;  %v1407_v51 = vld [vmem:[#allocation6 + $0x160] sm:$0xff] }
 0x355   :  { %v6219_v61 = vadd.f32 %v1115_v44, %v1114_v60  ;;  %v1404_v44 = vld [vmem:[#allocation6 + $0x148] sm:$0xff] }
 0x356   :  { %v6270_v60 = vpack.c.bf16 %v1408_v47, %v1404_v44  ;;  %v6294_v44 = vpack.c.bf16 %v1426_v28, %v1422_v21  ;;  %v1423_v47 = vld [vmem:[#allocation6 + $0x1e0] sm:$0xff] }
 0x357   :  { %5489 = vtanh.f32 %v6219_v61 }
 0x361   :  { %v5490_v50 = vpop.eup %5489 }
 0x362   :  { %v6222_v52 = vmul.f32 %v5490_v50, %v5488_v62  ;;  %v1410_v62 = vld [vmem:[#allocation6 + $0x178] sm:$0xff]  ;;  %v1403_v50 = vld [vmem:[#allocation6 + $0x140] sm:$0xff] }
 0x363   :  { %v6272_v53 = vpack.c.bf16 %v1410_v62, %v1406_v57  ;;  %v6274_v3 = vpack.c.bf16 %v1407_v51, %v1403_v50  ;;  %v1421_v57 = vld [vmem:[#allocation6 + $0x1d0] sm:$0xff]  ;;  %v6297_v50 = vpack.c.bf16 %v1423_v47, %v1419_v38 }
 0x364   :  { %1253 = vmatmul.mubr.f32.vlgmr.msra.gmra.mrb[6].mxu0 %v6222_v52  ;;  %1324 = vmatmul.mubr.f32.vlgmr.msra.gmra.mrb[6].mxu1 %v6222_v52  ;;  %v1425_v62 = vld [vmem:[#allocation6 + $0x1f0] sm:$0xff] }
 0x365   :  { %4478 = vmatpush1.bf16.msra.mxu0 %v6168_v31  ;;  %4510 = vmatpush1.bf16.msra.mxu1 %v6171_v17  ;;  %v6301_v51 = vpack.c.bf16 %v1425_v62, %v1421_v57 }
 0x366   :  { %4480 = vmatprep.subr.bf16.mxu0 %v6176_v33  ;;  %4512 = vmatprep.subr.bf16.mxu1 %v6178_v37 }
 0x367   :  { %1491 = vmatprep.mubr.f32.mxu0 %v5774_v1  ;;  %1562 = vmatprep.mubr.f32.mxu1 %v5774_v1 }
 0x369   :  { %4482 = vmatpush1.bf16.msra.mxu0 %v6180_v40  ;;  %4514 = vmatpush1.bf16.msra.mxu1 %v6183_v49 }
 0x36a   :  { %4484 = vmatprep.subr.bf16.mxu0 %v6234_v14  ;;  %4516 = vmatprep.subr.bf16.mxu1 %v6236_v27 }
 0x36d   :  { %4486 = vmatpush1.bf16.msra.mxu0 %v6238_v12  ;;  %4518 = vmatpush1.bf16.msra.mxu1 %v6241_v20 }
 0x36e   :  { %4488 = vmatprep.subr.bf16.mxu0 %v6246_v36  ;;  %4520 = vmatprep.subr.bf16.mxu1 %v6248_v42 }
 0x371   :  { %4490 = vmatpush1.bf16.msra.mxu0 %v6250_v45  ;;  %4522 = vmatpush1.bf16.msra.mxu1 %v6253_v55 }
 0x372   :  { %4492 = vmatprep.subr.bf16.mxu0 %v6258_v5  ;;  %4524 = vmatprep.subr.bf16.mxu1 %v6260_v22 }
 0x375   :  { %4494 = vmatpush1.bf16.msra.mxu0 %v6262_v25  ;;  %4526 = vmatpush1.bf16.msra.mxu1 %v6265_v39 }
 0x376   :  { %4496 = vmatprep.subr.bf16.mxu0 %v6270_v60  ;;  %4528 = vmatprep.subr.bf16.mxu1 %v6272_v53 }
 0x379   :  { %4498 = vmatpush1.bf16.msra.mxu0 %v6274_v3  ;;  %4530 = vmatpush1.bf16.msra.mxu1 %v6277_v16 }
 0x37a   :  { %4500 = vmatprep.subr.bf16.mxu0 %v6281_v35  ;;  %4532 = vmatprep.subr.bf16.mxu1 %v6283_v43 }
 0x37d   :  { %4502 = vmatpush1.bf16.msra.mxu0 %v6286_v54  ;;  %4534 = vmatpush1.bf16.msra.mxu1 %v6290_v8 }
 0x37e   :  { %4504 = vmatprep.subr.bf16.mxu0 %v6292_v9  ;;  %4536 = vmatprep.subr.bf16.mxu1 %v6294_v44 }
 0x381   :  { %4506 = vmatpush1.bf16.msra.mxu0 %v6297_v50  ;;  %4538 = vmatpush1.bf16.msra.mxu1 %v6301_v51 }
 0x382   :  { %4540 = vmatprep.subr.bf16.mxu0 %v6164_v15  ;;  %4572 = vmatprep.subr.bf16.mxu1 %v6166_v30 }
 0x437   :  { %v1254_v63 = vpop.f32.mrb[6].mxu0  ;;  %v1325_v18 = vpop.f32.mrb[6].mxu1 }
 0x438   :  { %v5313_v26 = vadd.f32 %v1254_v63, %v6091_v7  ;;  %v1256_v19 = vpop.f32.mrb[7].mxu0  ;;  %v1327_v23 = vpop.f32.mrb[7].mxu1  ;;  %v5329_v46 = vadd.f32 %v1325_v18, %v6103_v29 }
 0x439   :  { %v5314_v34 = vadd.f32 %v1256_v19, %v6095_v10  ;;  %v5330_v58 = vadd.f32 %v1327_v23, %v6107_v32 }
 0x43a   :  { %v4178_v48 = vmul.f32 -1.442695, %v5313_v26  ;;  %v4180_v59 = vmul.f32 -1.442695, %v5329_v46 }
 0x43b   :  { %v4179_v41 = vmul.f32 -1.442695, %v5314_v34 }
 0x43c   :  { %5491 = vpow2.f32 %v4178_v48 }
 0x43d   :  { %5493 = vpow2.f32 %v4179_v41 }
 0x43e   :  { %5495 = vtanh.f32 %v5330_v58 }
 0x43f   :  { %5497 = vpow2.f32 %v4180_v59 }
 0x446   :  { %v5492_v4 = vpop.eup %5491 }
 0x447   :  { %v1343_v21 = vadd.f32 1.0, %v5492_v4  ;;  %v5494_v28 = vpop.eup %5493 }
 0x448   :  { %v1344_v38 = vadd.f32 1.0, %v5494_v28  ;;  %v5496_v47 = vpop.eup %5495 }
 0x449   :  { %5499 = vrcp.f32 %v1343_v21  ;;  %v5498_v57 = vpop.eup %5497 }
 0x44a   :  { %5501 = vrcp.f32 %v1344_v38  ;;  %v1345_v19 = vadd.f32 1.0, %v5498_v57 }
 0x44c   :  { %5503 = vrcp.f32 %v1345_v19 }
 0x453   :  { %v5500_v62 = vpop.eup %5499 }
 0x454   :  { %v1354_v63 = vmul.f32 %v5500_v62, %v5496_v47  ;;  %v5502_v26 = vpop.eup %5501 }
 0x455   :  { %v1353_v34 = vmul.f32 %v5502_v26, %v6219_v61 }
 0x456   :  { %v5504_v23 = vpop.eup %5503 }
 0x457   :  { %v6313_v18 = vadd.f32 %v1354_v63, %v1353_v34 }
 0x459   :  { %5505 = vtanh.f32 %v6313_v18 }
 0x463   :  { %v5506_v48 = vpop.eup %5505 }
 0x464   :  { %v6316_v41 = vmul.f32 %v5506_v48, %v5504_v23 }
 0x466   :  { %1492 = vmatmul.mubr.f32.vlgmr.msra.gmra.mrb[8].mxu0 %v6316_v41  ;;  %1563 = vmatmul.mubr.f32.vlgmr.msra.gmra.mrb[8].mxu1 %v6316_v41 }
 0x467   :  { %4542 = vmatpush1.bf16.msra.mxu0 %v6168_v31  ;;  %4574 = vmatpush1.bf16.msra.mxu1 %v6171_v17 }
 0x468   :  { %4544 = vmatprep.subr.bf16.mxu0 %v6176_v33  ;;  %4576 = vmatprep.subr.bf16.mxu1 %v6178_v37 }
 0x469   :  { %1730 = vmatprep.mubr.f32.mxu0 %v5774_v1  ;;  %1801 = vmatprep.mubr.f32.mxu1 %v5774_v1 }
 0x46b   :  { %4546 = vmatpush1.bf16.msra.mxu0 %v6180_v40  ;;  %4578 = vmatpush1.bf16.msra.mxu1 %v6183_v49 }
 0x46c   :  { %4548 = vmatprep.subr.bf16.mxu0 %v6234_v14  ;;  %4580 = vmatprep.subr.bf16.mxu1 %v6236_v27 }
 0x46f   :  { %4550 = vmatpush1.bf16.msra.mxu0 %v6238_v12  ;;  %4582 = vmatpush1.bf16.msra.mxu1 %v6241_v20 }
 0x470   :  { %4552 = vmatprep.subr.bf16.mxu0 %v6246_v36  ;;  %4584 = vmatprep.subr.bf16.mxu1 %v6248_v42 }
 0x473   :  { %4554 = vmatpush1.bf16.msra.mxu0 %v6250_v45  ;;  %4586 = vmatpush1.bf16.msra.mxu1 %v6253_v55 }
 0x474   :  { %4556 = vmatprep.subr.bf16.mxu0 %v6258_v5  ;;  %4588 = vmatprep.subr.bf16.mxu1 %v6260_v22 }
 0x477   :  { %4558 = vmatpush1.bf16.msra.mxu0 %v6262_v25  ;;  %4590 = vmatpush1.bf16.msra.mxu1 %v6265_v39 }
 0x478   :  { %4560 = vmatprep.subr.bf16.mxu0 %v6270_v60  ;;  %4592 = vmatprep.subr.bf16.mxu1 %v6272_v53 }
 0x47b   :  { %4562 = vmatpush1.bf16.msra.mxu0 %v6274_v3  ;;  %4594 = vmatpush1.bf16.msra.mxu1 %v6277_v16 }
 0x47c   :  { %4564 = vmatprep.subr.bf16.mxu0 %v6281_v35  ;;  %4596 = vmatprep.subr.bf16.mxu1 %v6283_v43 }
 0x47f   :  { %4566 = vmatpush1.bf16.msra.mxu0 %v6286_v54  ;;  %4598 = vmatpush1.bf16.msra.mxu1 %v6290_v8 }
 0x480   :  { %4568 = vmatprep.subr.bf16.mxu0 %v6292_v9  ;;  %4600 = vmatprep.subr.bf16.mxu1 %v6294_v44 }
 0x483   :  { %4570 = vmatpush1.bf16.msra.mxu0 %v6297_v50  ;;  %4602 = vmatpush1.bf16.msra.mxu1 %v6301_v51 }
 0x484   :  { %4604 = vmatprep.subr.bf16.mxu0 %v6164_v15  ;;  %4636 = vmatprep.subr.bf16.mxu1 %v6166_v30 }
 0x539   :  { %v1493_v61 = vpop.f32.mrb[8].mxu0  ;;  %v1564_v46 = vpop.f32.mrb[8].mxu1 }
 0x53a   :  { %v5315_v58 = vadd.f32 %v1493_v61, %v6091_v7  ;;  %v1495_v59 = vpop.f32.mrb[9].mxu0  ;;  %v1566_v4 = vpop.f32.mrb[9].mxu1  ;;  %v5331_v47 = vadd.f32 %v1564_v46, %v6103_v29 }
 0x53b   :  { %v5316_v21 = vadd.f32 %v1495_v59, %v6095_v10  ;;  %v5332_v57 = vadd.f32 %v1566_v4, %v6107_v32 }
 0x53c   :  { %v4181_v28 = vmul.f32 -1.442695, %v5315_v58  ;;  %v4183_v62 = vmul.f32 -1.442695, %v5331_v47 }
 0x53d   :  { %v4182_v38 = vmul.f32 -1.442695, %v5316_v21 }
 0x53e   :  { %5507 = vpow2.f32 %v4181_v28 }
 0x53f   :  { %5509 = vpow2.f32 %v4182_v38 }
 0x540   :  { %5511 = vtanh.f32 %v5332_v57 }
 0x541   :  { %5513 = vpow2.f32 %v4183_v62 }
 0x548   :  { %v5508_v15 = vpop.eup %5507 }
 0x549   :  { %v1582_v63 = vadd.f32 1.0, %v5508_v15  ;;  %v5510_v30 = vpop.eup %5509 }
 0x54a   :  { %v1583_v26 = vadd.f32 1.0, %v5510_v30  ;;  %v5512_v19 = vpop.eup %5511 }
 0x54b   :  { %5515 = vrcp.f32 %v1582_v63  ;;  %v5514_v34 = vpop.eup %5513 }
 0x54c   :  { %5517 = vrcp.f32 %v1583_v26  ;;  %v1584_v58 = vadd.f32 1.0, %v5514_v34 }
 0x54e   :  { %5519 = vrcp.f32 %v1584_v58 }
 0x555   :  { %v5516_v23 = vpop.eup %5515 }
 0x556   :  { %v1593_v48 = vmul.f32 %v5516_v23, %v5512_v19  ;;  %v5518_v61 = vpop.eup %5517 }
 0x557   :  { %v1592_v59 = vmul.f32 %v5518_v61, %v6313_v18 }
 0x558   :  { %v5520_v4 = vpop.eup %5519 }
 0x559   :  { %v6359_v46 = vadd.f32 %v1593_v48, %v1592_v59 }
 0x55b   :  { %5521 = vtanh.f32 %v6359_v46 }
 0x565   :  { %v5522_v21 = vpop.eup %5521 }
 0x566   :  { %v6362_v28 = vmul.f32 %v5522_v21, %v5520_v4 }
 0x568   :  { %1731 = vmatmul.mubr.f32.vlgmr.msra.gmra.mrb[10].mxu0 %v6362_v28  ;;  %1802 = vmatmul.mubr.f32.vlgmr.msra.gmra.mrb[10].mxu1 %v6362_v28 }
 0x569   :  { %4606 = vmatpush1.bf16.msra.mxu0 %v6168_v31  ;;  %4638 = vmatpush1.bf16.msra.mxu1 %v6171_v17 }
 0x56a   :  { %4608 = vmatprep.subr.bf16.mxu0 %v6176_v33  ;;  %4640 = vmatprep.subr.bf16.mxu1 %v6178_v37 }
 0x56b   :  { %1969 = vmatprep.mubr.f32.mxu0 %v5774_v1  ;;  %2040 = vmatprep.mubr.f32.mxu1 %v5774_v1 }
 0x56d   :  { %4610 = vmatpush1.bf16.msra.mxu0 %v6180_v40  ;;  %4642 = vmatpush1.bf16.msra.mxu1 %v6183_v49 }
 0x56e   :  { %4612 = vmatprep.subr.bf16.mxu0 %v6234_v14  ;;  %4644 = vmatprep.subr.bf16.mxu1 %v6236_v27 }
 0x571   :  { %4614 = vmatpush1.bf16.msra.mxu0 %v6238_v12  ;;  %4646 = vmatpush1.bf16.msra.mxu1 %v6241_v20 }
 0x572   :  { %4616 = vmatprep.subr.bf16.mxu0 %v6246_v36  ;;  %4648 = vmatprep.subr.bf16.mxu1 %v6248_v42 }
 0x575   :  { %4618 = vmatpush1.bf16.msra.mxu0 %v6250_v45  ;;  %4650 = vmatpush1.bf16.msra.mxu1 %v6253_v55 }
 0x576   :  { %4620 = vmatprep.subr.bf16.mxu0 %v6258_v5  ;;  %4652 = vmatprep.subr.bf16.mxu1 %v6260_v22 }
 0x579   :  { %4622 = vmatpush1.bf16.msra.mxu0 %v6262_v25  ;;  %4654 = vmatpush1.bf16.msra.mxu1 %v6265_v39 }
 0x57a   :  { %4624 = vmatprep.subr.bf16.mxu0 %v6270_v60  ;;  %4656 = vmatprep.subr.bf16.mxu1 %v6272_v53 }
 0x57d   :  { %4626 = vmatpush1.bf16.msra.mxu0 %v6274_v3  ;;  %4658 = vmatpush1.bf16.msra.mxu1 %v6277_v16 }
 0x57e   :  { %4628 = vmatprep.subr.bf16.mxu0 %v6281_v35  ;;  %4660 = vmatprep.subr.bf16.mxu1 %v6283_v43 }
 0x581   :  { %4630 = vmatpush1.bf16.msra.mxu0 %v6286_v54  ;;  %4662 = vmatpush1.bf16.msra.mxu1 %v6290_v8 }
 0x582   :  { %4632 = vmatprep.subr.bf16.mxu0 %v6292_v9  ;;  %4664 = vmatprep.subr.bf16.mxu1 %v6294_v44 }
 0x585   :  { %4634 = vmatpush1.bf16.msra.mxu0 %v6297_v50  ;;  %4666 = vmatpush1.bf16.msra.mxu1 %v6301_v51 }
 0x63b   :  { %v1732_v31 = vpop.f32.mrb[10].mxu0  ;;  %v1803_v17 = vpop.f32.mrb[10].mxu1 }
 0x63c   :  { %v5317_v33 = vadd.f32 %v1732_v31, %v6091_v7  ;;  %v1734_v37 = vpop.f32.mrb[11].mxu0  ;;  %v1805_v40 = vpop.f32.mrb[11].mxu1  ;;  %v5333_v47 = vadd.f32 %v1803_v17, %v6103_v29 }
 0x63d   :  { %v5318_v49 = vadd.f32 %v1734_v37, %v6095_v10  ;;  %v5334_v57 = vadd.f32 %v1805_v40, %v6107_v32  ;;  %v2085_v37 = vld [vmem:[#allocation6 + $0x28] sm:$0xff] }
 0x63e   :  { %v4184_v18 = vmul.f32 -1.442695, %v5317_v33  ;;  %v4186_v62 = vmul.f32 -1.442695, %v5333_v47  ;;  %v2081_v33 = vld [vmem:[#allocation6 + $0x8] sm:$0xff] }
 0x63f   :  { %v4185_v38 = vmul.f32 -1.442695, %v5318_v49  ;;  %v4667_v40 = vpack.c.bf16 %v2085_v37, %v2081_v33  ;;  %v2087_v49 = vld [vmem:[#allocation6 + $0x38] sm:$0xff] }
 0x640   :  { %5523 = vpow2.f32 %v4184_v18  ;;  %v2080_v18 = vld [vmem:[#allocation6] sm:$0xff] }
 0x641   :  { %5525 = vpow2.f32 %v4185_v38  ;;  %v2084_v38 = vld [vmem:[#allocation6 + $0x20] sm:$0xff]  ;;  %4668 = vmatprep.subr.bf16.mxu0 %v4667_v40 }
 0x642   :  { %5527 = vtanh.f32 %v5334_v57  ;;  %v4669_v57 = vpack.c.bf16 %v2084_v38, %v2080_v18  ;;  %v2323_v38 = vld [vmem:[#allocation8] sm:$0xff] }
 0x643   :  { %5529 = vpow2.f32 %v4186_v62  ;;  %v2082_v62 = vld [vmem:[#allocation6 + $0x10] sm:$0xff] }
 0x64a   :  { %v5524_v15 = vpop.eup %5523 }
 0x64b   :  { %v1821_v63 = vadd.f32 1.0, %v5524_v15  ;;  %v5526_v30 = vpop.eup %5525  ;;  %v2086_v15 = vld [vmem:[#allocation6 + $0x30] sm:$0xff] }
 0x64c   :  { %v1822_v26 = vadd.f32 1.0, %v5526_v30  ;;  %v5528_v19 = vpop.eup %5527  ;;  %v2089_v30 = vld [vmem:[#allocation6 + $0x48] sm:$0xff] }
 0x64d   :  { %5531 = vrcp.f32 %v1821_v63  ;;  %v5530_v34 = vpop.eup %5529  ;;  %v4701_v63 = vpack.c.bf16 %v2086_v15, %v2082_v62  ;;  %v2329_v62 = vld [vmem:[#allocation8 + $0x30] sm:$0xff]  ;;  %v2332_v15 = vld [vmem:[#allocation8 + $0x48] sm:$0xff] }
 0x64e   :  { %5533 = vrcp.f32 %v1822_v26  ;;  %v1823_v58 = vadd.f32 1.0, %v5530_v34  ;;  %v2093_v26 = vld [vmem:[#allocation6 + $0x68] sm:$0xff] }
 0x64f   :  { %v4671_v34 = vpack.c.bf16 %v2093_v26, %v2089_v30  ;;  %v2334_v30 = vld [vmem:[#allocation8 + $0x58] sm:$0xff] }
 0x650   :  { %5535 = vrcp.f32 %v1823_v58  ;;  %v2338_v26 = vld [vmem:[#allocation8 + $0x78] sm:$0xff] }
 0x657   :  { %v5532_v23 = vpop.eup %5531 }
 0x658   :  { %v1832_v48 = vmul.f32 %v5532_v23, %v5528_v19  ;;  %v5534_v61 = vpop.eup %5533  ;;  %v2091_v19 = vld [vmem:[#allocation6 + $0x58] sm:$0xff] }
 0x659   :  { %v1831_v59 = vmul.f32 %v5534_v61, %v6359_v46  ;;  %v2083_v46 = vld [vmem:[#allocation6 + $0x18] sm:$0xff]  ;;  %v2092_v61 = vld [vmem:[#allocation6 + $0x60] sm:$0xff] }
 0x65a   :  { %v5536_v21 = vpop.eup %5535  ;;  %v4699_v47 = vpack.c.bf16 %v2087_v49, %v2083_v46  ;;  %v2095_v23 = vld [vmem:[#allocation6 + $0x78] sm:$0xff] }
 0x65b   :  { %v6403_v4 = vadd.f32 %v1832_v48, %v1831_v59  ;;  %v2088_v48 = vld [vmem:[#allocation6 + $0x40] sm:$0xff]  ;;  %v4703_v58 = vpack.c.bf16 %v2095_v23, %v2091_v19 }
 0x65c   :  { %4700 = vmatprep.subr.bf16.mxu1 %v4699_v47  ;;  %v4673_v59 = vpack.c.bf16 %v2092_v61, %v2088_v48  ;;  %v2327_v47 = vld [vmem:[#allocation8 + $0x20] sm:$0xff] }
 0x65d   :  { %5537 = vtanh.f32 %v6403_v4  ;;  %v4733_v23 = vpack.c.bf16 %v2327_v47, %v2323_v38  ;;  %v2331_v61 = vld [vmem:[#allocation8 + $0x40] sm:$0xff] }
 0x667   :  { %v5538_v31 = vpop.eup %5537 }
 0x668   :  { %v6406_v17 = vmul.f32 %v5538_v31, %v5536_v21  ;;  %v2090_v21 = vld [vmem:[#allocation6 + $0x50] sm:$0xff] }
 0x669   :  { %v2094_v31 = vld [vmem:[#allocation6 + $0x70] sm:$0xff] }
 0x66a   :  { %1970 = vmatmul.mubr.f32.vlgmr.msra.gmra.mrb[12].mxu0 %v6406_v17  ;;  %2041 = vmatmul.mubr.f32.vlgmr.msra.gmra.mrb[12].mxu1 %v6406_v17  ;;  %v4705_v33 = vpack.c.bf16 %v2094_v31, %v2090_v21  ;;  %v4767_v21 = vpack.c.bf16 %v2338_v26, %v2334_v30  ;;  %v2333_v31 = vld [vmem:[#allocation8 + $0x50] sm:$0xff] }
 0x66b   :  { %2208 = vmatprep.mubr.f32.mxu0 %v5774_v1  ;;  %2279 = vmatprep.mubr.f32.mxu1 %v5774_v1  ;;  %v2357_v30 = vld [vmem:[#allocation8 + $0x110] sm:$0xff] }
 0x66c   :  { %4670 = vmatpush1.bf16.msra.mxu0 %v4669_v57  ;;  %4702 = vmatpush1.bf16.msra.mxu1 %v4701_v63  ;;  %v2325_v57 = vld [vmem:[#allocation8 + $0x10] sm:$0xff]  ;;  %v2336_v63 = vld [vmem:[#allocation8 + $0x68] sm:$0xff] }
 0x66d   :  { %4672 = vmatprep.subr.bf16.mxu0 %v4671_v34  ;;  %4704 = vmatprep.subr.bf16.mxu1 %v4703_v58  ;;  %v4765_v48 = vpack.c.bf16 %v2329_v62, %v2325_v57  ;;  %v2335_v58 = vld [vmem:[#allocation8 + $0x60] sm:$0xff]  ;;  %v2361_v26 = vld [vmem:[#allocation8 + $0x130] sm:$0xff] }
 0x66e   :  { %v2355_v57 = vld [vmem:[#allocation8 + $0x100] sm:$0xff] }
 0x66f   :  { %v2359_v62 = vld [vmem:[#allocation8 + $0x120] sm:$0xff] }
 0x670   :  { %4674 = vmatpush1.bf16.msra.mxu0 %v4673_v59  ;;  %4706 = vmatpush1.bf16.msra.mxu1 %v4705_v33  ;;  %v4735_v59 = vpack.c.bf16 %v2336_v63, %v2332_v15  ;;  %v2337_v33 = vld [vmem:[#allocation8 + $0x70] sm:$0xff] }
 0x671   :  { %4676 = vmatprep.subr.bf16.mxu0 %v6234_v14  ;;  %4708 = vmatprep.subr.bf16.mxu1 %v6236_v27  ;;  %v2324_v14 = vld [vmem:[#allocation8 + $0x8] sm:$0xff] }
 0x672   :  { %v2328_v27 = vld [vmem:[#allocation8 + $0x28] sm:$0xff] }
 0x674   :  { %4678 = vmatpush1.bf16.msra.mxu0 %v6238_v12  ;;  %4710 = vmatpush1.bf16.msra.mxu1 %v6241_v20  ;;  %v2326_v12 = vld [vmem:[#allocation8 + $0x18] sm:$0xff] }
 0x675   :  { %4680 = vmatprep.subr.bf16.mxu0 %v6246_v36  ;;  %4712 = vmatprep.subr.bf16.mxu1 %v6248_v42  ;;  %v2330_v20 = vld [vmem:[#allocation8 + $0x38] sm:$0xff]  ;;  %v4731_v36 = vpack.c.bf16 %v2328_v27, %v2324_v14  ;;  %v2340_v14 = vld [vmem:[#allocation8 + $0x88] sm:$0xff] }
 0x676   :  { %v4763_v42 = vpack.c.bf16 %v2330_v20, %v2326_v12  ;;  %v2344_v27 = vld [vmem:[#allocation8 + $0xa8] sm:$0xff]  ;;  %v2342_v12 = vld [vmem:[#allocation8 + $0x98] sm:$0xff] }
 0x677   :  { %v2346_v20 = vld [vmem:[#allocation8 + $0xb8] sm:$0xff] }
 0x678   :  { %4682 = vmatpush1.bf16.msra.mxu0 %v6250_v45  ;;  %4714 = vmatpush1.bf16.msra.mxu1 %v6253_v55 }
 0x679   :  { %4684 = vmatprep.subr.bf16.mxu0 %v6258_v5  ;;  %4716 = vmatprep.subr.bf16.mxu1 %v6260_v22 }
 0x67c   :  { %4686 = vmatpush1.bf16.msra.mxu0 %v6262_v25  ;;  %4718 = vmatpush1.bf16.msra.mxu1 %v6265_v39 }
 0x67d   :  { %4688 = vmatprep.subr.bf16.mxu0 %v6270_v60  ;;  %4720 = vmatprep.subr.bf16.mxu1 %v6272_v53 }
 0x680   :  { %4690 = vmatpush1.bf16.msra.mxu0 %v6274_v3  ;;  %4722 = vmatpush1.bf16.msra.mxu1 %v6277_v16 }
 0x681   :  { %4692 = vmatprep.subr.bf16.mxu0 %v6281_v35  ;;  %4724 = vmatprep.subr.bf16.mxu1 %v6283_v43 }
 0x684   :  { %4694 = vmatpush1.bf16.msra.mxu0 %v6286_v54  ;;  %4726 = vmatpush1.bf16.msra.mxu1 %v6290_v8 }
 0x685   :  { %4696 = vmatprep.subr.bf16.mxu0 %v6292_v9  ;;  %4728 = vmatprep.subr.bf16.mxu1 %v6294_v44 }
 0x688   :  { %4698 = vmatpush1.bf16.msra.mxu0 %v6297_v50  ;;  %4730 = vmatpush1.bf16.msra.mxu1 %v6301_v51 }
 0x689   :  { %4732 = vmatprep.subr.bf16.mxu0 %v4731_v36  ;;  %4764 = vmatprep.subr.bf16.mxu1 %v4763_v42  ;;  %v4737_v36 = vpack.c.bf16 %v2335_v58, %v2331_v61  ;;  %v4769_v42 = vpack.c.bf16 %v2337_v33, %v2333_v31  ;;  %v4749_v61 = vpack.c.bf16 %v2359_v62, %v2355_v57  ;;  %v2673_v62 = vld [vmem:[#allocation10 + $0x10] sm:$0xff] }
 0x68a   :  { %v4781_v58 = vpack.c.bf16 %v2361_v26, %v2357_v30  ;;  %v2684_v30 = vld [vmem:[#allocation10 + $0x68] sm:$0xff]  ;;  %v2682_v26 = vld [vmem:[#allocation10 + $0x58] sm:$0xff] }
 0x73d   :  { %v1971_v45 = vpop.f32.mrb[12].mxu0  ;;  %v2042_v55 = vpop.f32.mrb[12].mxu1 }
 0x73e   :  { %v5319_v5 = vadd.f32 %v1971_v45, %v6091_v7  ;;  %v1973_v22 = vpop.f32.mrb[13].mxu0  ;;  %v2044_v25 = vpop.f32.mrb[13].mxu1  ;;  %v5335_v3 = vadd.f32 %v2042_v55, %v6103_v29  ;;  %v2339_v45 = vld [vmem:[#allocation8 + $0x80] sm:$0xff] }
 0x73f   :  { %v5320_v39 = vadd.f32 %v1973_v22, %v6095_v10  ;;  %v5336_v16 = vadd.f32 %v2044_v25, %v6107_v32  ;;  %v2343_v55 = vld [vmem:[#allocation8 + $0xa0] sm:$0xff]  ;;  %v4771_v22 = vpack.c.bf16 %v2346_v20, %v2342_v12  ;;  %v2341_v25 = vld [vmem:[#allocation8 + $0x90] sm:$0xff]  ;;  %v2372_v12 = vld [vmem:[#allocation8 + $0x188] sm:$0xff] }
 0x740   :  { %v4187_v60 = vmul.f32 -1.442695, %v5319_v5  ;;  %v4189_v35 = vmul.f32 -1.442695, %v5335_v3  ;;  %v4739_v5 = vpack.c.bf16 %v2344_v27, %v2340_v14  ;;  %v2350_v3 = vld [vmem:[#allocation8 + $0xd8] sm:$0xff]  ;;  %v2365_v14 = vld [vmem:[#allocation8 + $0x150] sm:$0xff] }
 0x741   :  { %v4188_v53 = vmul.f32 -1.442695, %v5320_v39  ;;  %v2345_v39 = vld [vmem:[#allocation8 + $0xb0] sm:$0xff]  ;;  %v2376_v20 = vld [vmem:[#allocation8 + $0x1a8] sm:$0xff] }
 0x742   :  { %5539 = vpow2.f32 %v4187_v60  ;;  %v2348_v60 = vld [vmem:[#allocation8 + $0xc8] sm:$0xff]  ;;  %v2369_v27 = vld [vmem:[#allocation8 + $0x170] sm:$0xff] }
 0x743   :  { %5541 = vpow2.f32 %v4188_v53  ;;  %v2352_v53 = vld [vmem:[#allocation8 + $0xe8] sm:$0xff] }
 0x744   :  { %5543 = vtanh.f32 %v5336_v16  ;;  %v2354_v16 = vld [vmem:[#allocation8 + $0xf8] sm:$0xff] }
 0x745   :  { %5545 = vpow2.f32 %v4189_v35  ;;  %v4741_v35 = vpack.c.bf16 %v2343_v55, %v2339_v45  ;;  %v4785_v55 = vpack.c.bf16 %v2369_v27, %v2365_v14  ;;  %v2692_v14 = vld [vmem:[#allocation10 + $0xa8] sm:$0xff]  ;;  %v2690_v27 = vld [vmem:[#allocation10 + $0x98] sm:$0xff] }
 0x74c   :  { %v5540_v43 = vpop.eup %5539 }
 0x74d   :  { %v2060_v54 = vadd.f32 1.0, %v5540_v43  ;;  %v5542_v8 = vpop.eup %5541  ;;  %v4773_v43 = vpack.c.bf16 %v2345_v39, %v2341_v25  ;;  %v4755_v25 = vpack.c.bf16 %v2376_v20, %v2372_v12  ;;  %v2694_v20 = vld [vmem:[#allocation10 + $0xb8] sm:$0xff] }
 0x74e   :  { %v2061_v9 = vadd.f32 1.0, %v5542_v8  ;;  %v5544_v44 = vpop.eup %5543  ;;  %v2351_v8 = vld [vmem:[#allocation8 + $0xe0] sm:$0xff] }
 0x74f   :  { %5547 = vrcp.f32 %v2060_v54  ;;  %v5546_v50 = vpop.eup %5545  ;;  %v2347_v54 = vld [vmem:[#allocation8 + $0xc0] sm:$0xff] }
 0x750   :  { %5549 = vrcp.f32 %v2061_v9  ;;  %v2062_v40 = vadd.f32 1.0, %v5546_v50  ;;  %v4743_v9 = vpack.c.bf16 %v2352_v53, %v2348_v60  ;;  %v2349_v50 = vld [vmem:[#allocation8 + $0xd0] sm:$0xff]  ;;  %v4745_v38 = vpack.c.bf16 %v2351_v8, %v2347_v54 }
 0x751   :  { %v2373_v60 = vld [vmem:[#allocation8 + $0x190] sm:$0xff] }
 0x752   :  { %5551 = vrcp.f32 %v2062_v40  ;;  %v2358_v40 = vld [vmem:[#allocation8 + $0x118] sm:$0xff]  ;;  %v2377_v53 = vld [vmem:[#allocation8 + $0x1b0] sm:$0xff] }
 0x753   :  { %v4789_v8 = vpack.c.bf16 %v2377_v53, %v2373_v60  ;;  %v2700_v60 = vld [vmem:[#allocation10 + $0xe8] sm:$0xff]  ;;  %v2698_v53 = vld [vmem:[#allocation10 + $0xd8] sm:$0xff] }
 0x759   :  { %v5548_v51 = vpop.eup %5547 }
 0x75a   :  { %v2071_v37 = vmul.f32 %v5548_v51, %v5544_v44  ;;  %v5550_v46 = vpop.eup %5549  ;;  %v4775_v44 = vpack.c.bf16 %v2354_v16, %v2350_v3  ;;  %v2353_v51 = vld [vmem:[#allocation8 + $0xf0] sm:$0xff]  ;;  %v2380_v3 = vld [vmem:[#allocation8 + $0x1c8] sm:$0xff] }
 0x75b   :  { %v2070_v49 = vmul.f32 %v5550_v46, %v6403_v4  ;;  %v2360_v46 = vld [vmem:[#allocation8 + $0x128] sm:$0xff]  ;;  %v4777_v47 = vpack.c.bf16 %v2353_v51, %v2349_v50  ;;  %v2383_v51 = vld [vmem:[#allocation8 + $0x1e0] sm:$0xff] }
 0x75c   :  { %v5552_v19 = vpop.eup %5551  ;;  %v2384_v16 = vld [vmem:[#allocation8 + $0x1e8] sm:$0xff] }
 0x75d   :  { %v6441_v18 = vadd.f32 %v2071_v37, %v2070_v49  ;;  %v2356_v37 = vld [vmem:[#allocation8 + $0x108] sm:$0xff]  ;;  %v2362_v49 = vld [vmem:[#allocation8 + $0x138] sm:$0xff] }
 0x75e   :  { %v4747_v15 = vpack.c.bf16 %v2360_v46, %v2356_v37  ;;  %v4779_v63 = vpack.c.bf16 %v2362_v49, %v2358_v40  ;;  %v2381_v37 = vld [vmem:[#allocation8 + $0x1d0] sm:$0xff] }
 0x75f   :  { %5553 = vtanh.f32 %v6441_v18  ;;  %v2385_v46 = vld [vmem:[#allocation8 + $0x1f0] sm:$0xff] }
 0x760   :  { %v4793_v49 = vpack.c.bf16 %v2385_v46, %v2381_v37  ;;  %v2708_v37 = vld [vmem:[#allocation10 + $0x128] sm:$0xff]  ;;  %v2706_v46 = vld [vmem:[#allocation10 + $0x118] sm:$0xff] }
 0x769   :  { %v5554_v34 = vpop.eup %5553 }
 0x76a   :  { %v6444_v4 = vmul.f32 %v5554_v34, %v5552_v19  ;;  %v2364_v19 = vld [vmem:[#allocation8 + $0x148] sm:$0xff] }
 0x76b   :  { %v2368_v34 = vld [vmem:[#allocation8 + $0x168] sm:$0xff] }
 0x76c   :  { %2209 = vmatmul.mubr.f32.vlgmr.msra.gmra.mrb[14].mxu0 %v6444_v4  ;;  %2280 = vmatmul.mubr.f32.vlgmr.msra.gmra.mrb[14].mxu1 %v6444_v4  ;;  %v4751_v31 = vpack.c.bf16 %v2368_v34, %v2364_v19  ;;  %v2686_v34 = vld [vmem:[#allocation10 + $0x78] sm:$0xff] }
 0x76d   :  { %4734 = vmatpush1.bf16.msra.mxu0 %v4733_v23  ;;  %4766 = vmatpush1.bf16.msra.mxu1 %v4765_v48  ;;  %v2366_v23 = vld [vmem:[#allocation8 + $0x158] sm:$0xff] }
 0x76e   :  { %4736 = vmatprep.subr.bf16.mxu0 %v4735_v59  ;;  %4768 = vmatprep.subr.bf16.mxu1 %v4767_v21  ;;  %v2370_v48 = vld [vmem:[#allocation8 + $0x178] sm:$0xff]  ;;  %v2363_v59 = vld [vmem:[#allocation8 + $0x140] sm:$0xff] }
 0x76f   :  { %2473 = vmatprep.mubr.f32.mxu0 %v5774_v1  ;;  %2586 = vmatprep.mubr.f32.mxu1 %v5774_v1  ;;  %v2367_v21 = vld [vmem:[#allocation8 + $0x160] sm:$0xff]  ;;  %v4783_v33 = vpack.c.bf16 %v2370_v48, %v2366_v23 }
 0x770   :  { %v4753_v45 = vpack.c.bf16 %v2367_v21, %v2363_v59  ;;  %v2679_v23 = vld [vmem:[#allocation10 + $0x40] sm:$0xff]  ;;  %v2681_v59 = vld [vmem:[#allocation10 + $0x50] sm:$0xff] }
 0x771   :  { %4738 = vmatpush1.bf16.msra.mxu0 %v4737_v36  ;;  %4770 = vmatpush1.bf16.msra.mxu1 %v4769_v42  ;;  %v2374_v36 = vld [vmem:[#allocation8 + $0x198] sm:$0xff]  ;;  %v2683_v48 = vld [vmem:[#allocation10 + $0x60] sm:$0xff]  ;;  %v2685_v21 = vld [vmem:[#allocation10 + $0x70] sm:$0xff] }
 0x772   :  { %4740 = vmatprep.subr.bf16.mxu0 %v4739_v5  ;;  %4772 = vmatprep.subr.bf16.mxu1 %v4771_v22  ;;  %v2378_v42 = vld [vmem:[#allocation8 + $0x1b8] sm:$0xff]  ;;  %v2371_v5 = vld [vmem:[#allocation8 + $0x180] sm:$0xff] }
 0x773   :  { %v2375_v22 = vld [vmem:[#allocation8 + $0x1a0] sm:$0xff]  ;;  %v4787_v39 = vpack.c.bf16 %v2378_v42, %v2374_v36 }
 0x774   :  { %v4757_v54 = vpack.c.bf16 %v2375_v22, %v2371_v5  ;;  %v2687_v36 = vld [vmem:[#allocation10 + $0x80] sm:$0xff]  ;;  %v2689_v5 = vld [vmem:[#allocation10 + $0x90] sm:$0xff] }
 0x775   :  { %4742 = vmatpush1.bf16.msra.mxu0 %v4741_v35  ;;  %4774 = vmatpush1.bf16.msra.mxu1 %v4773_v43  ;;  %v2382_v35 = vld [vmem:[#allocation8 + $0x1d8] sm:$0xff]  ;;  %v2691_v42 = vld [vmem:[#allocation10 + $0xa0] sm:$0xff]  ;;  %v2693_v22 = vld [vmem:[#allocation10 + $0xb0] sm:$0xff] }
 0x776   :  { %4744 = vmatprep.subr.bf16.mxu0 %v4743_v9  ;;  %4776 = vmatprep.subr.bf16.mxu1 %v4775_v44  ;;  %v2386_v43 = vld [vmem:[#allocation8 + $0x1f8] sm:$0xff]  ;;  %v2379_v9 = vld [vmem:[#allocation8 + $0x1c0] sm:$0xff]  ;;  %v4759_v44 = vpack.c.bf16 %v2384_v16, %v2380_v3 }
 0x777   :  { %v4791_v50 = vpack.c.bf16 %v2386_v43, %v2382_v35  ;;  %v4761_v40 = vpack.c.bf16 %v2383_v51, %v2379_v9  ;;  %v2702_v16 = vld [vmem:[#allocation10 + $0xf8] sm:$0xff]  ;;  %v2695_v35 = vld [vmem:[#allocation10 + $0xc0] sm:$0xff]  ;;  %v2697_v9 = vld [vmem:[#allocation10 + $0xd0] sm:$0xff] }
 0x778   :  { %v2699_v43 = vld [vmem:[#allocation10 + $0xe0] sm:$0xff]  ;;  %v2704_v51 = vld [vmem:[#allocation10 + $0x108] sm:$0xff] }
 0x779   :  { %4746 = vmatpush1.bf16.msra.mxu0 %v4745_v38  ;;  %4778 = vmatpush1.bf16.msra.mxu1 %v4777_v47  ;;  %v2671_v38 = vld [vmem:[#allocation10] sm:$0xff] }
 0x77a   :  { %4748 = vmatprep.subr.bf16.mxu0 %v4747_v15  ;;  %4780 = vmatprep.subr.bf16.mxu1 %v4779_v63  ;;  %v2677_v15 = vld [vmem:[#allocation10 + $0x30] sm:$0xff]  ;;  %v2680_v63 = vld [vmem:[#allocation10 + $0x48] sm:$0xff] }
 0x77b   :  { %v6490_v19 = vpack.c.bf16 %v2684_v30, %v2680_v63  ;;  %v2716_v63 = vld [vmem:[#allocation10 + $0x168] sm:$0xff]  ;;  %v2714_v30 = vld [vmem:[#allocation10 + $0x158] sm:$0xff] }
 0x77d   :  { %4750 = vmatpush1.bf16.msra.mxu0 %v4749_v61  ;;  %4782 = vmatpush1.bf16.msra.mxu1 %v4781_v58  ;;  %v6492_v61 = vpack.c.bf16 %v2686_v34, %v2682_v26  ;;  %v6494_v58 = vpack.c.bf16 %v2683_v48, %v2679_v23  ;;  %v2718_v26 = vld [vmem:[#allocation10 + $0x178] sm:$0xff]  ;;  %v2711_v48 = vld [vmem:[#allocation10 + $0x140] sm:$0xff] }
 0x77e   :  { %4752 = vmatprep.subr.bf16.mxu0 %v4751_v31  ;;  %4784 = vmatprep.subr.bf16.mxu1 %v4783_v33  ;;  %v6497_v31 = vpack.c.bf16 %v2685_v21, %v2681_v59  ;;  %v2688_v33 = vld [vmem:[#allocation10 + $0x88] sm:$0xff]  ;;  %v6539_v23 = vpack.c.bf16 %v2718_v26, %v2714_v30  ;;  %v2715_v59 = vld [vmem:[#allocation10 + $0x160] sm:$0xff]  ;;  %v2713_v21 = vld [vmem:[#allocation10 + $0x150] sm:$0xff] }
 0x77f   :  { %v6502_v12 = vpack.c.bf16 %v2692_v14, %v2688_v33  ;;  %v6542_v33 = vpack.c.bf16 %v2715_v59, %v2711_v48  ;;  %v2717_v14 = vld [vmem:[#allocation10 + $0x170] sm:$0xff] }
 0x781   :  { %4754 = vmatpush1.bf16.msra.mxu0 %v4753_v45  ;;  %4786 = vmatpush1.bf16.msra.mxu1 %v4785_v55  ;;  %v6504_v45 = vpack.c.bf16 %v2694_v20, %v2690_v27  ;;  %v6506_v55 = vpack.c.bf16 %v2691_v42, %v2687_v36  ;;  %v2720_v27 = vld [vmem:[#allocation10 + $0x188] sm:$0xff]  ;;  %v6546_v36 = vpack.c.bf16 %v2717_v14, %v2713_v21 }
 0x782   :  { %4756 = vmatprep.subr.bf16.mxu0 %v4755_v25  ;;  %4788 = vmatprep.subr.bf16.mxu1 %v4787_v39  ;;  %v6509_v25 = vpack.c.bf16 %v2693_v22, %v2689_v5  ;;  %v2696_v39 = vld [vmem:[#allocation10 + $0xc8] sm:$0xff]  ;;  %v2722_v5 = vld [vmem:[#allocation10 + $0x198] sm:$0xff] }
 0x783   :  { %v6514_v3 = vpack.c.bf16 %v2700_v60, %v2696_v39  ;;  %v2724_v20 = vld [vmem:[#allocation10 + $0x1a8] sm:$0xff]  ;;  %v2726_v22 = vld [vmem:[#allocation10 + $0x1b8] sm:$0xff]  ;;  %v2719_v39 = vld [vmem:[#allocation10 + $0x180] sm:$0xff] }
 0x784   :  { %v6548_v42 = vpack.c.bf16 %v2724_v20, %v2720_v27  ;;  %v6550_v60 = vpack.c.bf16 %v2726_v22, %v2722_v5 }
 0x785   :  { %4758 = vmatpush1.bf16.msra.mxu0 %v4757_v54  ;;  %4790 = vmatpush1.bf16.msra.mxu1 %v4789_v8  ;;  %v6516_v54 = vpack.c.bf16 %v2702_v16, %v2698_v53  ;;  %v6518_v8 = vpack.c.bf16 %v2699_v43, %v2695_v35  ;;  %v2723_v53 = vld [vmem:[#allocation10 + $0x1a0] sm:$0xff]  ;;  %v2721_v16 = vld [vmem:[#allocation10 + $0x190] sm:$0xff] }
 0x786   :  { %4760 = vmatprep.subr.bf16.mxu0 %v4759_v44  ;;  %4792 = vmatprep.subr.bf16.mxu1 %v4791_v50  ;;  %v2701_v44 = vld [vmem:[#allocation10 + $0xf0] sm:$0xff]  ;;  %v6553_v43 = vpack.c.bf16 %v2723_v53, %v2719_v39 }
 0x787   :  { %v6521_v50 = vpack.c.bf16 %v2701_v44, %v2697_v9  ;;  %v2725_v35 = vld [vmem:[#allocation10 + $0x1b0] sm:$0xff]  ;;  %v2728_v44 = vld [vmem:[#allocation10 + $0x1c8] sm:$0xff] }
 0x788   :  { %v6557_v9 = vpack.c.bf16 %v2725_v35, %v2721_v16 }
 0x789   :  { %4762 = vmatpush1.bf16.msra.mxu0 %v4761_v40  ;;  %4794 = vmatpush1.bf16.msra.mxu1 %v4793_v49  ;;  %v6526_v40 = vpack.c.bf16 %v2708_v37, %v2704_v51  ;;  %v2710_v49 = vld [vmem:[#allocation10 + $0x138] sm:$0xff]  ;;  %v2732_v51 = vld [vmem:[#allocation10 + $0x1e8] sm:$0xff] }
 0x78a   :  { %v2730_v37 = vld [vmem:[#allocation10 + $0x1d8] sm:$0xff] }
 0x78c   :  { %2474 = vmatmul.mubr.f32.vlgmr.msra.gmra.mrb[16].mxu0 %v6114_v11  ;;  %2587 = vmatmul.mubr.f32.vlgmr.msra.gmra.mrb[16].mxu1 %v6114_v11  ;;  %v2672_v11 = vld [vmem:[#allocation10 + $0x8] sm:$0xff] }
 0x78d   :  { %2479 = vmatprep.mubr.f32.mxu0 %v5774_v1  ;;  %2592 = vmatprep.mubr.f32.mxu1 %v5774_v1 }
 0x790   :  { %2480 = vmatmul.mubr.f32.gmra.mrb[18].mxu0 %v6158_v56  ;;  %2593 = vmatmul.mubr.f32.gmra.mrb[18].mxu1 %v6158_v56  ;;  %v2676_v56 = vld [vmem:[#allocation10 + $0x28] sm:$0xff] }
 0x791   :  { %2485 = vmatprep.mubr.f32.mxu0 %v5774_v1  ;;  %2598 = vmatprep.mubr.f32.mxu1 %v5774_v1 }
 0x794   :  { %2486 = vmatmul.mubr.f32.gmra.mrb[20].mxu0 %v6222_v52  ;;  %2599 = vmatmul.mubr.f32.gmra.mrb[20].mxu1 %v6222_v52  ;;  %v2674_v52 = vld [vmem:[#allocation10 + $0x18] sm:$0xff] }
 0x795   :  { %2491 = vmatprep.mubr.f32.mxu0 %v5774_v1  ;;  %2604 = vmatprep.mubr.f32.mxu1 %v5774_v1 }
 0x798   :  { %2492 = vmatmul.mubr.f32.gmra.mrb[22].mxu0 %v6316_v41  ;;  %2605 = vmatmul.mubr.f32.gmra.mrb[22].mxu1 %v6316_v41  ;;  %v6478_v41 = vpack.c.bf16 %v2676_v56, %v2672_v11  ;;  %v2703_v11 = vld [vmem:[#allocation10 + $0x100] sm:$0xff] }
 0x799   :  { %2497 = vmatprep.mubr.f32.mxu0 %v5774_v1  ;;  %2610 = vmatprep.mubr.f32.mxu1 %v5774_v1  ;;  %v2707_v56 = vld [vmem:[#allocation10 + $0x120] sm:$0xff] }
 0x79a   :  { %4796 = vmatprep.subr.bf16.mxu0 %v6478_v41 }
 0x79c   :  { %2498 = vmatmul.mubr.f32.gmra.mrb[24].mxu0 %v6362_v28  ;;  %2611 = vmatmul.mubr.f32.gmra.mrb[24].mxu1 %v6362_v28  ;;  %v2678_v28 = vld [vmem:[#allocation10 + $0x38] sm:$0xff] }
 0x79d   :  { %2503 = vmatprep.mubr.f32.mxu0 %v5774_v1  ;;  %2616 = vmatprep.mubr.f32.mxu1 %v5774_v1  ;;  %v6480_v47 = vpack.c.bf16 %v2678_v28, %v2674_v52  ;;  %v6528_v52 = vpack.c.bf16 %v2710_v49, %v2706_v46  ;;  %v6530_v28 = vpack.c.bf16 %v2707_v56, %v2703_v11  ;;  %v2734_v49 = vld [vmem:[#allocation10 + $0x1f8] sm:$0xff]  ;;  %v2727_v11 = vld [vmem:[#allocation10 + $0x1c0] sm:$0xff] }
 0x79e   :  { %v6562_v46 = vpack.c.bf16 %v2732_v51, %v2728_v44  ;;  %v2731_v56 = vld [vmem:[#allocation10 + $0x1e0] sm:$0xff] }
 0x79f   :  { %4828 = vmatprep.subr.bf16.mxu1 %v6480_v47 }
 0x7a0   :  { %2504 = vmatmul.mubr.f32.gmra.mrb[26].mxu0 %v6406_v17  ;;  %2617 = vmatmul.mubr.f32.gmra.mrb[26].mxu1 %v6406_v17  ;;  %v2675_v17 = vld [vmem:[#allocation10 + $0x20] sm:$0xff] }
 0x7a1   :  { %2509 = vmatprep.mubr.f32.mxu0 %v5774_v1  ;;  %2622 = vmatprep.mubr.f32.mxu1 %v5774_v1  ;;  %v6482_v57 = vpack.c.bf16 %v2675_v17, %v2671_v38  ;;  %v2705_v38 = vld [vmem:[#allocation10 + $0x110] sm:$0xff] }
 0x7a2   :  { %v2709_v17 = vld [vmem:[#allocation10 + $0x130] sm:$0xff] }
 0x7a3   :  { %4798 = vmatpush1.bf16.msra.mxu0 %v6482_v57 }
 0x7a4   :  { %2510 = vmatmul.mubr.f32.gmra.mrb[28].mxu0 %v6444_v4  ;;  %2623 = vmatmul.mubr.f32.gmra.mrb[28].mxu1 %v6444_v4  ;;  %v6485_v4 = vpack.c.bf16 %v2677_v15, %v2673_v62  ;;  %v2712_v62 = vld [vmem:[#allocation10 + $0x148] sm:$0xff]  ;;  %v6533_v15 = vpack.c.bf16 %v2709_v17, %v2705_v38  ;;  %v6564_v38 = vpack.c.bf16 %v2734_v49, %v2730_v37 }
 0x7a5   :  { %2515 = vmatprep.mubr.f32.mxu0 %v5774_v1  ;;  %2628 = vmatprep.mubr.f32.mxu1 %v5774_v1  ;;  %v6537_v34 = vpack.c.bf16 %v2716_v63, %v2712_v62  ;;  %v6566_v17 = vpack.c.bf16 %v2731_v56, %v2727_v11  ;;  %v2729_v62 = vld [vmem:[#allocation10 + $0x1d0] sm:$0xff] }
 0x7a6   :  { %4830 = vmatpush1.bf16.msra.mxu1 %v6485_v4  ;;  %4800 = vmatprep.subr.bf16.mxu0 %v6490_v19  ;;  %v2733_v63 = vld [vmem:[#allocation10 + $0x1f0] sm:$0xff] }
 0x7a7   :  { %4832 = vmatprep.subr.bf16.mxu1 %v6492_v61  ;;  %4802 = vmatpush1.bf16.msra.mxu0 %v6494_v58  ;;  %v6569_v30 = vpack.c.bf16 %v2733_v63, %v2729_v62 }
 0x7a8   :  { %4804 = vmatprep.subr.bf16.mxu0 %v6502_v12 }
 0x7aa   :  { %4834 = vmatpush1.bf16.msra.mxu1 %v6497_v31 }
 0x7ab   :  { %4836 = vmatprep.subr.bf16.mxu1 %v6504_v45  ;;  %4806 = vmatpush1.bf16.msra.mxu0 %v6506_v55 }
 0x7ac   :  { %4808 = vmatprep.subr.bf16.mxu0 %v6514_v3 }
 0x7ae   :  { %4838 = vmatpush1.bf16.msra.mxu1 %v6509_v25 }
 0x7af   :  { %4840 = vmatprep.subr.bf16.mxu1 %v6516_v54  ;;  %4810 = vmatpush1.bf16.msra.mxu0 %v6518_v8 }
 0x7b0   :  { %4812 = vmatprep.subr.bf16.mxu0 %v6526_v40 }
 0x7b2   :  { %4842 = vmatpush1.bf16.msra.mxu1 %v6521_v50 }
 0x7b3   :  { %4844 = vmatprep.subr.bf16.mxu1 %v6528_v52  ;;  %4814 = vmatpush1.bf16.msra.mxu0 %v6530_v28 }
 0x7b4   :  { %4816 = vmatprep.subr.bf16.mxu0 %v6537_v34 }
 0x7b6   :  { %4846 = vmatpush1.bf16.msra.mxu1 %v6533_v15 }
 0x7b7   :  { %4848 = vmatprep.subr.bf16.mxu1 %v6539_v23  ;;  %4818 = vmatpush1.bf16.msra.mxu0 %v6542_v33 }
 0x7b8   :  { %4820 = vmatprep.subr.bf16.mxu0 %v6548_v42 }
 0x7ba   :  { %4850 = vmatpush1.bf16.msra.mxu1 %v6546_v36 }
 0x7bb   :  { %4852 = vmatprep.subr.bf16.mxu1 %v6550_v60  ;;  %4822 = vmatpush1.bf16.msra.mxu0 %v6553_v43 }
 0x7bc   :  { %4824 = vmatprep.subr.bf16.mxu0 %v6562_v46 }
 0x7be   :  { %4854 = vmatpush1.bf16.msra.mxu1 %v6557_v9 }
 0x7bf   :  { %4856 = vmatprep.subr.bf16.mxu1 %v6564_v38  ;;  %4826 = vmatpush1.bf16.msra.mxu0 %v6566_v17 }
 0x7c0   :  { %4860 = vmatprep.subr.bf16.mxu0 %v6478_v41 }
 0x7c2   :  { %4858 = vmatpush1.bf16.msra.mxu1 %v6569_v30 }
 0x7c3   :  { %4892 = vmatprep.subr.bf16.mxu1 %v6480_v47 }
 0x83f   :  { %v2210_v26 = vpop.f32.mrb[14].mxu0  ;;  %v2281_v48 = vpop.f32.mrb[14].mxu1 }
 0x840   :  { %v5321_v59 = vadd.f32 %v2210_v26, %v6091_v7  ;;  %v2212_v21 = vpop.f32.mrb[15].mxu0  ;;  %v2283_v14 = vpop.f32.mrb[15].mxu1  ;;  %v5337_v22 = vadd.f32 %v2281_v48, %v6103_v29 }
 0x841   :  { %v5322_v27 = vadd.f32 %v2212_v21, %v6095_v10  ;;  %v5338_v39 = vadd.f32 %v2283_v14, %v6107_v32 }
 0x842   :  { %v4190_v20 = vmul.f32 -1.442695, %v5321_v59  ;;  %v4192_v53 = vmul.f32 -1.442695, %v5337_v22 }
 0x843   :  { %v4191_v5 = vmul.f32 -1.442695, %v5322_v27 }
 0x844   :  { %5555 = vpow2.f32 %v4190_v20 }
 0x845   :  { %5557 = vpow2.f32 %v4191_v5 }
 0x846   :  { %5559 = vtanh.f32 %v5338_v39 }
 0x847   :  { %5561 = vpow2.f32 %v4192_v53 }
 0x84e   :  { %v5556_v16 = vpop.eup %5555 }
 0x84f   :  { %v2299_v35 = vadd.f32 1.0, %v5556_v16  ;;  %v5558_v44 = vpop.eup %5557 }
 0x850   :  { %v2300_v7 = vadd.f32 1.0, %v5558_v44  ;;  %v5560_v51 = vpop.eup %5559 }
 0x851   :  { %5563 = vrcp.f32 %v2299_v35  ;;  %v5562_v37 = vpop.eup %5561 }
 0x852   :  { %5565 = vrcp.f32 %v2300_v7  ;;  %v2301_v56 = vadd.f32 1.0, %v5562_v37 }
 0x854   :  { %5567 = vrcp.f32 %v2301_v56 }
 0x85b   :  { %v5564_v10 = vpop.eup %5563 }
 0x85c   :  { %v2310_v49 = vmul.f32 %v5564_v10, %v5560_v51  ;;  %v5566_v11 = vpop.eup %5565 }
 0x85d   :  { %v2309_v62 = vmul.f32 %v5566_v11, %v6441_v18  ;;  %v2387_v18 = vld [vmem:[%s6908_s6] sm:$0xf] }
 0x85e   :  { %v5568_v32 = vpop.eup %5567  ;;  %v6624_v48 = vrot.slane %v2387_v18, %v89_v2  ;;  %v6628_v59 = vrot.slane %v2387_v18, %v93_v6  ;;  %v6634_v16 = vrot.slane %v2387_v18, %v97_v13  ;;  %v6638_v2 = vrot.slane %v2387_v18, %v101_v24 }
 0x85f   :  { %v2311_v29 = vadd.f32 %v2310_v49, %v2309_v62 }
 0x861   :  { %5569 = vtanh.f32 %v2311_v29 }
 0x86b   :  { %v5570_v63 = vpop.eup %5569 }
 0x86c   :  { %v2313_v26 = vmul.f32 %v5570_v63, %v5568_v32 }
 0x86e   :  { %2516 = vmatmul.mubr.f32.gmra.mrb[30].mxu0 %v2313_v26  ;;  %2629 = vmatmul.mubr.f32.gmra.mrb[30].mxu1 %v2313_v26 }
 0x86f   :  { %2799 = vmatprep.mubr.f32.mxu0 %v5774_v1  ;;  %2870 = vmatprep.mubr.f32.mxu1 %v5774_v1 }
 0x872   :  { %2800 = vmatmul.mubr.f32.vlgmr.msra.gmra.mrb[16].mxu0 %v5774_v1  ;;  %2871 = vmatmul.mubr.f32.vlgmr.msra.gmra.mrb[16].mxu1 %v5774_v1 }
 0x873   :  { %4862 = vmatpush1.bf16.msra.mxu0 %v6482_v57  ;;  %4894 = vmatpush1.bf16.msra.mxu1 %v6485_v4 }
 0x874   :  { %4864 = vmatprep.subr.bf16.mxu0 %v6490_v19  ;;  %4896 = vmatprep.subr.bf16.mxu1 %v6492_v61 }
 0x875   :  { %2973 = vmatprep.mubr.f32.mxu0 %v5774_v1  ;;  %3044 = vmatprep.mubr.f32.mxu1 %v5774_v1 }
 0x877   :  { %4866 = vmatpush1.bf16.msra.mxu0 %v6494_v58  ;;  %4898 = vmatpush1.bf16.msra.mxu1 %v6497_v31 }
 0x878   :  { %4868 = vmatprep.subr.bf16.mxu0 %v6502_v12  ;;  %4900 = vmatprep.subr.bf16.mxu1 %v6504_v45 }
 0x87b   :  { %4870 = vmatpush1.bf16.msra.mxu0 %v6506_v55  ;;  %4902 = vmatpush1.bf16.msra.mxu1 %v6509_v25 }
 0x87c   :  { %4872 = vmatprep.subr.bf16.mxu0 %v6514_v3  ;;  %4904 = vmatprep.subr.bf16.mxu1 %v6516_v54 }
 0x87f   :  { %4874 = vmatpush1.bf16.msra.mxu0 %v6518_v8  ;;  %4906 = vmatpush1.bf16.msra.mxu1 %v6521_v50 }
 0x880   :  { %4876 = vmatprep.subr.bf16.mxu0 %v6526_v40  ;;  %4908 = vmatprep.subr.bf16.mxu1 %v6528_v52 }
 0x883   :  { %4878 = vmatpush1.bf16.msra.mxu0 %v6530_v28  ;;  %4910 = vmatpush1.bf16.msra.mxu1 %v6533_v15 }
 0x884   :  { %4880 = vmatprep.subr.bf16.mxu0 %v6537_v34  ;;  %4912 = vmatprep.subr.bf16.mxu1 %v6539_v23 }
 0x887   :  { %4882 = vmatpush1.bf16.msra.mxu0 %v6542_v33  ;;  %4914 = vmatpush1.bf16.msra.mxu1 %v6546_v36 }
 0x888   :  { %4884 = vmatprep.subr.bf16.mxu0 %v6548_v42  ;;  %4916 = vmatprep.subr.bf16.mxu1 %v6550_v60 }
 0x88b   :  { %4886 = vmatpush1.bf16.msra.mxu0 %v6553_v43  ;;  %4918 = vmatpush1.bf16.msra.mxu1 %v6557_v9 }
 0x88c   :  { %4888 = vmatprep.subr.bf16.mxu0 %v6562_v46  ;;  %4920 = vmatprep.subr.bf16.mxu1 %v6564_v38 }
 0x88f   :  { %4890 = vmatpush1.bf16.msra.mxu0 %v6566_v17  ;;  %4922 = vmatpush1.bf16.msra.mxu1 %v6569_v30 }
 0x890   :  { %4924 = vmatprep.subr.bf16.mxu0 %v6478_v41  ;;  %4956 = vmatprep.subr.bf16.mxu1 %v6480_v47 }
 0x945   :  { %v2801_v21 = vpop.f32.mrb[16].mxu0  ;;  %v2872_v14 = vpop.f32.mrb[16].mxu1 }
 0x946   :  { %v5339_v27 = vadd.f32 %v2801_v21, %v6624_v48  ;;  %v2803_v20 = vpop.f32.mrb[17].mxu0  ;;  %v2874_v5 = vpop.f32.mrb[17].mxu1  ;;  %v5355_v6 = vadd.f32 %v2872_v14, %v6634_v16 }
 0x947   :  { %v5340_v22 = vadd.f32 %v2803_v20, %v6628_v59  ;;  %v5356_v35 = vadd.f32 %v2874_v5, %v6638_v2 }
 0x948   :  { %v4193_v39 = vmul.f32 -1.442695, %v5339_v27  ;;  %v4195_v44 = vmul.f32 -1.442695, %v5355_v6 }
 0x949   :  { %v4194_v53 = vmul.f32 -1.442695, %v5340_v22 }
 0x94a   :  { %5571 = vpow2.f32 %v4193_v39 }
 0x94b   :  { %5573 = vpow2.f32 %v4194_v53 }
 0x94c   :  { %5575 = vtanh.f32 %v5356_v35 }
 0x94d   :  { %5577 = vpow2.f32 %v4195_v44 }
 0x954   :  { %v5572_v7 = vpop.eup %5571 }
 0x955   :  { %v2890_v51 = vadd.f32 1.0, %v5572_v7  ;;  %v5574_v37 = vpop.eup %5573 }
 0x956   :  { %v2891_v10 = vadd.f32 1.0, %v5574_v37  ;;  %v5576_v13 = vpop.eup %5575 }
 0x957   :  { %5579 = vrcp.f32 %v2890_v51  ;;  %v5578_v49 = vpop.eup %5577 }
 0x958   :  { %5581 = vrcp.f32 %v2891_v10  ;;  %v2892_v24 = vadd.f32 1.0, %v5578_v49 }
 0x95a   :  { %5583 = vrcp.f32 %v2892_v24 }
 0x961   :  { %v5580_v11 = vpop.eup %5579 }
 0x962   :  { %v2901_v56 = vmul.f32 %v5580_v11, %v5576_v13  ;;  %v5582_v0 = vpop.eup %5581 }
 0x963   :  { %v2900_v62 = vmul.f32 0.0, %v5582_v0 }
 0x964   :  { %v5584_v32 = vpop.eup %5583 }
 0x965   :  { %v6642_v29 = vadd.f32 %v2901_v56, %v2900_v62 }
 0x967   :  { %5585 = vtanh.f32 %v6642_v29 }
 0x971   :  { %v5586_v63 = vpop.eup %5585 }
 0x972   :  { %v2904_v26 = vmul.f32 %v5586_v63, %v5584_v32 }
 0x974   :  { %2974 = vmatmul.mubr.f32.vlgmr.msra.gmra.mrb[18].mxu0 %v2904_v26  ;;  %3045 = vmatmul.mubr.f32.vlgmr.msra.gmra.mrb[18].mxu1 %v2904_v26 }
 0x975   :  { %4926 = vmatpush1.bf16.msra.mxu0 %v6482_v57  ;;  %4958 = vmatpush1.bf16.msra.mxu1 %v6485_v4 }
 0x976   :  { %4928 = vmatprep.subr.bf16.mxu0 %v6490_v19  ;;  %4960 = vmatprep.subr.bf16.mxu1 %v6492_v61 }
 0x977   :  { %3147 = vmatprep.mubr.f32.mxu0 %v5774_v1  ;;  %3218 = vmatprep.mubr.f32.mxu1 %v5774_v1 }
 0x979   :  { %4930 = vmatpush1.bf16.msra.mxu0 %v6494_v58  ;;  %4962 = vmatpush1.bf16.msra.mxu1 %v6497_v31 }
 0x97a   :  { %4932 = vmatprep.subr.bf16.mxu0 %v6502_v12  ;;  %4964 = vmatprep.subr.bf16.mxu1 %v6504_v45 }
 0x97d   :  { %4934 = vmatpush1.bf16.msra.mxu0 %v6506_v55  ;;  %4966 = vmatpush1.bf16.msra.mxu1 %v6509_v25 }
 0x97e   :  { %4936 = vmatprep.subr.bf16.mxu0 %v6514_v3  ;;  %4968 = vmatprep.subr.bf16.mxu1 %v6516_v54 }
 0x981   :  { %4938 = vmatpush1.bf16.msra.mxu0 %v6518_v8  ;;  %4970 = vmatpush1.bf16.msra.mxu1 %v6521_v50 }
 0x982   :  { %4940 = vmatprep.subr.bf16.mxu0 %v6526_v40  ;;  %4972 = vmatprep.subr.bf16.mxu1 %v6528_v52 }
 0x985   :  { %4942 = vmatpush1.bf16.msra.mxu0 %v6530_v28  ;;  %4974 = vmatpush1.bf16.msra.mxu1 %v6533_v15 }
 0x986   :  { %4944 = vmatprep.subr.bf16.mxu0 %v6537_v34  ;;  %4976 = vmatprep.subr.bf16.mxu1 %v6539_v23 }
 0x989   :  { %4946 = vmatpush1.bf16.msra.mxu0 %v6542_v33  ;;  %4978 = vmatpush1.bf16.msra.mxu1 %v6546_v36 }
 0x98a   :  { %4948 = vmatprep.subr.bf16.mxu0 %v6548_v42  ;;  %4980 = vmatprep.subr.bf16.mxu1 %v6550_v60 }
 0x98d   :  { %4950 = vmatpush1.bf16.msra.mxu0 %v6553_v43  ;;  %4982 = vmatpush1.bf16.msra.mxu1 %v6557_v9 }
 0x98e   :  { %4952 = vmatprep.subr.bf16.mxu0 %v6562_v46  ;;  %4984 = vmatprep.subr.bf16.mxu1 %v6564_v38 }
 0x991   :  { %4954 = vmatpush1.bf16.msra.mxu0 %v6566_v17  ;;  %4986 = vmatpush1.bf16.msra.mxu1 %v6569_v30 }
 0x992   :  { %4988 = vmatprep.subr.bf16.mxu0 %v6478_v41  ;;  %5020 = vmatprep.subr.bf16.mxu1 %v6480_v47 }
 0xa47   :  { %v2975_v18 = vpop.f32.mrb[18].mxu0  ;;  %v3046_v21 = vpop.f32.mrb[18].mxu1 }
 0xa48   :  { %v5341_v14 = vadd.f32 %v2975_v18, %v6624_v48  ;;  %v2977_v27 = vpop.f32.mrb[19].mxu0  ;;  %v3048_v20 = vpop.f32.mrb[19].mxu1  ;;  %v5357_v53 = vadd.f32 %v3046_v21, %v6634_v16 }
 0xa49   :  { %v5342_v5 = vadd.f32 %v2977_v27, %v6628_v59  ;;  %v5358_v6 = vadd.f32 %v3048_v20, %v6638_v2 }
 0xa4a   :  { %v4196_v22 = vmul.f32 -1.442695, %v5341_v14  ;;  %v4198_v35 = vmul.f32 -1.442695, %v5357_v53 }
 0xa4b   :  { %v4197_v39 = vmul.f32 -1.442695, %v5342_v5 }
 0xa4c   :  { %5587 = vpow2.f32 %v4196_v22 }
 0xa4d   :  { %5589 = vpow2.f32 %v4197_v39 }
 0xa4e   :  { %5591 = vtanh.f32 %v5358_v6 }
 0xa4f   :  { %5593 = vpow2.f32 %v4198_v35 }
 0xa56   :  { %v5588_v44 = vpop.eup %5587 }
 0xa57   :  { %v3064_v7 = vadd.f32 1.0, %v5588_v44  ;;  %v5590_v51 = vpop.eup %5589 }
 0xa58   :  { %v3065_v37 = vadd.f32 1.0, %v5590_v51  ;;  %v5592_v10 = vpop.eup %5591 }
 0xa59   :  { %5595 = vrcp.f32 %v3064_v7  ;;  %v5594_v13 = vpop.eup %5593 }
 0xa5a   :  { %5597 = vrcp.f32 %v3065_v37  ;;  %v3066_v0 = vadd.f32 1.0, %v5594_v13 }
 0xa5c   :  { %5599 = vrcp.f32 %v3066_v0 }
 0xa63   :  { %v5596_v49 = vpop.eup %5595 }
 0xa64   :  { %v3075_v11 = vmul.f32 %v5596_v49, %v5592_v10  ;;  %v5598_v56 = vpop.eup %5597 }
 0xa65   :  { %v3074_v24 = vmul.f32 %v5598_v56, %v6642_v29 }
 0xa66   :  { %v5600_v32 = vpop.eup %5599 }
 0xa67   :  { %v6684_v62 = vadd.f32 %v3075_v11, %v3074_v24 }
 0xa69   :  { %5601 = vtanh.f32 %v6684_v62 }
 0xa73   :  { %v5602_v63 = vpop.eup %5601 }
 0xa74   :  { %v3078_v26 = vmul.f32 %v5602_v63, %v5600_v32 }
 0xa76   :  { %3148 = vmatmul.mubr.f32.vlgmr.msra.gmra.mrb[20].mxu0 %v3078_v26  ;;  %3219 = vmatmul.mubr.f32.vlgmr.msra.gmra.mrb[20].mxu1 %v3078_v26 }
 0xa77   :  { %4990 = vmatpush1.bf16.msra.mxu0 %v6482_v57  ;;  %5022 = vmatpush1.bf16.msra.mxu1 %v6485_v4 }
 0xa78   :  { %4992 = vmatprep.subr.bf16.mxu0 %v6490_v19  ;;  %5024 = vmatprep.subr.bf16.mxu1 %v6492_v61 }
 0xa79   :  { %3321 = vmatprep.mubr.f32.mxu0 %v5774_v1  ;;  %3392 = vmatprep.mubr.f32.mxu1 %v5774_v1 }
 0xa7b   :  { %4994 = vmatpush1.bf16.msra.mxu0 %v6494_v58  ;;  %5026 = vmatpush1.bf16.msra.mxu1 %v6497_v31 }
 0xa7c   :  { %4996 = vmatprep.subr.bf16.mxu0 %v6502_v12  ;;  %5028 = vmatprep.subr.bf16.mxu1 %v6504_v45 }
 0xa7f   :  { %4998 = vmatpush1.bf16.msra.mxu0 %v6506_v55  ;;  %5030 = vmatpush1.bf16.msra.mxu1 %v6509_v25 }
 0xa80   :  { %5000 = vmatprep.subr.bf16.mxu0 %v6514_v3  ;;  %5032 = vmatprep.subr.bf16.mxu1 %v6516_v54 }
 0xa83   :  { %5002 = vmatpush1.bf16.msra.mxu0 %v6518_v8  ;;  %5034 = vmatpush1.bf16.msra.mxu1 %v6521_v50 }
 0xa84   :  { %5004 = vmatprep.subr.bf16.mxu0 %v6526_v40  ;;  %5036 = vmatprep.subr.bf16.mxu1 %v6528_v52 }
 0xa87   :  { %5006 = vmatpush1.bf16.msra.mxu0 %v6530_v28  ;;  %5038 = vmatpush1.bf16.msra.mxu1 %v6533_v15 }
 0xa88   :  { %5008 = vmatprep.subr.bf16.mxu0 %v6537_v34  ;;  %5040 = vmatprep.subr.bf16.mxu1 %v6539_v23 }
 0xa8b   :  { %5010 = vmatpush1.bf16.msra.mxu0 %v6542_v33  ;;  %5042 = vmatpush1.bf16.msra.mxu1 %v6546_v36 }
 0xa8c   :  { %5012 = vmatprep.subr.bf16.mxu0 %v6548_v42  ;;  %5044 = vmatprep.subr.bf16.mxu1 %v6550_v60 }
 0xa8f   :  { %5014 = vmatpush1.bf16.msra.mxu0 %v6553_v43  ;;  %5046 = vmatpush1.bf16.msra.mxu1 %v6557_v9 }
 0xa90   :  { %5016 = vmatprep.subr.bf16.mxu0 %v6562_v46  ;;  %5048 = vmatprep.subr.bf16.mxu1 %v6564_v38 }
 0xa93   :  { %5018 = vmatpush1.bf16.msra.mxu0 %v6566_v17  ;;  %5050 = vmatpush1.bf16.msra.mxu1 %v6569_v30 }
 0xa94   :  { %5052 = vmatprep.subr.bf16.mxu0 %v6478_v41  ;;  %5084 = vmatprep.subr.bf16.mxu1 %v6480_v47 }
 0xb49   :  { %v3149_v29 = vpop.f32.mrb[20].mxu0  ;;  %v3220_v18 = vpop.f32.mrb[20].mxu1 }
 0xb4a   :  { %v5343_v21 = vadd.f32 %v3149_v29, %v6624_v48  ;;  %v3151_v14 = vpop.f32.mrb[21].mxu0  ;;  %v3222_v27 = vpop.f32.mrb[21].mxu1  ;;  %v5359_v39 = vadd.f32 %v3220_v18, %v6634_v16 }
 0xb4b   :  { %v5344_v20 = vadd.f32 %v3151_v14, %v6628_v59  ;;  %v5360_v53 = vadd.f32 %v3222_v27, %v6638_v2 }
 0xb4c   :  { %v4199_v5 = vmul.f32 -1.442695, %v5343_v21  ;;  %v4201_v6 = vmul.f32 -1.442695, %v5359_v39 }
 0xb4d   :  { %v4200_v22 = vmul.f32 -1.442695, %v5344_v20 }
 0xb4e   :  { %5603 = vpow2.f32 %v4199_v5 }
 0xb4f   :  { %5605 = vpow2.f32 %v4200_v22 }
 0xb50   :  { %5607 = vtanh.f32 %v5360_v53 }
 0xb51   :  { %5609 = vpow2.f32 %v4201_v6 }
 0xb58   :  { %v5604_v35 = vpop.eup %5603 }
 0xb59   :  { %v3238_v44 = vadd.f32 1.0, %v5604_v35  ;;  %v5606_v7 = vpop.eup %5605 }
 0xb5a   :  { %v3239_v51 = vadd.f32 1.0, %v5606_v7  ;;  %v5608_v37 = vpop.eup %5607 }
 0xb5b   :  { %5611 = vrcp.f32 %v3238_v44  ;;  %v5610_v10 = vpop.eup %5609 }
 0xb5c   :  { %5613 = vrcp.f32 %v3239_v51  ;;  %v3240_v56 = vadd.f32 1.0, %v5610_v10 }
 0xb5e   :  { %5615 = vrcp.f32 %v3240_v56 }
 0xb65   :  { %v5612_v13 = vpop.eup %5611 }
 0xb66   :  { %v3249_v49 = vmul.f32 %v5612_v13, %v5608_v37  ;;  %v5614_v11 = vpop.eup %5613 }
 0xb67   :  { %v3248_v0 = vmul.f32 %v5614_v11, %v6684_v62 }
 0xb68   :  { %v5616_v32 = vpop.eup %5615 }
 0xb69   :  { %v6726_v24 = vadd.f32 %v3249_v49, %v3248_v0 }
 0xb6b   :  { %5617 = vtanh.f32 %v6726_v24 }
 0xb75   :  { %v5618_v63 = vpop.eup %5617 }
 0xb76   :  { %v3252_v26 = vmul.f32 %v5618_v63, %v5616_v32 }
 0xb78   :  { %3322 = vmatmul.mubr.f32.vlgmr.msra.gmra.mrb[22].mxu0 %v3252_v26  ;;  %3393 = vmatmul.mubr.f32.vlgmr.msra.gmra.mrb[22].mxu1 %v3252_v26 }
 0xb79   :  { %5054 = vmatpush1.bf16.msra.mxu0 %v6482_v57  ;;  %5086 = vmatpush1.bf16.msra.mxu1 %v6485_v4 }
 0xb7a   :  { %5056 = vmatprep.subr.bf16.mxu0 %v6490_v19  ;;  %5088 = vmatprep.subr.bf16.mxu1 %v6492_v61 }
 0xb7b   :  { %3495 = vmatprep.mubr.f32.mxu0 %v5774_v1  ;;  %3566 = vmatprep.mubr.f32.mxu1 %v5774_v1 }
 0xb7d   :  { %5058 = vmatpush1.bf16.msra.mxu0 %v6494_v58  ;;  %5090 = vmatpush1.bf16.msra.mxu1 %v6497_v31 }
 0xb7e   :  { %5060 = vmatprep.subr.bf16.mxu0 %v6502_v12  ;;  %5092 = vmatprep.subr.bf16.mxu1 %v6504_v45 }
 0xb81   :  { %5062 = vmatpush1.bf16.msra.mxu0 %v6506_v55  ;;  %5094 = vmatpush1.bf16.msra.mxu1 %v6509_v25 }
 0xb82   :  { %5064 = vmatprep.subr.bf16.mxu0 %v6514_v3  ;;  %5096 = vmatprep.subr.bf16.mxu1 %v6516_v54 }
 0xb85   :  { %5066 = vmatpush1.bf16.msra.mxu0 %v6518_v8  ;;  %5098 = vmatpush1.bf16.msra.mxu1 %v6521_v50 }
 0xb86   :  { %5068 = vmatprep.subr.bf16.mxu0 %v6526_v40  ;;  %5100 = vmatprep.subr.bf16.mxu1 %v6528_v52 }
 0xb89   :  { %5070 = vmatpush1.bf16.msra.mxu0 %v6530_v28  ;;  %5102 = vmatpush1.bf16.msra.mxu1 %v6533_v15 }
 0xb8a   :  { %5072 = vmatprep.subr.bf16.mxu0 %v6537_v34  ;;  %5104 = vmatprep.subr.bf16.mxu1 %v6539_v23 }
 0xb8d   :  { %5074 = vmatpush1.bf16.msra.mxu0 %v6542_v33  ;;  %5106 = vmatpush1.bf16.msra.mxu1 %v6546_v36 }
 0xb8e   :  { %5076 = vmatprep.subr.bf16.mxu0 %v6548_v42  ;;  %5108 = vmatprep.subr.bf16.mxu1 %v6550_v60 }
 0xb91   :  { %5078 = vmatpush1.bf16.msra.mxu0 %v6553_v43  ;;  %5110 = vmatpush1.bf16.msra.mxu1 %v6557_v9 }
 0xb92   :  { %5080 = vmatprep.subr.bf16.mxu0 %v6562_v46  ;;  %5112 = vmatprep.subr.bf16.mxu1 %v6564_v38 }
 0xb95   :  { %5082 = vmatpush1.bf16.msra.mxu0 %v6566_v17  ;;  %5114 = vmatpush1.bf16.msra.mxu1 %v6569_v30 }
 0xb96   :  { %5116 = vmatprep.subr.bf16.mxu0 %v6478_v41  ;;  %5148 = vmatprep.subr.bf16.mxu1 %v6480_v47 }
 0xc4b   :  { %v3323_v62 = vpop.f32.mrb[22].mxu0  ;;  %v3394_v29 = vpop.f32.mrb[22].mxu1 }
 0xc4c   :  { %v5345_v18 = vadd.f32 %v3323_v62, %v6624_v48  ;;  %v3325_v21 = vpop.f32.mrb[23].mxu0  ;;  %v3396_v14 = vpop.f32.mrb[23].mxu1  ;;  %v5361_v22 = vadd.f32 %v3394_v29, %v6634_v16 }
 0xc4d   :  { %v5346_v27 = vadd.f32 %v3325_v21, %v6628_v59  ;;  %v5362_v39 = vadd.f32 %v3396_v14, %v6638_v2 }
 0xc4e   :  { %v4202_v20 = vmul.f32 -1.442695, %v5345_v18  ;;  %v4204_v53 = vmul.f32 -1.442695, %v5361_v22 }
 0xc4f   :  { %v4203_v5 = vmul.f32 -1.442695, %v5346_v27 }
 0xc50   :  { %5619 = vpow2.f32 %v4202_v20 }
 0xc51   :  { %5621 = vpow2.f32 %v4203_v5 }
 0xc52   :  { %5623 = vtanh.f32 %v5362_v39 }
 0xc53   :  { %5625 = vpow2.f32 %v4204_v53 }
 0xc5a   :  { %v5620_v6 = vpop.eup %5619 }
 0xc5b   :  { %v3412_v35 = vadd.f32 1.0, %v5620_v6  ;;  %v5622_v44 = vpop.eup %5621 }
 0xc5c   :  { %v3413_v7 = vadd.f32 1.0, %v5622_v44  ;;  %v5624_v51 = vpop.eup %5623 }
 0xc5d   :  { %5627 = vrcp.f32 %v3412_v35  ;;  %v5626_v37 = vpop.eup %5625 }
 0xc5e   :  { %5629 = vrcp.f32 %v3413_v7  ;;  %v3414_v11 = vadd.f32 1.0, %v5626_v37 }
 0xc60   :  { %5631 = vrcp.f32 %v3414_v11 }
 0xc67   :  { %v5628_v10 = vpop.eup %5627 }
 0xc68   :  { %v3423_v13 = vmul.f32 %v5628_v10, %v5624_v51  ;;  %v5630_v49 = vpop.eup %5629 }
 0xc69   :  { %v3422_v56 = vmul.f32 %v5630_v49, %v6726_v24 }
 0xc6a   :  { %v5632_v32 = vpop.eup %5631 }
 0xc6b   :  { %v6768_v0 = vadd.f32 %v3423_v13, %v3422_v56 }
 0xc6d   :  { %5633 = vtanh.f32 %v6768_v0 }
 0xc77   :  { %v5634_v63 = vpop.eup %5633 }
 0xc78   :  { %v3426_v26 = vmul.f32 %v5634_v63, %v5632_v32 }
 0xc7a   :  { %3496 = vmatmul.mubr.f32.vlgmr.msra.gmra.mrb[24].mxu0 %v3426_v26  ;;  %3567 = vmatmul.mubr.f32.vlgmr.msra.gmra.mrb[24].mxu1 %v3426_v26 }
 0xc7b   :  { %5118 = vmatpush1.bf16.msra.mxu0 %v6482_v57  ;;  %5150 = vmatpush1.bf16.msra.mxu1 %v6485_v4 }
 0xc7c   :  { %5120 = vmatprep.subr.bf16.mxu0 %v6490_v19  ;;  %5152 = vmatprep.subr.bf16.mxu1 %v6492_v61 }
 0xc7d   :  { %3669 = vmatprep.mubr.f32.mxu0 %v5774_v1  ;;  %3740 = vmatprep.mubr.f32.mxu1 %v5774_v1 }
 0xc7f   :  { %5122 = vmatpush1.bf16.msra.mxu0 %v6494_v58  ;;  %5154 = vmatpush1.bf16.msra.mxu1 %v6497_v31 }
 0xc80   :  { %5124 = vmatprep.subr.bf16.mxu0 %v6502_v12  ;;  %5156 = vmatprep.subr.bf16.mxu1 %v6504_v45 }
 0xc83   :  { %5126 = vmatpush1.bf16.msra.mxu0 %v6506_v55  ;;  %5158 = vmatpush1.bf16.msra.mxu1 %v6509_v25 }
 0xc84   :  { %5128 = vmatprep.subr.bf16.mxu0 %v6514_v3  ;;  %5160 = vmatprep.subr.bf16.mxu1 %v6516_v54 }
 0xc87   :  { %5130 = vmatpush1.bf16.msra.mxu0 %v6518_v8  ;;  %5162 = vmatpush1.bf16.msra.mxu1 %v6521_v50 }
 0xc88   :  { %5132 = vmatprep.subr.bf16.mxu0 %v6526_v40  ;;  %5164 = vmatprep.subr.bf16.mxu1 %v6528_v52 }
 0xc8b   :  { %5134 = vmatpush1.bf16.msra.mxu0 %v6530_v28  ;;  %5166 = vmatpush1.bf16.msra.mxu1 %v6533_v15 }
 0xc8c   :  { %5136 = vmatprep.subr.bf16.mxu0 %v6537_v34  ;;  %5168 = vmatprep.subr.bf16.mxu1 %v6539_v23 }
 0xc8f   :  { %5138 = vmatpush1.bf16.msra.mxu0 %v6542_v33  ;;  %5170 = vmatpush1.bf16.msra.mxu1 %v6546_v36 }
 0xc90   :  { %5140 = vmatprep.subr.bf16.mxu0 %v6548_v42  ;;  %5172 = vmatprep.subr.bf16.mxu1 %v6550_v60 }
 0xc93   :  { %5142 = vmatpush1.bf16.msra.mxu0 %v6553_v43  ;;  %5174 = vmatpush1.bf16.msra.mxu1 %v6557_v9 }
 0xc94   :  { %5144 = vmatprep.subr.bf16.mxu0 %v6562_v46  ;;  %5176 = vmatprep.subr.bf16.mxu1 %v6564_v38 }
 0xc97   :  { %5146 = vmatpush1.bf16.msra.mxu0 %v6566_v17  ;;  %5178 = vmatpush1.bf16.msra.mxu1 %v6569_v30 }
 0xc98   :  { %5180 = vmatprep.subr.bf16.mxu0 %v6478_v41  ;;  %5212 = vmatprep.subr.bf16.mxu1 %v6480_v47 }
 0xd4d   :  { %v3497_v24 = vpop.f32.mrb[24].mxu0  ;;  %v3568_v62 = vpop.f32.mrb[24].mxu1 }
 0xd4e   :  { %v5347_v29 = vadd.f32 %v3497_v24, %v6624_v48  ;;  %v3499_v18 = vpop.f32.mrb[25].mxu0  ;;  %v3570_v21 = vpop.f32.mrb[25].mxu1  ;;  %v5363_v5 = vadd.f32 %v3568_v62, %v6634_v16 }
 0xd4f   :  { %v5348_v14 = vadd.f32 %v3499_v18, %v6628_v59  ;;  %v5364_v22 = vadd.f32 %v3570_v21, %v6638_v2 }
 0xd50   :  { %v4205_v27 = vmul.f32 -1.442695, %v5347_v29  ;;  %v4207_v39 = vmul.f32 -1.442695, %v5363_v5 }
 0xd51   :  { %v4206_v20 = vmul.f32 -1.442695, %v5348_v14 }
 0xd52   :  { %5635 = vpow2.f32 %v4205_v27 }
 0xd53   :  { %5637 = vpow2.f32 %v4206_v20 }
 0xd54   :  { %5639 = vtanh.f32 %v5364_v22 }
 0xd55   :  { %5641 = vpow2.f32 %v4207_v39 }
 0xd5c   :  { %v5636_v53 = vpop.eup %5635 }
 0xd5d   :  { %v3586_v6 = vadd.f32 1.0, %v5636_v53  ;;  %v5638_v35 = vpop.eup %5637 }
 0xd5e   :  { %v3587_v44 = vadd.f32 1.0, %v5638_v35  ;;  %v5640_v7 = vpop.eup %5639 }
 0xd5f   :  { %5643 = vrcp.f32 %v3586_v6  ;;  %v5642_v51 = vpop.eup %5641 }
 0xd60   :  { %5645 = vrcp.f32 %v3587_v44  ;;  %v3588_v49 = vadd.f32 1.0, %v5642_v51 }
 0xd62   :  { %5647 = vrcp.f32 %v3588_v49 }
 0xd69   :  { %v5644_v37 = vpop.eup %5643 }
 0xd6a   :  { %v3597_v10 = vmul.f32 %v5644_v37, %v5640_v7  ;;  %v5646_v13 = vpop.eup %5645 }
 0xd6b   :  { %v3596_v11 = vmul.f32 %v5646_v13, %v6768_v0 }
 0xd6c   :  { %v5648_v32 = vpop.eup %5647 }
 0xd6d   :  { %v6810_v56 = vadd.f32 %v3597_v10, %v3596_v11 }
 0xd6f   :  { %5649 = vtanh.f32 %v6810_v56 }
 0xd79   :  { %v5650_v63 = vpop.eup %5649 }
 0xd7a   :  { %v3600_v26 = vmul.f32 %v5650_v63, %v5648_v32 }
 0xd7c   :  { %3670 = vmatmul.mubr.f32.vlgmr.msra.gmra.mrb[26].mxu0 %v3600_v26  ;;  %3741 = vmatmul.mubr.f32.vlgmr.msra.gmra.mrb[26].mxu1 %v3600_v26 }
 0xd7d   :  { %5182 = vmatpush1.bf16.msra.mxu0 %v6482_v57  ;;  %5214 = vmatpush1.bf16.msra.mxu1 %v6485_v4 }
 0xd7e   :  { %5184 = vmatprep.subr.bf16.mxu0 %v6490_v19  ;;  %5216 = vmatprep.subr.bf16.mxu1 %v6492_v61 }
 0xd7f   :  { %3843 = vmatprep.mubr.f32.mxu0 %v5774_v1  ;;  %3914 = vmatprep.mubr.f32.mxu1 %v5774_v1 }
 0xd81   :  { %5186 = vmatpush1.bf16.msra.mxu0 %v6494_v58  ;;  %5218 = vmatpush1.bf16.msra.mxu1 %v6497_v31 }
 0xd82   :  { %5188 = vmatprep.subr.bf16.mxu0 %v6502_v12  ;;  %5220 = vmatprep.subr.bf16.mxu1 %v6504_v45 }
 0xd85   :  { %5190 = vmatpush1.bf16.msra.mxu0 %v6506_v55  ;;  %5222 = vmatpush1.bf16.msra.mxu1 %v6509_v25 }
 0xd86   :  { %5192 = vmatprep.subr.bf16.mxu0 %v6514_v3  ;;  %5224 = vmatprep.subr.bf16.mxu1 %v6516_v54 }
 0xd89   :  { %5194 = vmatpush1.bf16.msra.mxu0 %v6518_v8  ;;  %5226 = vmatpush1.bf16.msra.mxu1 %v6521_v50 }
 0xd8a   :  { %5196 = vmatprep.subr.bf16.mxu0 %v6526_v40  ;;  %5228 = vmatprep.subr.bf16.mxu1 %v6528_v52 }
 0xd8d   :  { %5198 = vmatpush1.bf16.msra.mxu0 %v6530_v28  ;;  %5230 = vmatpush1.bf16.msra.mxu1 %v6533_v15 }
 0xd8e   :  { %5200 = vmatprep.subr.bf16.mxu0 %v6537_v34  ;;  %5232 = vmatprep.subr.bf16.mxu1 %v6539_v23 }
 0xd91   :  { %5202 = vmatpush1.bf16.msra.mxu0 %v6542_v33  ;;  %5234 = vmatpush1.bf16.msra.mxu1 %v6546_v36 }
 0xd92   :  { %5204 = vmatprep.subr.bf16.mxu0 %v6548_v42  ;;  %5236 = vmatprep.subr.bf16.mxu1 %v6550_v60 }
 0xd95   :  { %5206 = vmatpush1.bf16.msra.mxu0 %v6553_v43  ;;  %5238 = vmatpush1.bf16.msra.mxu1 %v6557_v9 }
 0xd96   :  { %5208 = vmatprep.subr.bf16.mxu0 %v6562_v46  ;;  %5240 = vmatprep.subr.bf16.mxu1 %v6564_v38 }
 0xd99   :  { %5210 = vmatpush1.bf16.msra.mxu0 %v6566_v17  ;;  %5242 = vmatpush1.bf16.msra.mxu1 %v6569_v30 }
 0xd9a   :  { %5244 = vmatprep.subr.bf16.mxu0 %v6478_v41  ;;  %5276 = vmatprep.subr.bf16.mxu1 %v6480_v47 }
 0xe4f   :  { %v3671_v0 = vpop.f32.mrb[26].mxu0  ;;  %v3742_v24 = vpop.f32.mrb[26].mxu1 }
 0xe50   :  { %v5349_v62 = vadd.f32 %v3671_v0, %v6624_v48  ;;  %v3673_v29 = vpop.f32.mrb[27].mxu0  ;;  %v3744_v18 = vpop.f32.mrb[27].mxu1  ;;  %v5365_v20 = vadd.f32 %v3742_v24, %v6634_v16 }
 0xe51   :  { %v5350_v21 = vadd.f32 %v3673_v29, %v6628_v59  ;;  %v5366_v5 = vadd.f32 %v3744_v18, %v6638_v2 }
 0xe52   :  { %v4208_v14 = vmul.f32 -1.442695, %v5349_v62  ;;  %v4210_v22 = vmul.f32 -1.442695, %v5365_v20 }
 0xe53   :  { %v4209_v27 = vmul.f32 -1.442695, %v5350_v21 }
 0xe54   :  { %5651 = vpow2.f32 %v4208_v14 }
 0xe55   :  { %5653 = vpow2.f32 %v4209_v27 }
 0xe56   :  { %5655 = vtanh.f32 %v5366_v5 }
 0xe57   :  { %5657 = vpow2.f32 %v4210_v22 }
 0xe5e   :  { %v5652_v41 = vpop.eup %5651 }
 0xe5f   :  { %v3760_v39 = vadd.f32 1.0, %v5652_v41  ;;  %v5654_v47 = vpop.eup %5653 }
 0xe60   :  { %v3761_v53 = vadd.f32 1.0, %v5654_v47  ;;  %v5656_v6 = vpop.eup %5655  ;;  %v4217_v47 = vld [vmem:[%s6909_s7] ss:$0 sm:$0xff] }
 0xe61   :  { %5659 = vrcp.f32 %v3760_v39  ;;  %v5658_v35 = vpop.eup %5657 }
 0xe62   :  { %5661 = vrcp.f32 %v3761_v53  ;;  %v3762_v37 = vadd.f32 1.0, %v5658_v35  ;;  %v4218_v35 = vld [vmem:[#allocation5] ss:$0 sm:$0xff] }
 0xe64   :  { %5663 = vrcp.f32 %v3762_v37 }
 0xe6b   :  { %v5660_v44 = vpop.eup %5659 }
 0xe6c   :  { %v3771_v7 = vmul.f32 %v5660_v44, %v5656_v6  ;;  %v5662_v51 = vpop.eup %5661 }
 0xe6d   :  { %v3770_v10 = vmul.f32 %v5662_v51, %v6810_v56 }
 0xe6e   :  { %v5664_v49 = vpop.eup %5663 }
 0xe6f   :  { %v6852_v13 = vadd.f32 %v3771_v7, %v3770_v10 }
 0xe71   :  { %5665 = vtanh.f32 %v6852_v13 }
 0xe7b   :  { %v5666_v11 = vpop.eup %5665 }
 0xe7c   :  { %v3774_v32 = vmul.f32 %v5666_v11, %v5664_v49 }
 0xe7e   :  { %3844 = vmatmul.mubr.f32.vlgmr.msra.gmra.mrb[28].mxu0 %v3774_v32  ;;  %3915 = vmatmul.mubr.f32.vlgmr.msra.gmra.mrb[28].mxu1 %v3774_v32 }
 0xe7f   :  { %5246 = vmatpush1.bf16.msra.mxu0 %v6482_v57  ;;  %5278 = vmatpush1.bf16.msra.mxu1 %v6485_v4 }
 0xe80   :  { %5248 = vmatprep.subr.bf16.mxu0 %v6490_v19  ;;  %5280 = vmatprep.subr.bf16.mxu1 %v6492_v61 }
 0xe81   :  { %4017 = vmatprep.mubr.f32.mxu0 %v5774_v1  ;;  %4088 = vmatprep.mubr.f32.mxu1 %v5774_v1 }
 0xe83   :  { %5250 = vmatpush1.bf16.msra.mxu0 %v6494_v58  ;;  %5282 = vmatpush1.bf16.msra.mxu1 %v6497_v31 }
 0xe84   :  { %5252 = vmatprep.subr.bf16.mxu0 %v6502_v12  ;;  %5284 = vmatprep.subr.bf16.mxu1 %v6504_v45 }
 0xe87   :  { %5254 = vmatpush1.bf16.msra.mxu0 %v6506_v55  ;;  %5286 = vmatpush1.bf16.msra.mxu1 %v6509_v25 }
 0xe88   :  { %5256 = vmatprep.subr.bf16.mxu0 %v6514_v3  ;;  %5288 = vmatprep.subr.bf16.mxu1 %v6516_v54 }
 0xe8b   :  { %5258 = vmatpush1.bf16.msra.mxu0 %v6518_v8  ;;  %5290 = vmatpush1.bf16.msra.mxu1 %v6521_v50 }
 0xe8c   :  { %5260 = vmatprep.subr.bf16.mxu0 %v6526_v40  ;;  %5292 = vmatprep.subr.bf16.mxu1 %v6528_v52 }
 0xe8f   :  { %5262 = vmatpush1.bf16.msra.mxu0 %v6530_v28  ;;  %5294 = vmatpush1.bf16.msra.mxu1 %v6533_v15 }
 0xe90   :  { %5264 = vmatprep.subr.bf16.mxu0 %v6537_v34  ;;  %5296 = vmatprep.subr.bf16.mxu1 %v6539_v23 }
 0xe93   :  { %5266 = vmatpush1.bf16.msra.mxu0 %v6542_v33  ;;  %5298 = vmatpush1.bf16.msra.mxu1 %v6546_v36 }
 0xe94   :  { %5268 = vmatprep.subr.bf16.mxu0 %v6548_v42  ;;  %5300 = vmatprep.subr.bf16.mxu1 %v6550_v60 }
 0xe97   :  { %5270 = vmatpush1.bf16.msra.mxu0 %v6553_v43  ;;  %5302 = vmatpush1.bf16.msra.mxu1 %v6557_v9 }
 0xe98   :  { %5272 = vmatprep.subr.bf16.mxu0 %v6562_v46  ;;  %5304 = vmatprep.subr.bf16.mxu1 %v6564_v38 }
 0xe9b   :  { %5274 = vmatpush1.bf16.msra.mxu0 %v6566_v17  ;;  %5306 = vmatpush1.bf16.msra.mxu1 %v6569_v30 }
 0xf51   :  { %v3845_v1 = vpop.f32.mrb[28].mxu0  ;;  %v3916_v57 = vpop.f32.mrb[28].mxu1 }
 0xf52   :  { %v5351_v4 = vadd.f32 %v3845_v1, %v6624_v48  ;;  %v3847_v19 = vpop.f32.mrb[29].mxu0  ;;  %v3918_v61 = vpop.f32.mrb[29].mxu1  ;;  %v5367_v45 = vadd.f32 %v3916_v57, %v6634_v16 }
 0xf53   :  { %v5352_v58 = vadd.f32 %v3847_v19, %v6628_v59  ;;  %v5368_v55 = vadd.f32 %v3918_v61, %v6638_v2 }
 0xf54   :  { %v4211_v31 = vmul.f32 -1.442695, %v5351_v4  ;;  %v4213_v25 = vmul.f32 -1.442695, %v5367_v45 }
 0xf55   :  { %v4212_v12 = vmul.f32 -1.442695, %v5352_v58 }
 0xf56   :  { %5667 = vpow2.f32 %v4211_v31 }
 0xf57   :  { %5669 = vpow2.f32 %v4212_v12 }
 0xf58   :  { %5671 = vtanh.f32 %v5368_v55 }
 0xf59   :  { %5673 = vpow2.f32 %v4213_v25 }
 0xf60   :  { %v5668_v3 = vpop.eup %5667 }
 0xf61   :  { %v3934_v54 = vadd.f32 1.0, %v5668_v3  ;;  %v5670_v8 = vpop.eup %5669 }
 0xf62   :  { %v3935_v50 = vadd.f32 1.0, %v5670_v8  ;;  %v5672_v40 = vpop.eup %5671 }
 0xf63   :  { %5675 = vrcp.f32 %v3934_v54  ;;  %v5674_v52 = vpop.eup %5673 }
 0xf64   :  { %5677 = vrcp.f32 %v3935_v50  ;;  %v3936_v23 = vadd.f32 1.0, %v5674_v52 }
 0xf66   :  { %5679 = vrcp.f32 %v3936_v23 }
 0xf6d   :  { %v5676_v28 = vpop.eup %5675 }
 0xf6e   :  { %v3945_v15 = vmul.f32 %v5676_v28, %v5672_v40  ;;  %v5678_v34 = vpop.eup %5677 }
 0xf6f   :  { %v3944_v33 = vmul.f32 %v5678_v34, %v6852_v13 }
 0xf70   :  { %v5680_v42 = vpop.eup %5679 }
 0xf71   :  { %v3946_v36 = vadd.f32 %v3945_v15, %v3944_v33 }
 0xf73   :  { %5681 = vtanh.f32 %v3946_v36 }
 0xf7d   :  { %v5682_v60 = vpop.eup %5681 }
 0xf7e   :  { %v3948_v43 = vmul.f32 %v5682_v60, %v5680_v42 }
 0xf80   :  { %4018 = vmatmul.mubr.f32.vlgmr.msra.gmra.mrb[30].mxu0 %v3948_v43  ;;  %4089 = vmatmul.mubr.f32.vlgmr.msra.gmra.mrb[30].mxu1 %v3948_v43 }
0x1053   :  { %v4019_v9 = vpop.f32.mrb[30].mxu0  ;;  %v4090_v46 = vpop.f32.mrb[30].mxu1 }
0x1054   :  { %v5353_v38 = vadd.f32 %v4019_v9, %v6624_v48  ;;  %v4021_v17 = vpop.f32.mrb[31].mxu0  ;;  %v4092_v30 = vpop.f32.mrb[31].mxu1  ;;  %v5369_v0 = vadd.f32 %v4090_v46, %v6634_v16 }
0x1055   :  { %v5354_v56 = vadd.f32 %v4021_v17, %v6628_v59  ;;  %v5370_v24 = vadd.f32 %v4092_v30, %v6638_v2 }
0x1056   :  { %v4214_v63 = vmul.f32 -1.442695, %v5353_v38  ;;  %v4216_v62 = vmul.f32 -1.442695, %v5369_v0 }
0x1057   :  { %v4215_v26 = vmul.f32 -1.442695, %v5354_v56 }
0x1058   :  { %5683 = vpow2.f32 %v4214_v63 }
0x1059   :  { %5685 = vpow2.f32 %v4215_v26 }
0x105a   :  { %5687 = vtanh.f32 %v5370_v24 }
0x105b   :  { %5689 = vpow2.f32 %v4216_v62 }
0x1062   :  { %v5684_v29 = vpop.eup %5683 }
0x1063   :  { %v4108_v18 = vadd.f32 1.0, %v5684_v29  ;;  %v5686_v21 = vpop.eup %5685 }
0x1064   :  { %v4109_v48 = vadd.f32 1.0, %v5686_v21  ;;  %v5688_v14 = vpop.eup %5687 }
0x1065   :  { %5691 = vrcp.f32 %v4108_v18  ;;  %v5690_v27 = vpop.eup %5689 }
0x1066   :  { %5693 = vrcp.f32 %v4109_v48  ;;  %v4110_v22 = vadd.f32 1.0, %v5690_v27 }
0x1068   :  { %5695 = vrcp.f32 %v4110_v22 }
0x106f   :  { %v5692_v59 = vpop.eup %5691 }
0x1070   :  { %v4119_v20 = vmul.f32 %v5692_v59, %v5688_v14  ;;  %v5694_v5 = vpop.eup %5693 }
0x1071   :  { %v4118_v41 = vmul.f32 %v5694_v5, %v3946_v36 }
0x1072   :  { %v5696_v16 = vpop.eup %5695 }
0x1073   :  { %v4120_v39 = vadd.f32 %v4119_v20, %v4118_v41 }
0x1075   :  { %5697 = vtanh.f32 %v4120_v39 }
0x107f   :  { %v5698_v2 = vpop.eup %5697 }
0x1080   :  { %v4122_v53 = vmul.f32 %v5698_v2, %v5696_v16 }
0x1082   :  { %v4130_v6 = vmul.f32 %v4217_v47, %v4122_v53 }
0x1084   :  { %4131 = vadd.xlane.f32.xlu0 %v4130_v6 }
0x1111   :  { %v4132_v44 = vpop.xlane.xlu0 %4131 }
0x1112   :  { %v4140_v7 = vadd.f32 %v4218_v35, %v4132_v44 }
0x1114   :  { %4142 = vst.msk [vmem:[%s6911_s9] sm:$0xff] %vm4141_vm2, %v4140_v7 }
0x1115   :  { %4147 = vsyncpa [#allocation7], 1 }
0x1116   :  { %4148 = vsyncpa [#allocation9], 1 }

</bundles_post_ra>
